<compile_context>
chip_gen: v7x
topology: tpu7x:2x2x1
jax: 0.10.0
libtpu: 0.0.40
codegen_flags: <defaults>
</compile_context>

<pallas_src>
import numpy as np
import jax
import jax.numpy as jnp
from jax import lax
from jax.experimental import pallas as pl
from jax.experimental.pallas import tpu as pltpu


# Hyperparameters of BackBoneNet_{s,t}_shallow (conv1 width, avgpool, conv3).
_S_CFG = dict(K1=20, pool_k=20, pool_s=8, K3=4, conv3_s=8)   # spatial regions
_T_CFG = dict(K1=15, pool_k=20, pool_s=2, K3=12, conv3_s=4)  # temporal regions
_BN_EPS = 1e-5
_LANE = 128     # lane granule for the T1 (time) axis
_SUB = 16       # bf16 sublane-tile granule for the channel axis


def _round_up(x, m):
    return -(-x // m) * m


# ----------------------------------------------------------------------------
# Fused region-group kernel: one grid step = one region, whole batch in-block.
# ----------------------------------------------------------------------------
def _region_group_kernel(xg_ref, w12_ref, b12_ref, pcat_ref, out_ref):
    """
    xg_ref  : (B, ch_pad, T_pad)  bf16  raw region input (channels/time zero-padded)
    w12_ref : (20, K1*ch_pad)     bf16  conv1*conv2 weights with BN(eval) scale folded in
    b12_ref : (20, 1)             f32   fused bias (conv1 bias through conv2 + BN shift)
    pcat_ref: (T1_pad, K3*L3)     f32   avgpool + conv3-tap-gather matrix (rows >= T1 are 0)
    out_ref : (B, 20, K3*L3)      f32   z[b, c, k*L3+q] = pooled[b, c, q*s3 + k]
    """
    B, ch_pad, Tp = xg_ref.shape
    Kc = w12_ref.shape[1]
    K1 = Kc // ch_pad
    T1p = pcat_ref.shape[0]

    w12 = w12_ref[...]
    b12 = b12_ref[...]
    pcat = pcat_ref[...]

    def body(b, carry):
        x = xg_ref[b]                                             # (ch_pad, Tp) bf16
        # In-kernel im2col: slab row k*ch_pad + c holds x[c, t + k].  Every piece is
        # sublane-tile aligned because ch_pad is a multiple of 16.
        slab = jnp.concatenate([x[:, k:k + T1p] for k in range(K1)], axis=0)
        # conv1 + conv2 + BatchNorm(eval) as ONE deep-contraction bf16 MXU matmul.
        yT = jnp.dot(w12, slab, preferred_element_type=jnp.float32) + b12   # (20, T1p)
        yT = jnp.maximum(yT, 0.0)                                 # ReLU
        # dropout -> identity (inference)
        # AvgPool2d((1,pk),(1,ps)) + conv3 tap gather folded into one f32 matmul
        # against a constant; padded (garbage) yT columns hit zero pcat rows.
        out_ref[b] = jnp.dot(yT, pcat, preferred_element_type=jnp.float32)  # (20, K3*L3)
        return carry

    lax.fori_loop(0, B, body, 0, unroll=True)


def _region_group_forward(xg, w12, b12, pcat):
    """xg: (B, R, ch_pad, T_pad) bf16 -> z: (B, R, 20, K3*L3) f32 for all R regions."""
    B, R, ch_pad, Tp = xg.shape
    Kc = w12.shape[2]
    T1p, KL = pcat.shape
    assert Tp == T1p + Kc // ch_pad - 1

    flops = 2 * B * R * 20 * (Kc * T1p + T1p * KL)
    bytes_accessed = (B * R * ch_pad * Tp * 2 + R * 20 * Kc * 2 + R * 20 * 4
                      + T1p * KL * 4 + B * R * 20 * KL * 4)
    return pl.pallas_call(
        _region_group_kernel,
        out_shape=jax.ShapeDtypeStruct((B, R, 20, KL), jnp.float32),
        grid=(R,),
        in_specs=[
            pl.BlockSpec((B, None, ch_pad, Tp), lambda r: (0, r, 0, 0)),
            pl.BlockSpec((None, 20, Kc), lambda r: (r, 0, 0)),
            pl.BlockSpec((None, 20, 1), lambda r: (r, 0, 0)),
            pl.BlockSpec((T1p, KL), lambda r: (0, 0)),
        ],
        out_specs=pl.BlockSpec((B, None, 20, KL), lambda r: (0, r, 0, 0)),
        compiler_params=pltpu.CompilerParams(
            dimension_semantics=("parallel",)),
        cost_estimate=pl.CostEstimate(flops=flops, transcendentals=0,
                                      bytes_accessed=bytes_accessed),
    )(xg, w12, b12, pcat)


# ----------------------------------------------------------------------------
# Host-side constants and XLA-side glue.
# ----------------------------------------------------------------------------
def _pool_conv3_matrix(T1, T1_pad, pk, ps, K3, s3):
    """Pcat[t, k*L3 + q] = avgpool weight feeding pooled position q*s3+k (conv3 tap k)."""
    L2 = (T1 - pk) // ps + 1
    L3 = (L2 - K3) // s3 + 1
    P = np.zeros((T1_pad, K3 * L3), np.float32)
    for k in range(K3):
        for q in range(L3):
            p = q * s3 + k
            P[p * ps:p * ps + pk, k * L3 + q] = 1.0 / pk
    return jnp.asarray(P), L3


def _slice_regions(x, kind, idx_lists):
    """x: (B, C, T) -> (B, R, ch, T_region); lax.slice for contiguous index lists."""
    axis = 1 if kind == 's' else 2
    parts = []
    for idx in idx_lists:
        ia = np.asarray(idx)
        if ia.size and np.array_equal(ia, np.arange(ia[0], ia[0] + ia.size)):
            parts.append(lax.slice_in_dim(x, int(ia[0]), int(ia[0]) + ia.size, axis=axis))
        else:
            parts.append(jnp.take(x, jnp.asarray(ia), axis=axis))
    return jnp.stack(parts, axis=1)


def _prep_group_input(x, g):
    """Slice, zero-pad channels/time to hardware granules and cast to bf16."""
    xg = _slice_regions(x, g['kind'], g['idx_lists']).astype(jnp.float32)
    pad_c = g['ch_pad'] - xg.shape[2]
    pad_t = g['T_pad'] - xg.shape[3]
    if pad_c or pad_t:
        xg = jnp.pad(xg, ((0, 0), (0, 0), (0, pad_c), (0, pad_t)))
    return xg.astype(jnp.bfloat16)


# ----------------------------------------------------------------------------
# Parameter init (deterministic) + folding.
# ----------------------------------------------------------------------------
def _init_region_raw(key, ch, K1, K3):
    ks = jax.random.split(key, 9)
    return dict(
        w1=0.1 * jax.random.normal(ks[0], (10, K1), jnp.float32),       # conv1 (out, kw)
        b1=0.1 * jax.random.normal(ks[1], (10,), jnp.float32),
        w2=0.1 * jax.random.normal(ks[2], (20, 10, ch), jnp.float32),   # conv2 (out, in, kh)
        gamma=1.0 + 0.1 * jax.random.normal(ks[3], (20,), jnp.float32),
        beta=0.1 * jax.random.normal(ks[4], (20,), jnp.float32),
        mean=0.1 * jax.random.normal(ks[5], (20,), jnp.float32),
        var=1.0 + 0.1 * jax.random.uniform(ks[6], (20,), dtype=jnp.float32),
        w3=0.1 * jax.random.normal(ks[7], (10, 20, K3), jnp.float32),   # conv3 (out, in, kw)
        b3=0.1 * jax.random.normal(ks[8], (10,), jnp.float32),
    )


def _fold_conv12_bn(raw, ch_pad, eps=_BN_EPS):
    """conv1 -> conv2 -> BN(eval) folded into one (20, K1*ch_pad) bf16 weight + f32 bias."""
    hi = lax.Precision.HIGHEST
    w1, b1, w2 = raw['w1'], raw['b1'], raw['w2']
    ch, K1 = w2.shape[2], w1.shape[1]
    weff = jnp.einsum('omc,mk->ock', w2, w1, precision=hi)     # (20, ch, K1)
    beff = jnp.einsum('omc,m->o', w2, b1, precision=hi)        # (20,)
    s = raw['gamma'] / jnp.sqrt(raw['var'] + eps)
    t = raw['beta'] - raw['mean'] * s
    w12 = jnp.transpose(s[:, None, None] * weff, (0, 2, 1))    # (20, K1, ch)
    w12 = jnp.pad(w12, ((0, 0), (0, 0), (0, ch_pad - ch)))     # zero padded channels
    w12 = w12.reshape(20, K1 * ch_pad)                         # [o, k*ch_pad + c]
    b12 = (s * beff + t)[:, None]                              # (20, 1)
    return w12.astype(jnp.bfloat16), b12


def _fold_conv3_into_fc(raw, fc_rows_region, K3, L3):
    """Fold conv3 weights/bias into the fc1 rows of one region.

    F'[c*K3*L3 + k*L3 + q, n] = sum_o w3[o, c, k] * fc[o*L3 + q, n]
    bias_c[n]                 = sum_{o,q} b3[o] * fc[o*L3 + q, n]
    """
    hi = lax.Precision.HIGHEST
    fcq = fc_rows_region.reshape(10, L3, -1)                   # (o, q, n)
    Ff = jnp.einsum('ock,oqn->ckqn', raw['w3'], fcq, precision=hi)
    Ff = Ff.reshape(20 * K3 * L3, -1)                          # matches z flatten order
    bias_c = jnp.einsum('o,oqn->n', raw['b3'], fcq, precision=hi)
    return Ff, bias_c


def build_blacknet(key, spatial_div, temporal_div, nb_class, T_in):
    # Regions in the fusion order used by BlackNet: spatial first, then temporal.
    regions = []
    for rk in spatial_div:
        idx = list(spatial_div[rk])
        regions.append(dict(kind='s', idx=idx, ch=len(idx), T=T_in, **_S_CFG))
    for rk in temporal_div:
        idx = list(temporal_div[rk])
        regions.append(dict(kind='t', idx=idx, ch=20, T=len(idx), **_T_CFG))

    keys = jax.random.split(key, len(regions) + 1)
    raws, feat_offsets, total_feats = [], [], 0
    for r, rk in zip(regions, keys[:-1]):
        raws.append(_init_region_raw(rk, ch=r['ch'], K1=r['K1'], K3=r['K3']))
        T1 = r['T'] - r['K1'] + 1
        L2 = (T1 - r['pool_k']) // r['pool_s'] + 1
        L3 = (L2 - r['K3']) // r['conv3_s'] + 1
        r['T1'], r['L3'] = T1, L3
        r['T1_pad'] = _round_up(T1, _LANE)
        r['T_pad'] = r['T1_pad'] + r['K1'] - 1
        r['ch_pad'] = _round_up(r['ch'], _SUB)
        feat_offsets.append(total_feats)
        total_feats += 10 * L3                                 # 60 per region in the spec

    kw, kb = jax.random.split(keys[-1])
    fc_w = 0.1 * jax.random.normal(kw, (nb_class, total_feats), jnp.float32)
    fc_b = 0.1 * jax.random.normal(kb, (nb_class,), jnp.float32)
    fc_wT = fc_w.T                                             # (total_feats, nb_class)

    # Group regions sharing a kernel shape so each group is a single pallas_call;
    # fc rows are permuted / conv3-folded at build time to match the group layout.
    groups, sig2gid = [], {}
    for pos, (r, raw) in enumerate(zip(regions, raws)):
        sig = (r['kind'], r['ch'], r['T'])
        if sig not in sig2gid:
            sig2gid[sig] = len(groups)
            groups.append(dict(cfg=r, idx_lists=[], raws=[], fc_slices=[]))
        g = groups[sig2gid[sig]]
        g['idx_lists'].append(r['idx'])
        g['raws'].append(raw)
        g['fc_slices'].append(fc_wT[feat_offsets[pos]:feat_offsets[pos] + 10 * r['L3']])

    fc_b_eff = fc_b[None, :]
    model_groups = []
    for g in groups:
        cfg = g['cfg']
        folded = [_fold_conv12_bn(raw, cfg['ch_pad']) for raw in g['raws']]
        pcat, _ = _pool_conv3_matrix(cfg['T1'], cfg['T1_pad'], cfg['pool_k'],
                                     cfg['pool_s'], cfg['K3'], cfg['conv3_s'])
        fc_rows = []
        for raw, fcs in zip(g['raws'], g['fc_slices']):
            Ff, bias_c = _fold_conv3_into_fc(raw, fcs, cfg['K3'], cfg['L3'])
            fc_rows.append(Ff)
            fc_b_eff = fc_b_eff + bias_c[None, :]
        model_groups.append(dict(
            kind=cfg['kind'], idx_lists=g['idx_lists'],
            ch_pad=cfg['ch_pad'], T_pad=cfg['T_pad'],
            w12=jnp.stack([f[0] for f in folded]),             # (R, 20, K1*ch_pad) bf16
            b12=jnp.stack([f[1] for f in folded]),             # (R, 20, 1) f32
            pcat=pcat,                                         # (T1_pad, K3*L3) f32
            fc_rows=jnp.concatenate(fc_rows, axis=0)))         # (R*20*K3*L3, nb_class)

    return dict(groups=model_groups, fc_b=fc_b[None, :], fc_b_eff=fc_b_eff,
                fc_wT=fc_wT, regions=regions, raws=raws)


# ----------------------------------------------------------------------------
# BlackNet forward.
# ----------------------------------------------------------------------------
def blacknet_forward(x, model):
    B = x.shape[0]
    logits = model['fc_b_eff']                                 # fc bias + folded conv3 biases
    for g in model['groups']:
        xg = _prep_group_input(x, g)                           # (B, R, ch_pad, T_pad) bf16
        z = _region_group_forward(xg, g['w12'], g['b12'], g['pcat'])   # (B, R, 20, K3*L3)
        feats = z.reshape(B, -1)                               # row-major flatten (free)
        logits = logits + jnp.dot(feats, g['fc_rows'],
                                  precision=lax.Precision.HIGHEST)     # conv3+fc1 (XLA)
    return logits


# ----------------------------------------------------------------------------
# Pure-JAX reference (from the raw, unfolded parameters) for validation.
# ----------------------------------------------------------------------------
def _reference_region(x, raw, cfg, eps=_BN_EPS):
    B, ch, T = x.shape
    K1, pk, ps, K3, s3 = cfg['K1'], cfg['pool_k'], cfg['pool_s'], cfg['K3'], cfg['conv3_s']
    T1 = T - K1 + 1
    hi = lax.Precision.HIGHEST
    xw = jnp.stack([x[:, :, k:k + T1] for k in range(K1)], axis=-1)       # (B, ch, T1, K1)
    c1 = jnp.einsum('bctk,mk->bmct', xw, raw['w1'], precision=hi) \
        + raw['b1'][None, :, None, None]                                  # (B, 10, ch, T1)
    c2 = jnp.einsum('bmct,omc->bot', c1, raw['w2'], precision=hi)         # (B, 20, T1)
    s = raw['gamma'] / jnp.sqrt(raw['var'] + eps)
    t = raw['beta'] - raw['mean'] * s
    y = jnp.maximum(c2 * s[None, :, None] + t[None, :, None], 0.0)
    L2 = (T1 - pk) // ps + 1
    pooled = jnp.stack([y[:, :, p * ps:p * ps + pk].mean(axis=-1)
                        for p in range(L2)], axis=-1)                     # (B, 20, L2)
    L3 = (L2 - K3) // s3 + 1
    pw = jnp.stack([pooled[:, :, q * s3:q * s3 + K3] for q in range(L3)], axis=-1)
    c3 = jnp.einsum('bckq,ock->boq', pw, raw['w3'], precision=hi) \
        + raw['b3'][None, :, None]                                        # (B, 10, L3)
    return c3.reshape(B, -1)


def _reference_forward(x, model):
    feats = []
    for r, raw in zip(model['regions'], model['raws']):
        xr = x[:, jnp.asarray(r['idx']), :] if r['kind'] == 's' else x[:, :, jnp.asarray(r['idx'])]
        feats.append(_reference_region(xr, raw, r))
    fusion = jnp.concatenate(feats, axis=1)
    return jnp.dot(fusion, model['fc_wT'], precision=lax.Precision.HIGHEST) + model['fc_b']


if __name__ == "__main__":
    key = jax.random.PRNGKey(0)
    B, C, T = 2, 20, 400          # smallest shapes consistent with the module (60 feats/region)
    nb_class = 4
    spatial_div = {0: list(range(0, 10)), 1: list(range(10, 20))}
    temporal_div = {0: list(range(0, 100)), 1: list(range(100, 200)),
                    2: list(range(200, 300)), 3: list(range(300, 400))}

    kx, kp = jax.random.split(key)
    x = jax.random.normal(kx, (B, C, T), dtype=jnp.float32)
    model = build_blacknet(kp, spatial_div, temporal_div, nb_class, T_in=T)

    fwd = jax.jit(lambda xv: blacknet_forward(xv, model))
    out = jax.block_until_ready(fwd(x))

    assert out.shape == (B, nb_class), out.shape
    assert bool(jnp.all(jnp.isfinite(out)))

    ref = jax.block_until_ready(_reference_forward(x, model))
    np.testing.assert_allclose(np.asarray(out), np.asarray(ref), rtol=5e-2, atol=5e-2)

    print("KERNEL_OK")
</pallas_src>

<mosaic_0001>
module attributes {stable_mosaic.version = 11 : i64} {
  func.func @_region_group_kernel(%arg0: i32, %arg1: memref<2x1x16x403xbf16, #tpu.memory_space<vmem>>, %arg2: memref<1x20x320xbf16, #tpu.memory_space<vmem>>, %arg3: memref<1x20x1xf32, #tpu.memory_space<vmem>>, %arg4: memref<384x24xf32, #tpu.memory_space<vmem>>, %arg5: memref<2x1x20x24xf32, #tpu.memory_space<vmem>>) attributes {dimension_semantics = [#tpu.dimension_semantics<parallel>], iteration_bounds = array<i64: 2>, scalar_prefetch = 0 : i64, scratch_operands = 0 : i64, tpu.core_type = #tpu.core_type<tc>, window_params = [{transform_indices = @transform_0, window_bounds = array<i64: 2, 1, 16, 403>}, {transform_indices = @transform_1, window_bounds = array<i64: 1, 20, 320>}, {transform_indices = @transform_2, window_bounds = array<i64: 1, 20, 1>}, {pipeline_mode = #tpu.pipeline_mode<synchronous>, transform_indices = @transform_3, window_bounds = array<i64: 384, 24>}, {transform_indices = @transform_4, window_bounds = array<i64: 2, 1, 20, 24>}]} {
    %c0 = arith.constant 0 : index
    %c0_0 = arith.constant 0 : index
    %c0_1 = arith.constant 0 : index
    %0 = vector.load %arg2[%c0, %c0_0, %c0_1] : memref<1x20x320xbf16, #tpu.memory_space<vmem>>, vector<1x20x320xbf16>
    %1 = vector.shape_cast %0 : vector<1x20x320xbf16> to vector<20x320xbf16>
    %c0_2 = arith.constant 0 : index
    %c0_3 = arith.constant 0 : index
    %c0_4 = arith.constant 0 : index
    %2 = vector.load %arg3[%c0_2, %c0_3, %c0_4] : memref<1x20x1xf32, #tpu.memory_space<vmem>>, vector<1x20x1xf32>
    %3 = vector.shape_cast %2 : vector<1x20x1xf32> to vector<20x1xf32>
    %c0_5 = arith.constant 0 : index
    %c0_6 = arith.constant 0 : index
    %4 = vector.load %arg4[%c0_5, %c0_6] : memref<384x24xf32, #tpu.memory_space<vmem>>, vector<384x24xf32>
    %c0_i32 = arith.constant 0 : i32
    %5 = arith.index_cast %c0_i32 : i32 to index
    %c0_7 = arith.constant 0 : index
    %c0_8 = arith.constant 0 : index
    %c0_9 = arith.constant 0 : index
    %6 = vector.load %arg1[%5, %c0_7, %c0_8, %c0_9] : memref<2x1x16x403xbf16, #tpu.memory_space<vmem>>, vector<1x1x16x403xbf16>
    %7 = vector.shape_cast %6 : vector<1x1x16x403xbf16> to vector<16x403xbf16>
    %8 = vector.extract_strided_slice %7 {offsets = [0, 0], sizes = [16, 384], strides = [1, 1]} : vector<16x403xbf16> to vector<16x384xbf16>
    %9 = vector.extract_strided_slice %7 {offsets = [0, 1], sizes = [16, 384], strides = [1, 1]} : vector<16x403xbf16> to vector<16x384xbf16>
    %10 = vector.extract_strided_slice %7 {offsets = [0, 2], sizes = [16, 384], strides = [1, 1]} : vector<16x403xbf16> to vector<16x384xbf16>
    %11 = vector.extract_strided_slice %7 {offsets = [0, 3], sizes = [16, 384], strides = [1, 1]} : vector<16x403xbf16> to vector<16x384xbf16>
    %12 = vector.extract_strided_slice %7 {offsets = [0, 4], sizes = [16, 384], strides = [1, 1]} : vector<16x403xbf16> to vector<16x384xbf16>
    %13 = vector.extract_strided_slice %7 {offsets = [0, 5], sizes = [16, 384], strides = [1, 1]} : vector<16x403xbf16> to vector<16x384xbf16>
    %14 = vector.extract_strided_slice %7 {offsets = [0, 6], sizes = [16, 384], strides = [1, 1]} : vector<16x403xbf16> to vector<16x384xbf16>
    %15 = vector.extract_strided_slice %7 {offsets = [0, 7], sizes = [16, 384], strides = [1, 1]} : vector<16x403xbf16> to vector<16x384xbf16>
    %16 = vector.extract_strided_slice %7 {offsets = [0, 8], sizes = [16, 384], strides = [1, 1]} : vector<16x403xbf16> to vector<16x384xbf16>
    %17 = vector.extract_strided_slice %7 {offsets = [0, 9], sizes = [16, 384], strides = [1, 1]} : vector<16x403xbf16> to vector<16x384xbf16>
    %18 = vector.extract_strided_slice %7 {offsets = [0, 10], sizes = [16, 384], strides = [1, 1]} : vector<16x403xbf16> to vector<16x384xbf16>
    %19 = vector.extract_strided_slice %7 {offsets = [0, 11], sizes = [16, 384], strides = [1, 1]} : vector<16x403xbf16> to vector<16x384xbf16>
    %20 = vector.extract_strided_slice %7 {offsets = [0, 12], sizes = [16, 384], strides = [1, 1]} : vector<16x403xbf16> to vector<16x384xbf16>
    %21 = vector.extract_strided_slice %7 {offsets = [0, 13], sizes = [16, 384], strides = [1, 1]} : vector<16x403xbf16> to vector<16x384xbf16>
    %22 = vector.extract_strided_slice %7 {offsets = [0, 14], sizes = [16, 384], strides = [1, 1]} : vector<16x403xbf16> to vector<16x384xbf16>
    %23 = vector.extract_strided_slice %7 {offsets = [0, 15], sizes = [16, 384], strides = [1, 1]} : vector<16x403xbf16> to vector<16x384xbf16>
    %24 = vector.extract_strided_slice %7 {offsets = [0, 16], sizes = [16, 384], strides = [1, 1]} : vector<16x403xbf16> to vector<16x384xbf16>
    %25 = vector.extract_strided_slice %7 {offsets = [0, 17], sizes = [16, 384], strides = [1, 1]} : vector<16x403xbf16> to vector<16x384xbf16>
    %26 = vector.extract_strided_slice %7 {offsets = [0, 18], sizes = [16, 384], strides = [1, 1]} : vector<16x403xbf16> to vector<16x384xbf16>
    %27 = vector.extract_strided_slice %7 {offsets = [0, 19], sizes = [16, 384], strides = [1, 1]} : vector<16x403xbf16> to vector<16x384xbf16>
    %28 = tpu.concatenate %8, %9, %10, %11, %12, %13, %14, %15, %16, %17, %18, %19, %20, %21, %22, %23 in 0 : vector<16x384xbf16>, vector<16x384xbf16>, vector<16x384xbf16>, vector<16x384xbf16>, vector<16x384xbf16>, vector<16x384xbf16>, vector<16x384xbf16>, vector<16x384xbf16>, vector<16x384xbf16>, vector<16x384xbf16>, vector<16x384xbf16>, vector<16x384xbf16>, vector<16x384xbf16>, vector<16x384xbf16>, vector<16x384xbf16>, vector<16x384xbf16> -> vector<256x384xbf16>
    %29 = tpu.concatenate %24, %25, %26, %27 in 0 : vector<16x384xbf16>, vector<16x384xbf16>, vector<16x384xbf16>, vector<16x384xbf16> -> vector<64x384xbf16>
    %30 = tpu.concatenate %28, %29 in 0 : vector<256x384xbf16>, vector<64x384xbf16> -> vector<320x384xbf16>
    %cst = arith.constant dense<0.000000e+00> : vector<20x384xf32>
    %31 = tpu.matmul %1, %30, %cst {dimension_numbers = #tpu.dot_dimension_numbers<[1], [0], [0], [1], [0, 0, 1, 1], [], []>} : vector<20x320xbf16>, vector<320x384xbf16>, vector<20x384xf32> -> vector<20x384xf32>
    %32 = vector.broadcast %3 : vector<20x1xf32> to vector<20x384xf32>
    %33 = arith.addf %31, %32 : vector<20x384xf32>
    %cst_10 = arith.constant 0.000000e+00 : f32
    %34 = vector.broadcast %cst_10 : f32 to vector<20x384xf32>
    %35 = arith.maximumf %33, %34 : vector<20x384xf32>
    %cst_11 = arith.constant dense<0.000000e+00> : vector<20x24xf32>
    %36 = tpu.matmul %35, %4, %cst_11 {dimension_numbers = #tpu.dot_dimension_numbers<[1], [0], [0], [1], [0, 0, 1, 1], [], []>} : vector<20x384xf32>, vector<384x24xf32>, vector<20x24xf32> -> vector<20x24xf32>
    %37 = arith.index_cast %c0_i32 : i32 to index
    %c0_12 = arith.constant 0 : index
    %c0_13 = arith.constant 0 : index
    %c0_14 = arith.constant 0 : index
    %38 = vector.load %arg5[%37, %c0_12, %c0_13, %c0_14] : memref<2x1x20x24xf32, #tpu.memory_space<vmem>>, vector<1x1x20x24xf32>
    %39 = vector.shape_cast %38 : vector<1x1x20x24xf32> to vector<20x24xf32>
    %40 = vector.shape_cast %36 : vector<20x24xf32> to vector<1x1x20x24xf32>
    tpu.vector_store %arg5[%37, %c0_12, %c0_13, %c0_14], %40 {strides = array<i32>} : memref<2x1x20x24xf32, #tpu.memory_space<vmem>>, vector<1x1x20x24xf32>,
    %c1_i32 = arith.constant 1 : i32
    %41 = arith.index_cast %c1_i32 : i32 to index
    %c0_15 = arith.constant 0 : index
    %c0_16 = arith.constant 0 : index
    %c0_17 = arith.constant 0 : index
    %42 = vector.load %arg1[%41, %c0_15, %c0_16, %c0_17] : memref<2x1x16x403xbf16, #tpu.memory_space<vmem>>, vector<1x1x16x403xbf16>
    %43 = vector.shape_cast %42 : vector<1x1x16x403xbf16> to vector<16x403xbf16>
    %44 = vector.extract_strided_slice %43 {offsets = [0, 0], sizes = [16, 384], strides = [1, 1]} : vector<16x403xbf16> to vector<16x384xbf16>
    %45 = vector.extract_strided_slice %43 {offsets = [0, 1], sizes = [16, 384], strides = [1, 1]} : vector<16x403xbf16> to vector<16x384xbf16>
    %46 = vector.extract_strided_slice %43 {offsets = [0, 2], sizes = [16, 384], strides = [1, 1]} : vector<16x403xbf16> to vector<16x384xbf16>
    %47 = vector.extract_strided_slice %43 {offsets = [0, 3], sizes = [16, 384], strides = [1, 1]} : vector<16x403xbf16> to vector<16x384xbf16>
    %48 = vector.extract_strided_slice %43 {offsets = [0, 4], sizes = [16, 384], strides = [1, 1]} : vector<16x403xbf16> to vector<16x384xbf16>
    %49 = vector.extract_strided_slice %43 {offsets = [0, 5], sizes = [16, 384], strides = [1, 1]} : vector<16x403xbf16> to vector<16x384xbf16>
    %50 = vector.extract_strided_slice %43 {offsets = [0, 6], sizes = [16, 384], strides = [1, 1]} : vector<16x403xbf16> to vector<16x384xbf16>
    %51 = vector.extract_strided_slice %43 {offsets = [0, 7], sizes = [16, 384], strides = [1, 1]} : vector<16x403xbf16> to vector<16x384xbf16>
    %52 = vector.extract_strided_slice %43 {offsets = [0, 8], sizes = [16, 384], strides = [1, 1]} : vector<16x403xbf16> to vector<16x384xbf16>
    %53 = vector.extract_strided_slice %43 {offsets = [0, 9], sizes = [16, 384], strides = [1, 1]} : vector<16x403xbf16> to vector<16x384xbf16>
    %54 = vector.extract_strided_slice %43 {offsets = [0, 10], sizes = [16, 384], strides = [1, 1]} : vector<16x403xbf16> to vector<16x384xbf16>
    %55 = vector.extract_strided_slice %43 {offsets = [0, 11], sizes = [16, 384], strides = [1, 1]} : vector<16x403xbf16> to vector<16x384xbf16>
    %56 = vector.extract_strided_slice %43 {offsets = [0, 12], sizes = [16, 384], strides = [1, 1]} : vector<16x403xbf16> to vector<16x384xbf16>
    %57 = vector.extract_strided_slice %43 {offsets = [0, 13], sizes = [16, 384], strides = [1, 1]} : vector<16x403xbf16> to vector<16x384xbf16>
    %58 = vector.extract_strided_slice %43 {offsets = [0, 14], sizes = [16, 384], strides = [1, 1]} : vector<16x403xbf16> to vector<16x384xbf16>
    %59 = vector.extract_strided_slice %43 {offsets = [0, 15], sizes = [16, 384], strides = [1, 1]} : vector<16x403xbf16> to vector<16x384xbf16>
    %60 = vector.extract_strided_slice %43 {offsets = [0, 16], sizes = [16, 384], strides = [1, 1]} : vector<16x403xbf16> to vector<16x384xbf16>
    %61 = vector.extract_strided_slice %43 {offsets = [0, 17], sizes = [16, 384], strides = [1, 1]} : vector<16x403xbf16> to vector<16x384xbf16>
    %62 = vector.extract_strided_slice %43 {offsets = [0, 18], sizes = [16, 384], strides = [1, 1]} : vector<16x403xbf16> to vector<16x384xbf16>
    %63 = vector.extract_strided_slice %43 {offsets = [0, 19], sizes = [16, 384], strides = [1, 1]} : vector<16x403xbf16> to vector<16x384xbf16>
    %64 = tpu.concatenate %44, %45, %46, %47, %48, %49, %50, %51, %52, %53, %54, %55, %56, %57, %58, %59 in 0 : vector<16x384xbf16>, vector<16x384xbf16>, vector<16x384xbf16>, vector<16x384xbf16>, vector<16x384xbf16>, vector<16x384xbf16>, vector<16x384xbf16>, vector<16x384xbf16>, vector<16x384xbf16>, vector<16x384xbf16>, vector<16x384xbf16>, vector<16x384xbf16>, vector<16x384xbf16>, vector<16x384xbf16>, vector<16x384xbf16>, vector<16x384xbf16> -> vector<256x384xbf16>
    %65 = tpu.concatenate %60, %61, %62, %63 in 0 : vector<16x384xbf16>, vector<16x384xbf16>, vector<16x384xbf16>, vector<16x384xbf16> -> vector<64x384xbf16>
    %66 = tpu.concatenate %64, %65 in 0 : vector<256x384xbf16>, vector<64x384xbf16> -> vector<320x384xbf16>
    %cst_18 = arith.constant dense<0.000000e+00> : vector<20x384xf32>
    %67 = tpu.matmul %1, %66, %cst_18 {dimension_numbers = #tpu.dot_dimension_numbers<[1], [0], [0], [1], [0, 0, 1, 1], [], []>} : vector<20x320xbf16>, vector<320x384xbf16>, vector<20x384xf32> -> vector<20x384xf32>
    %68 = vector.broadcast %3 : vector<20x1xf32> to vector<20x384xf32>
    %69 = arith.addf %67, %68 : vector<20x384xf32>
    %cst_19 = arith.constant 0.000000e+00 : f32
    %70 = vector.broadcast %cst_19 : f32 to vector<20x384xf32>
    %71 = arith.maximumf %69, %70 : vector<20x384xf32>
    %cst_20 = arith.constant dense<0.000000e+00> : vector<20x24xf32>
    %72 = tpu.matmul %71, %4, %cst_20 {dimension_numbers = #tpu.dot_dimension_numbers<[1], [0], [0], [1], [0, 0, 1, 1], [], []>} : vector<20x384xf32>, vector<384x24xf32>, vector<20x24xf32> -> vector<20x24xf32>
    %73 = arith.index_cast %c1_i32 : i32 to index
    %c0_21 = arith.constant 0 : index
    %c0_22 = arith.constant 0 : index
    %c0_23 = arith.constant 0 : index
    %74 = vector.load %arg5[%73, %c0_21, %c0_22, %c0_23] : memref<2x1x20x24xf32, #tpu.memory_space<vmem>>, vector<1x1x20x24xf32>
    %75 = vector.shape_cast %74 : vector<1x1x20x24xf32> to vector<20x24xf32>
    %76 = vector.shape_cast %72 : vector<20x24xf32> to vector<1x1x20x24xf32>
    tpu.vector_store %arg5[%73, %c0_21, %c0_22, %c0_23], %76 {strides = array<i32>} : memref<2x1x20x24xf32, #tpu.memory_space<vmem>>, vector<1x1x20x24xf32>,
    %c2_i32 = arith.constant 2 : i32
    return
  }
  func.func @transform_0(%arg0: i32) -> (i32, i32, i32, i32) {
    %c0_i32 = arith.constant 0 : i32
    %c0_i32_0 = arith.constant 0 : i32
    %c0_i32_1 = arith.constant 0 : i32
    %c0_i32_2 = arith.constant 0 : i32
    return %c0_i32, %arg0, %c0_i32_0, %c0_i32_1 : i32, i32, i32, i32
  }
  func.func @transform_1(%arg0: i32) -> (i32, i32, i32) {
    %c0_i32 = arith.constant 0 : i32
    %c0_i32_0 = arith.constant 0 : i32
    %c0_i32_1 = arith.constant 0 : i32
    return %arg0, %c0_i32, %c0_i32_0 : i32, i32, i32
  }
  func.func @transform_2(%arg0: i32) -> (i32, i32, i32) {
    %c0_i32 = arith.constant 0 : i32
    %c0_i32_0 = arith.constant 0 : i32
    %c0_i32_1 = arith.constant 0 : i32
    return %arg0, %c0_i32, %c0_i32_0 : i32, i32, i32
  }
  func.func @transform_3(%arg0: i32) -> (i32, i32) {
    %c0_i32 = arith.constant 0 : i32
    %c0_i32_0 = arith.constant 0 : i32
    %c0_i32_1 = arith.constant 0 : i32
    return %c0_i32, %c0_i32_0 : i32, i32
  }
  func.func @transform_4(%arg0: i32) -> (i32, i32, i32, i32) {
    %c0_i32 = arith.constant 0 : i32
    %c0_i32_0 = arith.constant 0 : i32
    %c0_i32_1 = arith.constant 0 : i32
    %c0_i32_2 = arith.constant 0 : i32
    return %c0_i32, %arg0, %c0_i32_0, %c0_i32_1 : i32, i32, i32, i32
  }
}

module attributes {stable_mosaic.version = 11 : i64} {
  func.func @_region_group_kernel(%arg0: i32, %arg1: memref<2x1x32x142xbf16, #tpu.memory_space<vmem>>, %arg2: memref<1x20x480xbf16, #tpu.memory_space<vmem>>, %arg3: memref<1x20x1xf32, #tpu.memory_space<vmem>>, %arg4: memref<128x72xf32, #tpu.memory_space<vmem>>, %arg5: memref<2x1x20x72xf32, #tpu.memory_space<vmem>>) attributes {dimension_semantics = [#tpu.dimension_semantics<parallel>], iteration_bounds = array<i64: 4>, scalar_prefetch = 0 : i64, scratch_operands = 0 : i64, tpu.core_type = #tpu.core_type<tc>, window_params = [{transform_indices = @transform_0, window_bounds = array<i64: 2, 1, 32, 142>}, {transform_indices = @transform_1, window_bounds = array<i64: 1, 20, 480>}, {transform_indices = @transform_2, window_bounds = array<i64: 1, 20, 1>}, {pipeline_mode = #tpu.pipeline_mode<synchronous>, transform_indices = @transform_3, window_bounds = array<i64: 128, 72>}, {transform_indices = @transform_4, window_bounds = array<i64: 2, 1, 20, 72>}]} {
    %c0 = arith.constant 0 : index
    %c0_0 = arith.constant 0 : index
    %c0_1 = arith.constant 0 : index
    %0 = vector.load %arg2[%c0, %c0_0, %c0_1] : memref<1x20x480xbf16, #tpu.memory_space<vmem>>, vector<1x20x480xbf16>
    %1 = vector.shape_cast %0 : vector<1x20x480xbf16> to vector<20x480xbf16>
    %c0_2 = arith.constant 0 : index
    %c0_3 = arith.constant 0 : index
    %c0_4 = arith.constant 0 : index
    %2 = vector.load %arg3[%c0_2, %c0_3, %c0_4] : memref<1x20x1xf32, #tpu.memory_space<vmem>>, vector<1x20x1xf32>
    %3 = vector.shape_cast %2 : vector<1x20x1xf32> to vector<20x1xf32>
    %c0_5 = arith.constant 0 : index
    %c0_6 = arith.constant 0 : index
    %4 = vector.load %arg4[%c0_5, %c0_6] : memref<128x72xf32, #tpu.memory_space<vmem>>, vector<128x72xf32>
    %c0_i32 = arith.constant 0 : i32
    %5 = arith.index_cast %c0_i32 : i32 to index
    %c0_7 = arith.constant 0 : index
    %c0_8 = arith.constant 0 : index
    %c0_9 = arith.constant 0 : index
    %6 = vector.load %arg1[%5, %c0_7, %c0_8, %c0_9] : memref<2x1x32x142xbf16, #tpu.memory_space<vmem>>, vector<1x1x32x142xbf16>
    %7 = vector.shape_cast %6 : vector<1x1x32x142xbf16> to vector<32x142xbf16>
    %8 = vector.extract_strided_slice %7 {offsets = [0, 0], sizes = [32, 128], strides = [1, 1]} : vector<32x142xbf16> to vector<32x128xbf16>
    %9 = vector.extract_strided_slice %7 {offsets = [0, 1], sizes = [32, 128], strides = [1, 1]} : vector<32x142xbf16> to vector<32x128xbf16>
    %10 = vector.extract_strided_slice %7 {offsets = [0, 2], sizes = [32, 128], strides = [1, 1]} : vector<32x142xbf16> to vector<32x128xbf16>
    %11 = vector.extract_strided_slice %7 {offsets = [0, 3], sizes = [32, 128], strides = [1, 1]} : vector<32x142xbf16> to vector<32x128xbf16>
    %12 = vector.extract_strided_slice %7 {offsets = [0, 4], sizes = [32, 128], strides = [1, 1]} : vector<32x142xbf16> to vector<32x128xbf16>
    %13 = vector.extract_strided_slice %7 {offsets = [0, 5], sizes = [32, 128], strides = [1, 1]} : vector<32x142xbf16> to vector<32x128xbf16>
    %14 = vector.extract_strided_slice %7 {offsets = [0, 6], sizes = [32, 128], strides = [1, 1]} : vector<32x142xbf16> to vector<32x128xbf16>
    %15 = vector.extract_strided_slice %7 {offsets = [0, 7], sizes = [32, 128], strides = [1, 1]} : vector<32x142xbf16> to vector<32x128xbf16>
    %16 = vector.extract_strided_slice %7 {offsets = [0, 8], sizes = [32, 128], strides = [1, 1]} : vector<32x142xbf16> to vector<32x128xbf16>
    %17 = vector.extract_strided_slice %7 {offsets = [0, 9], sizes = [32, 128], strides = [1, 1]} : vector<32x142xbf16> to vector<32x128xbf16>
    %18 = vector.extract_strided_slice %7 {offsets = [0, 10], sizes = [32, 128], strides = [1, 1]} : vector<32x142xbf16> to vector<32x128xbf16>
    %19 = vector.extract_strided_slice %7 {offsets = [0, 11], sizes = [32, 128], strides = [1, 1]} : vector<32x142xbf16> to vector<32x128xbf16>
    %20 = vector.extract_strided_slice %7 {offsets = [0, 12], sizes = [32, 128], strides = [1, 1]} : vector<32x142xbf16> to vector<32x128xbf16>
    %21 = vector.extract_strided_slice %7 {offsets = [0, 13], sizes = [32, 128], strides = [1, 1]} : vector<32x142xbf16> to vector<32x128xbf16>
    %22 = vector.extract_strided_slice %7 {offsets = [0, 14], sizes = [32, 128], strides = [1, 1]} : vector<32x142xbf16> to vector<32x128xbf16>
    %23 = tpu.concatenate %8, %9, %10, %11, %12, %13, %14, %15, %16, %17, %18, %19, %20, %21, %22 in 0 : vector<32x128xbf16>, vector<32x128xbf16>, vector<32x128xbf16>, vector<32x128xbf16>, vector<32x128xbf16>, vector<32x128xbf16>, vector<32x128xbf16>, vector<32x128xbf16>, vector<32x128xbf16>, vector<32x128xbf16>, vector<32x128xbf16>, vector<32x128xbf16>, vector<32x128xbf16>, vector<32x128xbf16>, vector<32x128xbf16> -> vector<480x128xbf16>
    %cst = arith.constant dense<0.000000e+00> : vector<20x128xf32>
    %24 = tpu.matmul %1, %23, %cst {dimension_numbers = #tpu.dot_dimension_numbers<[1], [0], [0], [1], [0, 0, 1, 1], [], []>} : vector<20x480xbf16>, vector<480x128xbf16>, vector<20x128xf32> -> vector<20x128xf32>
    %25 = vector.broadcast %3 : vector<20x1xf32> to vector<20x128xf32>
    %26 = arith.addf %24, %25 : vector<20x128xf32>
    %cst_10 = arith.constant 0.000000e+00 : f32
    %27 = vector.broadcast %cst_10 : f32 to vector<20x128xf32>
    %28 = arith.maximumf %26, %27 : vector<20x128xf32>
    %cst_11 = arith.constant dense<0.000000e+00> : vector<20x72xf32>
    %29 = tpu.matmul %28, %4, %cst_11 {dimension_numbers = #tpu.dot_dimension_numbers<[1], [0], [0], [1], [0, 0, 1, 1], [], []>} : vector<20x128xf32>, vector<128x72xf32>, vector<20x72xf32> -> vector<20x72xf32>
    %30 = arith.index_cast %c0_i32 : i32 to index
    %c0_12 = arith.constant 0 : index
    %c0_13 = arith.constant 0 : index
    %c0_14 = arith.constant 0 : index
    %31 = vector.load %arg5[%30, %c0_12, %c0_13, %c0_14] : memref<2x1x20x72xf32, #tpu.memory_space<vmem>>, vector<1x1x20x72xf32>
    %32 = vector.shape_cast %31 : vector<1x1x20x72xf32> to vector<20x72xf32>
    %33 = vector.shape_cast %29 : vector<20x72xf32> to vector<1x1x20x72xf32>
    tpu.vector_store %arg5[%30, %c0_12, %c0_13, %c0_14], %33 {strides = array<i32>} : memref<2x1x20x72xf32, #tpu.memory_space<vmem>>, vector<1x1x20x72xf32>,
    %c1_i32 = arith.constant 1 : i32
    %34 = arith.index_cast %c1_i32 : i32 to index
    %c0_15 = arith.constant 0 : index
    %c0_16 = arith.constant 0 : index
    %c0_17 = arith.constant 0 : index
    %35 = vector.load %arg1[%34, %c0_15, %c0_16, %c0_17] : memref<2x1x32x142xbf16, #tpu.memory_space<vmem>>, vector<1x1x32x142xbf16>
    %36 = vector.shape_cast %35 : vector<1x1x32x142xbf16> to vector<32x142xbf16>
    %37 = vector.extract_strided_slice %36 {offsets = [0, 0], sizes = [32, 128], strides = [1, 1]} : vector<32x142xbf16> to vector<32x128xbf16>
    %38 = vector.extract_strided_slice %36 {offsets = [0, 1], sizes = [32, 128], strides = [1, 1]} : vector<32x142xbf16> to vector<32x128xbf16>
    %39 = vector.extract_strided_slice %36 {offsets = [0, 2], sizes = [32, 128], strides = [1, 1]} : vector<32x142xbf16> to vector<32x128xbf16>
    %40 = vector.extract_strided_slice %36 {offsets = [0, 3], sizes = [32, 128], strides = [1, 1]} : vector<32x142xbf16> to vector<32x128xbf16>
    %41 = vector.extract_strided_slice %36 {offsets = [0, 4], sizes = [32, 128], strides = [1, 1]} : vector<32x142xbf16> to vector<32x128xbf16>
    %42 = vector.extract_strided_slice %36 {offsets = [0, 5], sizes = [32, 128], strides = [1, 1]} : vector<32x142xbf16> to vector<32x128xbf16>
    %43 = vector.extract_strided_slice %36 {offsets = [0, 6], sizes = [32, 128], strides = [1, 1]} : vector<32x142xbf16> to vector<32x128xbf16>
    %44 = vector.extract_strided_slice %36 {offsets = [0, 7], sizes = [32, 128], strides = [1, 1]} : vector<32x142xbf16> to vector<32x128xbf16>
    %45 = vector.extract_strided_slice %36 {offsets = [0, 8], sizes = [32, 128], strides = [1, 1]} : vector<32x142xbf16> to vector<32x128xbf16>
    %46 = vector.extract_strided_slice %36 {offsets = [0, 9], sizes = [32, 128], strides = [1, 1]} : vector<32x142xbf16> to vector<32x128xbf16>
    %47 = vector.extract_strided_slice %36 {offsets = [0, 10], sizes = [32, 128], strides = [1, 1]} : vector<32x142xbf16> to vector<32x128xbf16>
    %48 = vector.extract_strided_slice %36 {offsets = [0, 11], sizes = [32, 128], strides = [1, 1]} : vector<32x142xbf16> to vector<32x128xbf16>
    %49 = vector.extract_strided_slice %36 {offsets = [0, 12], sizes = [32, 128], strides = [1, 1]} : vector<32x142xbf16> to vector<32x128xbf16>
    %50 = vector.extract_strided_slice %36 {offsets = [0, 13], sizes = [32, 128], strides = [1, 1]} : vector<32x142xbf16> to vector<32x128xbf16>
    %51 = vector.extract_strided_slice %36 {offsets = [0, 14], sizes = [32, 128], strides = [1, 1]} : vector<32x142xbf16> to vector<32x128xbf16>
    %52 = tpu.concatenate %37, %38, %39, %40, %41, %42, %43, %44, %45, %46, %47, %48, %49, %50, %51 in 0 : vector<32x128xbf16>, vector<32x128xbf16>, vector<32x128xbf16>, vector<32x128xbf16>, vector<32x128xbf16>, vector<32x128xbf16>, vector<32x128xbf16>, vector<32x128xbf16>, vector<32x128xbf16>, vector<32x128xbf16>, vector<32x128xbf16>, vector<32x128xbf16>, vector<32x128xbf16>, vector<32x128xbf16>, vector<32x128xbf16> -> vector<480x128xbf16>
    %cst_18 = arith.constant dense<0.000000e+00> : vector<20x128xf32>
    %53 = tpu.matmul %1, %52, %cst_18 {dimension_numbers = #tpu.dot_dimension_numbers<[1], [0], [0], [1], [0, 0, 1, 1], [], []>} : vector<20x480xbf16>, vector<480x128xbf16>, vector<20x128xf32> -> vector<20x128xf32>
    %54 = vector.broadcast %3 : vector<20x1xf32> to vector<20x128xf32>
    %55 = arith.addf %53, %54 : vector<20x128xf32>
    %cst_19 = arith.constant 0.000000e+00 : f32
    %56 = vector.broadcast %cst_19 : f32 to vector<20x128xf32>
    %57 = arith.maximumf %55, %56 : vector<20x128xf32>
    %cst_20 = arith.constant dense<0.000000e+00> : vector<20x72xf32>
    %58 = tpu.matmul %57, %4, %cst_20 {dimension_numbers = #tpu.dot_dimension_numbers<[1], [0], [0], [1], [0, 0, 1, 1], [], []>} : vector<20x128xf32>, vector<128x72xf32>, vector<20x72xf32> -> vector<20x72xf32>
    %59 = arith.index_cast %c1_i32 : i32 to index
    %c0_21 = arith.constant 0 : index
    %c0_22 = arith.constant 0 : index
    %c0_23 = arith.constant 0 : index
    %60 = vector.load %arg5[%59, %c0_21, %c0_22, %c0_23] : memref<2x1x20x72xf32, #tpu.memory_space<vmem>>, vector<1x1x20x72xf32>
    %61 = vector.shape_cast %60 : vector<1x1x20x72xf32> to vector<20x72xf32>
    %62 = vector.shape_cast %58 : vector<20x72xf32> to vector<1x1x20x72xf32>
    tpu.vector_store %arg5[%59, %c0_21, %c0_22, %c0_23], %62 {strides = array<i32>} : memref<2x1x20x72xf32, #tpu.memory_space<vmem>>, vector<1x1x20x72xf32>,
    %c2_i32 = arith.constant 2 : i32
    return
  }
  func.func @transform_0(%arg0: i32) -> (i32, i32, i32, i32) {
    %c0_i32 = arith.constant 0 : i32
    %c0_i32_0 = arith.constant 0 : i32
    %c0_i32_1 = arith.constant 0 : i32
    %c0_i32_2 = arith.constant 0 : i32
    return %c0_i32, %arg0, %c0_i32_0, %c0_i32_1 : i32, i32, i32, i32
  }
  func.func @transform_1(%arg0: i32) -> (i32, i32, i32) {
    %c0_i32 = arith.constant 0 : i32
    %c0_i32_0 = arith.constant 0 : i32
    %c0_i32_1 = arith.constant 0 : i32
    return %arg0, %c0_i32, %c0_i32_0 : i32, i32, i32
  }
  func.func @transform_2(%arg0: i32) -> (i32, i32, i32) {
    %c0_i32 = arith.constant 0 : i32
    %c0_i32_0 = arith.constant 0 : i32
    %c0_i32_1 = arith.constant 0 : i32
    return %arg0, %c0_i32, %c0_i32_0 : i32, i32, i32
  }
  func.func @transform_3(%arg0: i32) -> (i32, i32) {
    %c0_i32 = arith.constant 0 : i32
    %c0_i32_0 = arith.constant 0 : i32
    %c0_i32_1 = arith.constant 0 : i32
    return %c0_i32, %c0_i32_0 : i32, i32
  }
  func.func @transform_4(%arg0: i32) -> (i32, i32, i32, i32) {
    %c0_i32 = arith.constant 0 : i32
    %c0_i32_0 = arith.constant 0 : i32
    %c0_i32_1 = arith.constant 0 : i32
    %c0_i32_2 = arith.constant 0 : i32
    return %c0_i32, %arg0, %c0_i32_0, %c0_i32_1 : i32, i32, i32, i32
  }
}

</mosaic_0001>

<bundles_post_ra>
// kernel: _lambda_.3
= control target key start
LH: loop header
LB: loop body
LE: loop exit
PB: predicated region body
PF: predicated region fallthrough
CT: control target
= control target key end

     0   :  { %s1682_s15 = smov 0   ;;  %s1684_s16 = smov 0   ;;  %s2319_s0 = inlined_call_operand.vmem [shape: bf16[2,4,32,142], index: 0, kind: input, shape index: {}]   ;;  %s2320_s1 = inlined_call_operand.vmem [shape: bf16[4,20,480], index: 1, kind: input, shape index: {}]   ;;  %s2321_s2 = inlined_call_operand.vmem [shape: f32[4,20,1], index: 2, kind: input, shape index: {}]   ;;  %s2322_s3 = inlined_call_operand.vmem [shape: f32[128,72], index: 3, kind: input, shape index: {}]   ;;  %s2323_s4 = inlined_call_operand.vmem [shape: f32[2,4,20,72], index: 4, kind: output, shape index: {}]  }
   0x1   :  { %s1686_s17 = smov 0  }
   0x2 LB: > { %s1698_s18 = sadd.s32 4294967295, %s1637_s17   ;;  %s1701_s19 = sadd.s32 1, %s1637_s17   ;;  %s1637_s17 = sphi %s1686_s17, %s2332_s17   ;;  %s1633_s16 = sphi %s1684_s16, %s2331_s16   ;;  %s1629_s15 = sphi %s1682_s15, %s2330_s15  }
   0x3   : > { %s18_s20 = ssub.s32 %s1637_s17, %s1701_s19  ;;  %s21_s21 = sadd.s32 1, %s1633_s16 }
   0x4   : > { %p19_p0 = scmp.eq.s32.totalorder %s18_s20, 0  ;;  %p28_p1 = scmp.ne.s32.totalorder %s1633_s16, %s1629_s15 }
   0x5   : > { %p29_p2 = scmp.eq.s32.totalorder %s1637_s17, 0  ;;  %p131_p3 = scmp.eq.s32.totalorder %s1698_s18, 3 }
   0x6   : > { %s1711_s22 = scalar_select %p19_p0, %s1633_s16, %s21_s21  }
   0x7   : > { %p30_p4 = por %p29_p2, %p28_p1  ;;  %p1713_p5 = por %p131_p3, %p28_p1 }
   0x8   : > { %p1282_p6 = scmp.ge.s32.totalorder %s1637_s17, 4 }
   0xa   : > { %156 = sbr.rel (%p1282_p6) target bundleno = 25 (0x19), region = 20 }
  0x11   : > { %159 = sbr.rel (!%p30_p4) target bundleno = 25 (0x19), region = 24  ;;  %s161_s24 = sand.u32 (%p30_p4), 1, %s1633_s16  }
  0x12   : > { %s1320_s25 = sshll.u32 (%p30_p4), %s1637_s17, 5  ;;  %s1283_s26 = sshll.u32 (%p30_p4), %s161_s24, 6 }
  0x13   : > { %s166_s29 = scalar_lea.vmem (%p30_p4), %s2319_s0, %s1320_s25  ;;  %s163_s30 = scalar_lea.vmem (%p30_p4), [#allocation2], %s1283_s26 }
  0x14   : > { %v208_v0 = vld [vmem:[%s166_s29] sm:$0xff] (%p30_p4)  ;;  %v210_v1 = vld [vmem:[%s166_s29 + $0x8] sm:$0xff] (%p30_p4)  ;;  %v212_v2 = vld [vmem:[%s166_s29 + $0x10] sm:$0xff] (%p30_p4) }
  0x15   : > { %209 = vst [vmem:[%s163_s30] sm:$0xff] (%p30_p4), %v208_v0  ;;  %211 = vst [vmem:[%s163_s30 + $0x8] sm:$0xff] (%p30_p4), %v210_v1  ;;  %v214_v3 = vld [vmem:[%s166_s29 + $0x18] sm:$0xff] (%p30_p4)  ;;  %v216_v4 = vld [vmem:[%s166_s29 + $0x80] sm:$0xff] (%p30_p4) }
  0x16   : > { %213 = vst [vmem:[%s163_s30 + $0x10] sm:$0xff] (%p30_p4), %v212_v2  ;;  %v218_v5 = vld [vmem:[%s166_s29 + $0x88] sm:$0xff] (%p30_p4)  ;;  %215 = vst [vmem:[%s163_s30 + $0x18] sm:$0xff] (%p30_p4), %v214_v3  ;;  %v220_v6 = vld [vmem:[%s166_s29 + $0x90] sm:$0xff] (%p30_p4) }
  0x17   : > { %217 = vst [vmem:[%s163_s30 + $0x20] sm:$0xff] (%p30_p4), %v216_v4  ;;  %219 = vst [vmem:[%s163_s30 + $0x28] sm:$0xff] (%p30_p4), %v218_v5  ;;  %v222_v7 = vld [vmem:[%s166_s29 + $0x98] sm:$0xff] (%p30_p4) }
  0x18   : > { %221 = vst [vmem:[%s163_s30 + $0x30] sm:$0xff] %v220_v6  ;;  %223 = vst [vmem:[%s163_s30 + $0x38] sm:$0xff] %v222_v7 }
  0x19 PF: > { %p1286_p7 = scmp.ge.s32.totalorder %s1637_s17, 1  ;;  %p244_p8 = scmp.lt.s32.totalorder %s1637_s17, 5 }
  0x1b   : > { %p245_p9 = pnand %p1286_p7, %p244_p8 }
  0x1c   : > { %s2324_s5 = sand.u32 (!%p245_p9), 1, %s1629_s15   ;;  %v1639_v8 = vmov (!%p245_p9), 0   ;;  %s1640_s8 = smov (!%p245_p9), 120   ;;  %vm572_vm0 = vcmask (!%p245_p9), 785408   ;;  %vm442_vm1 = vcmask (!%p245_p9), 982016   ;;  %vm455_vm2 = vcmask (!%p245_p9), 973824  }
  0x1d   : > { %248 = sbr.rel (%p245_p9) target bundleno = 976 (0x3d0), region = 70  ;;  %s1287_s6 = sshll.u32 (!%p245_p9), %s2324_s5, 6  ;;  %1591 = vset.pattern.permute.xlu0 (!%p245_p9), %v1639_v8  ;;  %627 = vmatprep.subr.bf16.mxu1 (!%p245_p9), %v1639_v8  ;;  %vm390_vm3 = vcmask (!%p245_p9), 1014784   ;;  %vm468_vm4 = vcmask (!%p245_p9), 965632   ;;  %vm481_vm5 = vcmask (!%p245_p9), 957440   ;;  %vm403_vm6 = vcmask (!%p245_p9), 1006592  }
  0x1e   : > { %1592 = vset.pattern.permute.xlu1 (!%p245_p9), %v1639_v8  ;;  %s1731_s7 = scalar_lea.vmem (!%p245_p9), [#allocation2], %s1287_s6  ;;  %p285_p10 = scmp.lt.s32.totalorder (!%p245_p9), %s1698_s18, 3  ;;  %vm351_vm7 = vcmask (!%p245_p9), 1039360   ;;  %vm494_vm8 = vcmask (!%p245_p9), 949248   ;;  %vm416_vm9 = vcmask (!%p245_p9), 998400   ;;  %vm364_vm10 = vcmask (!%p245_p9), 1031168  }
  0x1f   : > { %v1734_v9 = vld [vmem:[%s1731_s7 + $0x10] ss:$8 sps:$4 sm:$0xff] (!%p245_p9)   ;;  %v1737_v10 = vld [vmem:[%s1731_s7] ss:$8 sps:$4 sm:$0xff] (!%p245_p9)   ;;  %v1742_v11 = vld [vmem:[%s1731_s7 + $0x14] ss:$8 sps:$4 sm:$0xff] (!%p245_p9)  }
  0x20   : > { %438 = vrot.lane.b32.xlu1 (!%p245_p9), %v1734_v9, %s1640_s8  ;;  %434 = vrot.lane.b32.xlu0 (!%p245_p9), %v1737_v10, %s1640_s8  ;;  %v1747_v12 = vld [vmem:[%s1731_s7 + $0x4] ss:$8 sps:$4 sm:$0xff] (!%p245_p9)   ;;  %s1641_s11 = smov (!%p245_p9), 119   ;;  %s1642_s17 = smov (!%p245_p9), 118   ;;  %v1881_v15 = vld [vmem:[%s1731_s7 + $0x20] ss:$8 sps:$4 sm:$0xff] (!%p245_p9)  }
  0x21   : > { %s1643_s20 = smov (!%p245_p9), 124   ;;  %s1644_s21 = smov (!%p245_p9), 117   ;;  %v1889_v17 = vld [vmem:[%s1731_s7 + $0x24] ss:$8 sps:$4 sm:$0xff] (!%p245_p9)   ;;  %v1892_v18 = vld [vmem:[%s1731_s7 + $0x30] ss:$8 sps:$4 sm:$0xff] (!%p245_p9)  }
  0x22   : > { %s1645_s24 = smov (!%p245_p9), 123   ;;  %s1646_s25 = smov (!%p245_p9), 127   ;;  %v1897_v21 = vld [vmem:[%s1731_s7 + $0x34] ss:$8 sps:$4 sm:$0xff] (!%p245_p9)   ;;  %vm507_vm11 = vcmask (!%p245_p9), 941056   ;;  %vm429_vm12 = vcmask (!%p245_p9), 990208  }
  0x23   : > { %s1647_s26 = smov (!%p245_p9), 116   ;;  %s1648_s27 = smov (!%p245_p9), 122   ;;  %vm377_vm13 = vcmask (!%p245_p9), 1022976   ;;  %vm520_vm14 = vcmask (!%p245_p9), 932864   ;;  %vm1655_vm15 = vmmov (!%p245_p9), 0  }
  0x24   : > { %440 = vrot.lane.b32.xlu1 %v1742_v11, %s1640_s8  ;;  %436 = vrot.lane.b32.xlu0 %v1747_v12, %s1640_s8  ;;  %s1755_s9 = scalar_select %p285_p10, %s1698_s18, 3 }
  0x25   : > { %s1649_s28 = smov 126   ;;  %s1650_s29 = smov 115  }
  0x26   : > { %s1546_s10 = smul.u32 48, %s1755_s9  ;;  %s2325_s30 = smov 121  }
  0x27   : > { %s1652_s6 = smov 125   ;;  %s1653_s12 = smov 114  }
  0x28   : > { %449 = vrot.lane.b32.xlu1 %v1747_v12, %s1641_s11  ;;  %447 = vrot.lane.b32.xlu0 %v1737_v10, %s1641_s11  ;;  %s1765_s14 = scalar_lea.vmem %s2320_s1, %s1546_s10  ;;  %s1547_s10 = smul.u32 24, %s1755_s9 }
  0x29   : > { %v1848_v13 = vld [vmem:[%s1765_s14 + $0x4] ss:$16 sps:$4 sm:$0xff]   ;;  %v1860_v14 = vld [vmem:[%s1765_s14 + $0xc] ss:$16 sps:$4 sm:$0xff]   ;;  %s2328_s5 = smov 121  }
  0x2a   : > { %611 = vmatprep.mubr.bf16.mxu0 %v1848_v13  ;;  %1302 = vmatprep.mubr.msk.bf16.mxu1 %vm572_vm0, %v1860_v14 }
  0x2c   : > { %453 = vrot.lane.b32.xlu1 %v1742_v11, %s1641_s11  ;;  %451 = vrot.lane.b32.xlu0 %v1734_v9, %s1641_s11 }
  0x30   : > { %462 = vrot.lane.b32.xlu1 %v1747_v12, %s1642_s17  ;;  %460 = vrot.lane.b32.xlu0 %v1737_v10, %s1642_s17 }
  0x34   : > { %384 = vrot.lane.b32.xlu1 %v1747_v12, %s1643_s20  ;;  %382 = vrot.lane.b32.xlu0 %v1737_v10, %s1643_s20 }
  0x38   : > { %466 = vrot.lane.b32.xlu1 %v1742_v11, %s1642_s17  ;;  %464 = vrot.lane.b32.xlu0 %v1734_v9, %s1642_s17 }
  0x3c   : > { %388 = vrot.lane.b32.xlu1 %v1742_v11, %s1643_s20  ;;  %386 = vrot.lane.b32.xlu0 %v1734_v9, %s1643_s20 }
  0x40   : > { %475 = vrot.lane.b32.xlu1 %v1747_v12, %s1644_s21  ;;  %473 = vrot.lane.b32.xlu0 %v1737_v10, %s1644_s21 }
  0x44   : > { %397 = vrot.lane.b32.xlu1 %v1747_v12, %s1645_s24  ;;  %395 = vrot.lane.b32.xlu0 %v1737_v10, %s1645_s24 }
  0x48   : > { %345 = vrot.lane.b32.xlu1 %v1747_v12, %s1646_s25  ;;  %343 = vrot.lane.b32.xlu0 %v1737_v10, %s1646_s25 }
  0x4c   : > { %479 = vrot.lane.b32.xlu1 %v1742_v11, %s1644_s21  ;;  %477 = vrot.lane.b32.xlu0 %v1734_v9, %s1644_s21 }
  0x50   : > { %401 = vrot.lane.b32.xlu1 %v1742_v11, %s1645_s24  ;;  %399 = vrot.lane.b32.xlu0 %v1734_v9, %s1645_s24 }
  0x54   : > { %349 = vrot.lane.b32.xlu1 %v1742_v11, %s1646_s25  ;;  %347 = vrot.lane.b32.xlu0 %v1734_v9, %s1646_s25 }
  0x58   : > { %488 = vrot.lane.b32.xlu1 %v1747_v12, %s1647_s26  ;;  %486 = vrot.lane.b32.xlu0 %v1737_v10, %s1647_s26 }
  0x5c   : > { %410 = vrot.lane.b32.xlu1 %v1747_v12, %s1648_s27  ;;  %408 = vrot.lane.b32.xlu0 %v1737_v10, %s1648_s27 }
  0x60   : > { %358 = vrot.lane.b32.xlu1 %v1747_v12, %s1649_s28  ;;  %356 = vrot.lane.b32.xlu0 %v1737_v10, %s1649_s28 }
  0x64   : > { %492 = vrot.lane.b32.xlu1 %v1742_v11, %s1647_s26  ;;  %490 = vrot.lane.b32.xlu0 %v1734_v9, %s1647_s26 }
  0x68   : > { %414 = vrot.lane.b32.xlu1 %v1742_v11, %s1648_s27  ;;  %412 = vrot.lane.b32.xlu0 %v1734_v9, %s1648_s27 }
  0x6c   : > { %362 = vrot.lane.b32.xlu1 %v1742_v11, %s1649_s28  ;;  %360 = vrot.lane.b32.xlu0 %v1734_v9, %s1649_s28 }
  0x70   : > { %501 = vrot.lane.b32.xlu1 %v1747_v12, %s1650_s29  ;;  %499 = vrot.lane.b32.xlu0 %v1737_v10, %s1650_s29 }
  0x74   : > { %423 = vrot.lane.b32.xlu1 %v1747_v12, %s2325_s30  ;;  %421 = vrot.lane.b32.xlu0 %v1737_v10, %s2325_s30 }
  0x78   : > { %371 = vrot.lane.b32.xlu1 %v1747_v12, %s1652_s6  ;;  %369 = vrot.lane.b32.xlu0 %v1737_v10, %s1652_s6 }
  0x7c   : > { %505 = vrot.lane.b32.xlu1 %v1742_v11, %s1650_s29  ;;  %503 = vrot.lane.b32.xlu0 %v1734_v9, %s1650_s29 }
  0x80   : > { %427 = vrot.lane.b32.xlu1 %v1742_v11, %s2325_s30  ;;  %425 = vrot.lane.b32.xlu0 %v1734_v9, %s2325_s30  ;;  %s1876_s30 = scalar_lea.vmem %s2321_s2, %s1547_s10 }
  0x81   : > { %v302_v16 = vld [vmem:[%s1876_s30] sm:$0xff]  ;;  %v303_v3 = vld [vmem:[%s1876_s30 + $0x8] sm:$0xff] }
  0x84   : > { %375 = vrot.lane.b32.xlu1 %v1742_v11, %s1652_s6  ;;  %373 = vrot.lane.b32.xlu0 %v1734_v9, %s1652_s6 }
  0x88   : > { %514 = vrot.lane.b32.xlu1 %v1747_v12, %s1653_s12  ;;  %512 = vrot.lane.b32.xlu0 %v1737_v10, %s1653_s12 }
  0x8c   : > { %518 = vrot.lane.b32.xlu1 %v1742_v11, %s1653_s12  ;;  %516 = vrot.lane.b32.xlu0 %v1734_v9, %s1653_s12 }
  0x90   : > { %870 = vrot.lane.b32.xlu1 %v1881_v15, %s1640_s8  ;;  %527 = vperm.xlu0 %1591, %v302_v16  }
  0x92   : > { %v439_v19 = vpop.permute.xlu1 %438  ;;  %v435_v20 = vpop.permute.xlu0 %434 }
  0x94   : > { %872 = vrot.lane.b32.xlu1 %v1889_v17, %s1640_s8  ;;  %874 = vrot.lane.b32.xlu0 %v1892_v18, %s1640_s8 }
  0x96   : > { %v441_v22 = vpop.permute.xlu1 %440  ;;  %v437_v23 = vpop.permute.xlu0 %436 }
  0x97   : > { %v443_v24 = vsel %vm442_vm1, %v435_v20, %v437_v23  ;;  %v444_v27 = vsel %vm442_vm1, %v439_v19, %v441_v22  ;;  %v304_v20 = vld [vmem:[%s1876_s30 + $0x10] sm:$0xf] }
  0x98   : > { %876 = vrot.lane.b32.xlu1 %v1897_v21, %s1640_s8  ;;  %628 = vmatpush1.bf16.msra.mxu1 %v443_v24 }
  0x99   : > { %882 = vrot.lane.b32.xlu0 %v1881_v15, %s1641_s11  ;;  %629 = vmatprep.subr.bf16.mxu1 %v1639_v8 }
  0x9a   : > { %v450_v25 = vpop.permute.xlu1 %449  ;;  %v448_v26 = vpop.permute.xlu0 %447 }
  0x9b   : > { %v456_v30 = vsel %vm455_vm2, %v448_v26, %v450_v25 }
  0x9c   : > { %884 = vrot.lane.b32.xlu1 %v1889_v17, %s1641_s11  ;;  %630 = vmatpush1.bf16.msra.mxu1 %v444_v27 }
  0x9d   : > { %886 = vrot.lane.b32.xlu0 %v1892_v18, %s1641_s11  ;;  %631 = vmatprep.subr.bf16.mxu1 %v1639_v8 }
  0x9e   : > { %v454_v28 = vpop.permute.xlu1 %453  ;;  %v452_v29 = vpop.permute.xlu0 %451 }
  0x9f   : > { %v457_v33 = vsel %vm455_vm2, %v452_v29, %v454_v28 }
  0xa0   : > { %888 = vrot.lane.b32.xlu1 %v1897_v21, %s1641_s11  ;;  %632 = vmatpush1.bf16.msra.mxu1 %v456_v30 }
  0xa1   : > { %894 = vrot.lane.b32.xlu0 %v1881_v15, %s1642_s17  ;;  %633 = vmatprep.subr.bf16.mxu1 %v1639_v8 }
  0xa2   : > { %v463_v31 = vpop.permute.xlu1 %462  ;;  %v461_v32 = vpop.permute.xlu0 %460 }
  0xa3   : > { %v469_v37 = vsel %vm468_vm4, %v461_v32, %v463_v31 }
  0xa4   : > { %896 = vrot.lane.b32.xlu1 %v1889_v17, %s1642_s17  ;;  %634 = vmatpush1.bf16.msra.mxu1 %v457_v33 }
  0xa5   : > { %822 = vrot.lane.b32.xlu0 %v1881_v15, %s1643_s20  ;;  %635 = vmatprep.subr.bf16.mxu1 %v1639_v8 }
  0xa6   : > { %v385_v34 = vpop.permute.xlu1 %384  ;;  %v383_v35 = vpop.permute.xlu0 %382 }
  0xa7   : > { %v391_v36 = vsel %vm390_vm3, %v383_v35, %v385_v34 }
  0xa8   : > { %824 = vrot.lane.b32.xlu1 %v1889_v17, %s1643_s20  ;;  %1321 = vmatprep.subr.bf16.mxu0 %v391_v36 }
  0xa9   : > { %636 = vmatpush1.bf16.msra.mxu1 %v469_v37  ;;  %898 = vrot.lane.b32.xlu0 %v1892_v18, %s1642_s17 }
  0xaa   : > { %v467_v38 = vpop.permute.xlu1 %466  ;;  %637 = vmatprep.subr.bf16.mxu1 %v1639_v8  ;;  %v465_v39 = vpop.permute.xlu0 %464  ;;  %1322 = vmatpush3.bf16.msra.mxu0 %v1737_v10 }
  0xab   : > { %v470_v40 = vsel %vm468_vm4, %v465_v39, %v467_v38 }
  0xac   : > { %900 = vrot.lane.b32.xlu1 %v1897_v21, %s1642_s17 }
  0xad   : > { %638 = vmatpush1.bf16.msra.mxu1 %v470_v40  ;;  %826 = vrot.lane.b32.xlu0 %v1892_v18, %s1643_s20 }
  0xae   : > { %v389_v41 = vpop.permute.xlu1 %388  ;;  %639 = vmatprep.subr.bf16.mxu1 %v1639_v8  ;;  %v387_v42 = vpop.permute.xlu0 %386 }
  0xaf   : > { %v392_v43 = vsel %vm390_vm3, %v387_v42, %v389_v41  ;;  %v300_v41 = vld [vmem:[%s1765_s14 + $0x20] sm:$0x33] }
  0xb0   : > { %828 = vrot.lane.b32.xlu1 %v1897_v21, %s1643_s20  ;;  %1323 = vmatprep.subr.bf16.mxu0 %v392_v43 }
  0xb1   : > { %906 = vrot.lane.b32.xlu0 %v1881_v15, %s1644_s21  ;;  %1324 = vmatpush3.bf16.msra.mxu0 %v1734_v9 }
  0xb2   : > { %v476_v44 = vpop.permute.xlu1 %475  ;;  %v474_v45 = vpop.permute.xlu0 %473 }
  0xb3   : > { %v482_v46 = vsel %vm481_vm5, %v474_v45, %v476_v44  ;;  %v2037_v44 = vld [vmem:[%s1765_s14] ss:$16 sps:$4 sm:$0xff]   ;;  %v2041_v45 = vcombine.high %v300_v41, %v300_v41 }
  0xb4   : > { %908 = vrot.lane.b32.xlu1 %v1889_v17, %s1644_s21  ;;  %640 = vmatpush1.bf16.msra.mxu1 %v482_v46 }
  0xb5   : > { %834 = vrot.lane.b32.xlu0 %v1881_v15, %s1645_s24  ;;  %641 = vmatprep.subr.bf16.mxu1 %v1639_v8 }
  0xb6   : > { %v398_v47 = vpop.permute.xlu1 %397  ;;  %v396_v48 = vpop.permute.xlu0 %395 }
  0xb7   : > { %v404_v49 = vsel %vm403_vm6, %v396_v48, %v398_v47 }
  0xb8   : > { %836 = vrot.lane.b32.xlu1 %v1889_v17, %s1645_s24  ;;  %1325 = vmatprep.subr.bf16.mxu0 %v404_v49 }
  0xb9   : > { %786 = vrot.lane.b32.xlu0 %v1881_v15, %s1646_s25 }
  0xba   : > { %v346_v50 = vpop.permute.xlu1 %345  ;;  %v344_v51 = vpop.permute.xlu0 %343 }
  0xbb   : > { %v352_v52 = vsel %vm351_vm7, %v344_v51, %v346_v50  ;;  %v301_v50 = vld [vmem:[%s1765_s14 + $0x28] sm:$0x33] }
  0xbc   : > { %788 = vrot.lane.b32.xlu1 %v1889_v17, %s1646_s25  ;;  %1326 = vmatpush3.bf16.msra.mxu0 %v352_v52 }
  0xbd   : > { %910 = vrot.lane.b32.xlu0 %v1892_v18, %s1644_s21 }
  0xbe   : > { %v480_v53 = vpop.permute.xlu1 %479  ;;  %v478_v54 = vpop.permute.xlu0 %477 }
  0xbf   : > { %v483_v55 = vsel %vm481_vm5, %v478_v54, %v480_v53  ;;  %v2056_v53 = vld [vmem:[%s1765_s14 + $0x8] ss:$16 sps:$4 sm:$0xff]   ;;  %v2058_v54 = vcombine.low %v300_v41, %v300_v41 }
  0xc0   : > { %912 = vrot.lane.b32.xlu1 %v1897_v21, %s1644_s21  ;;  %642 = vmatpush1.bf16.msra.mxu1 %v483_v55  ;;  %v2062_v55 = vcombine.high %v301_v50, %v301_v50 }
  0xc1   : > { %838 = vrot.lane.b32.xlu0 %v1892_v18, %s1645_s24  ;;  %643 = vmatprep.subr.bf16.mxu1 %v1639_v8 }
  0xc2   : > { %v402_v56 = vpop.permute.xlu1 %401  ;;  %v400_v57 = vpop.permute.xlu0 %399 }
  0xc3   : > { %v405_v58 = vsel %vm403_vm6, %v400_v57, %v402_v56 }
  0xc4   : > { %840 = vrot.lane.b32.xlu1 %v1897_v21, %s1645_s24  ;;  %1327 = vmatprep.subr.bf16.mxu0 %v405_v58  ;;  %v2075_v58 = vcombine.low %v301_v50, %v301_v50 }
  0xc5   : > { %790 = vrot.lane.b32.xlu0 %v1892_v18, %s1646_s25 }
  0xc6   : > { %v350_v59 = vpop.permute.xlu1 %349  ;;  %v348_v60 = vpop.permute.xlu0 %347 }
  0xc7   : > { %v353_v61 = vsel %vm351_vm7, %v348_v60, %v350_v59  ;;  %v305_v59 = vld [vmem:[%s2322_s3] sm:$0xff]  ;;  %v306_v60 = vld [vmem:[%s2322_s3 + $0x8] sm:$0xff] }
  0xc8   : > { %792 = vrot.lane.b32.xlu1 %v1897_v21, %s1646_s25  ;;  %1328 = vmatpush3.bf16.msra.mxu0 %v353_v61  ;;  %v307_v61 = vld [vmem:[%s2322_s3 + $0x10] sm:$0xff] }
  0xc9   : > { %918 = vrot.lane.b32.xlu0 %v1881_v15, %s1647_s26 }
  0xca   : > { %v489_v62 = vpop.permute.xlu1 %488  ;;  %v487_v63 = vpop.permute.xlu0 %486 }
  0xcb   : > { %v495_v0 = vsel %vm494_vm8, %v487_v63, %v489_v62  ;;  %v1654_v62 = vmov 0.0|0.0   ;;  %v308_v63 = vld [vmem:[%s2322_s3 + $0x18] sm:$0xff] }
  0xcc   : > { %920 = vrot.lane.b32.xlu1 %v1889_v17, %s1647_s26  ;;  %644 = vmatpush1.bf16.msra.mxu1 %v495_v0 }
  0xcd   : > { %846 = vrot.lane.b32.xlu0 %v1881_v15, %s1648_s27  ;;  %645 = vmatprep.subr.bf16.mxu1 %v1639_v8 }
  0xce   : > { %v411_v1 = vpop.permute.xlu1 %410  ;;  %v409_v2 = vpop.permute.xlu0 %408 }
  0xcf   : > { %v417_v4 = vsel %vm416_vm9, %v409_v2, %v411_v1  ;;  %v2093_v1 = vpack.c.bf16 %v308_v63, %v307_v61  ;;  %v309_v2 = vld [vmem:[%s2322_s3 + $0x20] sm:$0xff] }
  0xd0   : > { %848 = vrot.lane.b32.xlu1 %v1889_v17, %s1648_s27  ;;  %1329 = vmatprep.subr.bf16.mxu0 %v417_v4 }
  0xd1   : > { %532 = vperm.xlu0 %1591, %v303_v3   ;;  %v310_v3 = vld [vmem:[%s2322_s3 + $0x28] sm:$0xff] }
  0xd2   : > { %v359_v5 = vpop.permute.xlu1 %358  ;;  %v357_v6 = vpop.permute.xlu0 %356 }
  0xd3   : > { %v365_v7 = vsel %vm364_vm10, %v357_v6, %v359_v5  ;;  %v2105_v5 = vpack.c.bf16 %v310_v3, %v309_v2 }
  0xd4   : > { %798 = vrot.lane.b32.xlu1 %v1881_v15, %s1649_s28  ;;  %1330 = vmatpush3.bf16.msra.mxu0 %v365_v7  ;;  %v311_v7 = vld [vmem:[%s2322_s3 + $0x30] sm:$0xff] }
  0xd5   : > { %800 = vrot.lane.b32.xlu0 %v1889_v17, %s1649_s28 }
  0xd6   : > { %v493_v9 = vpop.permute.xlu1 %492  ;;  %v491_v10 = vpop.permute.xlu0 %490 }
  0xd7   : > { %v496_v11 = vsel %vm494_vm8, %v491_v10, %v493_v9  ;;  %v312_v9 = vld [vmem:[%s2322_s3 + $0x38] sm:$0xff] }
  0xd8   : > { %922 = vrot.lane.b32.xlu1 %v1892_v18, %s1647_s26  ;;  %646 = vmatpush1.bf16.msra.mxu1 %v496_v11 }
  0xd9   : > { %647 = vmatprep.subr.bf16.mxu1 %v1639_v8  ;;  %924 = vrot.lane.b32.xlu0 %v1897_v21, %s1647_s26 }
  0xda   : > { %v415_v12 = vpop.permute.xlu1 %414  ;;  %v413_v16 = vpop.permute.xlu0 %412 }
  0xdb   : > { %v418_v19 = vsel %vm416_vm9, %v413_v16, %v415_v12  ;;  %v313_v12 = vld [vmem:[%s2322_s3 + $0x40] sm:$0xff]  ;;  %v314_v16 = vld [vmem:[%s2322_s3 + $0x48] sm:$0xff] }
  0xdc   : > { %850 = vrot.lane.b32.xlu1 %v1892_v18, %s1648_s27  ;;  %1331 = vmatprep.subr.bf16.mxu0 %v418_v19 }
  0xdd   : > { %852 = vrot.lane.b32.xlu0 %v1897_v21, %s1648_s27 }
  0xde   : > { %v363_v22 = vpop.permute.xlu1 %362  ;;  %v361_v23 = vpop.permute.xlu0 %360 }
  0xdf   : > { %v366_v24 = vsel %vm364_vm10, %v361_v23, %v363_v22  ;;  %v2130_v22 = vpack.c.bf16 %v314_v16, %v313_v12  ;;  %v317_v12 = vld [vmem:[%s2322_s3 + $0x60] sm:$0xff]  ;;  %v318_v16 = vld [vmem:[%s2322_s3 + $0x68] sm:$0xff] }
  0xe0   : > { %537 = vperm.xlu1 %1592, %v304_v20   ;;  %1332 = vmatpush3.bf16.msra.mxu0 %v366_v24 }
  0xe1   : > { %802 = vrot.lane.b32.xlu0 %v1892_v18, %s1649_s28 }
  0xe2   : > { %v502_v25 = vpop.permute.xlu1 %501  ;;  %v500_v26 = vpop.permute.xlu0 %499 }
  0xe3   : > { %v508_v27 = vsel %vm507_vm11, %v500_v26, %v502_v25 }
  0xe4   : > { %804 = vrot.lane.b32.xlu1 %v1897_v21, %s1649_s28  ;;  %648 = vmatpush1.bf16.msra.mxu1 %v508_v27  ;;  %s2329_s28 = sand.u32 1, %s1629_s15   ;;  %s1548_s15 = smul.u32 (%p1713_p5), 24, %s1698_s18 }
  0xe5   : > { %649 = vmatprep.subr.bf16.mxu1 %v1639_v8  ;;  %930 = vrot.lane.b32.xlu0 %v1881_v15, %s1650_s29 }
  0xe6   : > { %v424_v28 = vpop.permute.xlu1 %423  ;;  %v422_v29 = vpop.permute.xlu0 %421 }
  0xe7   : > { %v430_v30 = vsel %vm429_vm12, %v422_v29, %v424_v28 }
  0xe8   : > { %932 = vrot.lane.b32.xlu1 %v1889_v17, %s1650_s29  ;;  %1333 = vmatprep.subr.bf16.mxu0 %v430_v30 }
  0xe9   : > { %858 = vrot.lane.b32.xlu0 %v1881_v15, %s2328_s5 }
  0xea   : > { %v372_v31 = vpop.permute.xlu1 %371  ;;  %v370_v32 = vpop.permute.xlu0 %369 }
  0xeb   : > { %v378_v33 = vsel %vm377_vm13, %v370_v32, %v372_v31 }
  0xec   : > { %860 = vrot.lane.b32.xlu1 %v1889_v17, %s2328_s5  ;;  %1334 = vmatpush3.bf16.msra.mxu0 %v378_v33 }
  0xed   : > { %810 = vrot.lane.b32.xlu0 %v1881_v15, %s1652_s6 }
  0xee   : > { %v506_v34 = vpop.permute.xlu1 %505  ;;  %v504_v35 = vpop.permute.xlu0 %503 }
  0xef   : > { %v509_v36 = vsel %vm507_vm11, %v504_v35, %v506_v34 }
  0xf0   : > { %812 = vrot.lane.b32.xlu1 %v1889_v17, %s1652_s6  ;;  %650 = vmatpush1.bf16.msra.mxu1 %v509_v36 }
  0xf1   : > { %651 = vmatprep.subr.bf16.mxu1 %v1639_v8  ;;  %934 = vrot.lane.b32.xlu0 %v1892_v18, %s1650_s29 }
  0xf2   : > { %v428_v37 = vpop.permute.xlu1 %427  ;;  %v426_v38 = vpop.permute.xlu0 %425 }
  0xf3   : > { %v431_v39 = vsel %vm429_vm12, %v426_v38, %v428_v37 }
  0xf4   : > { %936 = vrot.lane.b32.xlu1 %v1897_v21, %s1650_s29  ;;  %1335 = vmatprep.subr.bf16.mxu0 %v431_v39  ;;  %s1545_s29 = smul.u32 48, %s2329_s28 }
  0xf5   : > { %862 = vrot.lane.b32.xlu0 %v1892_v18, %s2328_s5 }
  0xf6   : > { %v376_v40 = vpop.permute.xlu1 %375  ;;  %v374_v42 = vpop.permute.xlu0 %373  ;;  %s2276_s30 = scalar_lea.vmem [#allocation3], %s1545_s29 }
  0xf7   : > { %v379_v43 = vsel %vm377_vm13, %v374_v42, %v376_v40 }
  0xf8   : > { %864 = vrot.lane.b32.xlu1 %v1897_v21, %s2328_s5  ;;  %1336 = vmatpush3.bf16.msra.mxu0 %v379_v43 }
  0xf9   : > { %814 = vrot.lane.b32.xlu0 %v1892_v18, %s1652_s6  ;;  %1497 = vmatprep.subr.bf16.mxu0 %v1654_v62 }
  0xfa   : > { %v515_v46 = vpop.permute.xlu1 %514  ;;  %v513_v47 = vpop.permute.xlu0 %512 }
  0xfb   : > { %612 = vmatmul.mubr.bf16.vlgmr.msra.gmra.mrb[0].mxu0 %v2037_v44  ;;  %v521_v48 = vsel %vm520_vm14, %v513_v47, %v515_v46 }
  0xfc   : > { %816 = vrot.lane.b32.xlu1 %v1897_v21, %s1652_s6  ;;  %652 = vmatpush1.bf16.msra.mxu1 %v521_v48 }
  0xfd   : > { %619 = vmatprep.mubr.bf16.mxu0 %v2041_v45  ;;  %653 = vmatprep.subr.bf16.mxu1 %v1639_v8 }
  0xfe   : > { %v519_v49 = vpop.permute.xlu1 %518  ;;  %942 = vrot.lane.b32.xlu0 %v1881_v15, %s1653_s12  ;;  %v517_v51 = vpop.permute.xlu0 %516 }
  0xff   : > { %v522_v52 = vsel %vm520_vm14, %v517_v51, %v519_v49 }
 0x100   : > { %944 = vrot.lane.b32.xlu1 %v1889_v17, %s1653_s12  ;;  %654 = vmatpush1.bf16.msra.mxu1 %v522_v52 }
 0x102   : > { %v871_v56 = vpop.permute.xlu1 %870  ;;  %946 = vrot.lane.b32.xlu0 %v1892_v18, %s1653_s12 }
 0x103   : > { %660 = vmatmul.mubr.bf16.vlgmr.msra.gmra.mrb[0].mxu1 %v2056_v53  ;;  %620 = vmatmul.mubr.bf16.gmra.mrb[4].mxu0 %v2058_v54 }
 0x104   : > { %1303 = vmatprep.mubr.msk.bf16.mxu1 %vm572_vm0, %v2062_v55  ;;  %948 = vrot.lane.b32.xlu1 %v1897_v21, %s1653_s12  ;;  %v2087_v21 = vpack.c.bf16 %v306_v60, %v305_v59  ;;  %s1146_s12 = scalar_lea.vmem (%p1713_p5), %s2323_s4, %s1548_s15 }
 0x106   : > { %v873_v57 = vpop.permute.xlu1 %872  ;;  %1499 = vmatpush3.bf16.msra.mxu0 %v2087_v21 }
 0x107   : > { %v2073_v17 = vsel %vm442_vm1, %v871_v56, %v873_v57  ;;  %1500 = vmatprep.subr.bf16.mxu0 %v1654_v62 }
 0x10a   : > { %v877_v0 = vpop.permute.xlu1 %876  ;;  %1502 = vmatpush3.bf16.msra.mxu0 %v2093_v1 }
 0x10b   : > { %668 = vmatmul.mubr.bf16.gmra.mrb[4].mxu1 %v2075_v58  ;;  %1503 = vmatprep.subr.bf16.mxu0 %v1654_v62 }
 0x10c   : > { %986 = vmatprep.mubr.bf16.mxu1 %v1848_v13  ;;  %v2117_v13 = vpack.c.bf16 %v312_v9, %v311_v7  ;;  %v315_v7 = vld [vmem:[%s2322_s3 + $0x50] sm:$0xff]  ;;  %v316_v9 = vld [vmem:[%s2322_s3 + $0x58] sm:$0xff] }
 0x10e   : > { %v885_v4 = vpop.permute.xlu1 %884  ;;  %1505 = vmatpush3.bf16.msra.mxu0 %v2105_v5 }
 0x10f   : > { %v2107_v6 = vpop.permute.xlu0 %527  ;;  %1506 = vmatprep.subr.bf16.mxu0 %v1654_v62 }
 0x112   : > { %v889_v10 = vpop.permute.xlu1 %888  ;;  %1508 = vmatpush3.bf16.msra.mxu0 %v2117_v13 }
 0x113   : > { %v875_v11 = vpop.permute.xlu0 %874  ;;  %1509 = vmatprep.subr.bf16.mxu0 %v1654_v62 }
 0x114   : > { %v2127_v19 = vsel %vm442_vm1, %v875_v11, %v877_v0  ;;  %vm758_vm1 = vcmask 588800  }
 0x116   : > { %v897_v20 = vpop.permute.xlu1 %896  ;;  %1511 = vmatpush3.bf16.msra.mxu0 %v2130_v22 }
 0x117   : > { %v883_v23 = vpop.permute.xlu0 %882  ;;  %1512 = vmatprep.subr.bf16.mxu0 %v1654_v62 }
 0x118   : > { %v2134_v24 = vsel %vm455_vm2, %v883_v23, %v885_v4 }
 0x11a   : > { %v825_v25 = vpop.permute.xlu1 %824 }
 0x11b   : > { %v887_v26 = vpop.permute.xlu0 %886 }
 0x11c   : > { %v2139_v27 = vsel %vm455_vm2, %v887_v26, %v889_v10  ;;  %v2171_v10 = vpack.c.bf16 %v316_v9, %v315_v7  ;;  %v319_v26 = vld [vmem:[%s2322_s3 + $0x70] sm:$0xff] }
 0x11e   : > { %v901_v28 = vpop.permute.xlu1 %900  ;;  %1514 = vmatpush3.bf16.msra.mxu0 %v2171_v10 }
 0x11f   : > { %v895_v29 = vpop.permute.xlu0 %894  ;;  %1515 = vmatprep.subr.bf16.mxu0 %v1654_v62 }
 0x120   : > { %v2142_v30 = vsel %vm468_vm4, %v895_v29, %v897_v20  ;;  %v2183_v20 = vpack.c.bf16 %v318_v16, %v317_v12 }
 0x122   : > { %v829_v31 = vpop.permute.xlu1 %828  ;;  %1517 = vmatpush3.bf16.msra.mxu0 %v2183_v20 }
 0x123   : > { %v823_v32 = vpop.permute.xlu0 %822  ;;  %1518 = vmatprep.subr.bf16.mxu0 %v1654_v62 }
 0x124   : > { %v830_v33 = vsel %vm390_vm3, %v823_v32, %v825_v25 }
 0x125   : > { %1368 = vmatprep.subr.bf16.mxu1 %v830_v33 }
 0x126   : > { %v909_v34 = vpop.permute.xlu1 %908  ;;  %1369 = vmatpush3.bf16.msra.mxu1 %v1881_v15 }
 0x127   : > { %v899_v35 = vpop.permute.xlu0 %898 }
 0x128   : > { %v2147_v36 = vsel %vm468_vm4, %v899_v35, %v901_v28  ;;  %v320_v28 = vld [vmem:[%s2322_s3 + $0x78] sm:$0xff]  ;;  %v1656_v35 = vmov 0.0  }
 0x129   : > { %1447 = vmatprep.mubr.msk.f32.mxu0 %vm1655_vm15, %v1656_v35 }
 0x12a   : > { %v837_v37 = vpop.permute.xlu1 %836 }
 0x12b   : > { %v827_v38 = vpop.permute.xlu0 %826 }
 0x12c   : > { %v831_v39 = vsel %vm390_vm3, %v827_v38, %v829_v31  ;;  %v1519_v31 = vpack.c.bf16 %v320_v28, %v319_v26 }
 0x12d   : > { %1370 = vmatprep.subr.bf16.mxu1 %v831_v39 }
 0x12e   : > { %v789_v40 = vpop.permute.xlu1 %788  ;;  %1371 = vmatpush3.bf16.msra.mxu1 %v1892_v18  ;;  %1520 = vmatpush3.bf16.msra.mxu0 %v1519_v31 }
 0x12f   : > { %v907_v41 = vpop.permute.xlu0 %906  ;;  %1002 = vmatprep.subr.bf16.mxu0 %v1639_v8 }
 0x130   : > { %v2152_v42 = vsel %vm481_vm5, %v907_v41, %v909_v34 }
 0x132   : > { %v913_v43 = vpop.permute.xlu1 %912 }
 0x133   : > { %v835_v46 = vpop.permute.xlu0 %834 }
 0x134   : > { %v842_v15 = vsel %vm403_vm6, %v835_v46, %v837_v37 }
 0x135   : > { %1372 = vmatprep.subr.bf16.mxu1 %v842_v15 }
 0x136   : > { %v841_v47 = vpop.permute.xlu1 %840 }
 0x137   : > { %v787_v48 = vpop.permute.xlu0 %786 }
 0x138   : > { %v794_v49 = vsel %vm351_vm7, %v787_v48, %v789_v40 }
 0x139   : > { %1373 = vmatpush3.bf16.msra.mxu1 %v794_v49 }
 0x13a   : > { %v793_v50 = vpop.permute.xlu1 %792 }
 0x13b   : > { %v911_v51 = vpop.permute.xlu0 %910 }
 0x13c   : > { %v2157_v52 = vsel %vm481_vm5, %v911_v51, %v913_v43 }
 0x13e   : > { %v921_v56 = vpop.permute.xlu1 %920 }
 0x13f   : > { %v839_v18 = vpop.permute.xlu0 %838 }
 0x140   : > { %v843_v57 = vsel %vm403_vm6, %v839_v18, %v841_v47 }
 0x141   : > { %1374 = vmatprep.subr.bf16.mxu1 %v843_v57 }
 0x142   : > { %v849_v61 = vpop.permute.xlu1 %848 }
 0x143   : > { %v791_v59 = vpop.permute.xlu0 %790 }
 0x144   : > { %v795_v60 = vsel %vm351_vm7, %v791_v59, %v793_v50 }
 0x145   : > { %1375 = vmatpush3.bf16.msra.mxu1 %v795_v60 }
 0x146   : > { %v799_v3 = vpop.permute.xlu1 %798 }
 0x147   : > { %v919_v63 = vpop.permute.xlu0 %918 }
 0x148   : > { %v2162_v0 = vsel %vm494_vm8, %v919_v63, %v921_v56 }
 0x14a   : > { %v923_v23 = vpop.permute.xlu1 %922 }
 0x14b   : > { %v847_v2 = vpop.permute.xlu0 %846 }
 0x14c   : > { %v854_v4 = vsel %vm416_vm9, %v847_v2, %v849_v61 }
 0x14d   : > { %1376 = vmatprep.subr.bf16.mxu1 %v854_v4 }
 0x14e   : > { %v851_v32 = vpop.permute.xlu1 %850 }
 0x150   : > { %v2174_v11 = vpop.permute.xlu0 %532 }
 0x154   : > { %v801_v25 = vpop.permute.xlu0 %800 }
 0x155   : > { %v806_v29 = vsel %vm364_vm10, %v799_v3, %v801_v25 }
 0x156   : > { %1377 = vmatpush3.bf16.msra.mxu1 %v806_v29 }
 0x158   : > { %v925_v33 = vpop.permute.xlu0 %924 }
 0x159   : > { %v2196_v34 = vsel %vm494_vm8, %v923_v23, %v925_v33 }
 0x15c   : > { %v853_v37 = vpop.permute.xlu0 %852 }
 0x15d   : > { %v855_v38 = vsel %vm416_vm9, %v851_v32, %v853_v37 }
 0x15e   : > { %1378 = vmatprep.subr.bf16.mxu1 %v855_v38 }
 0x15f   : > { %v2201_v39 = vpop.permute.xlu1 %537 }
 0x160   : > { %v803_v40 = vpop.permute.xlu0 %802 }
 0x163   : > { %v805_v41 = vpop.permute.xlu1 %804 }
 0x164   : > { %v807_v43 = vsel %vm364_vm10, %v803_v40, %v805_v41  ;;  %v931_v46 = vpop.permute.xlu0 %930 }
 0x165   : > { %1379 = vmatpush3.bf16.msra.mxu1 %v807_v43 }
 0x167   : > { %v933_v15 = vpop.permute.xlu1 %932 }
 0x168   : > { %v2205_v47 = vsel %vm507_vm11, %v931_v46, %v933_v15  ;;  %v859_v48 = vpop.permute.xlu0 %858 }
 0x16b   : > { %v861_v49 = vpop.permute.xlu1 %860 }
 0x16c   : > { %v866_v50 = vsel %vm429_vm12, %v859_v48, %v861_v49  ;;  %v811_v51 = vpop.permute.xlu0 %810 }
 0x16d   : > { %1380 = vmatprep.subr.bf16.mxu1 %v866_v50 }
 0x16f   : > { %v813_v18 = vpop.permute.xlu1 %812 }
 0x170   : > { %v818_v56 = vsel %vm377_vm13, %v811_v51, %v813_v18  ;;  %v935_v57 = vpop.permute.xlu0 %934 }
 0x171   : > { %1381 = vmatpush3.bf16.msra.mxu1 %v818_v56 }
 0x173   : > { %v937_v59 = vpop.permute.xlu1 %936 }
 0x174   : > { %v2210_v60 = vsel %vm507_vm11, %v935_v57, %v937_v59  ;;  %v863_v61 = vpop.permute.xlu0 %862 }
 0x177   : > { %v865_v63 = vpop.permute.xlu1 %864 }
 0x178   : > { %v867_v2 = vsel %vm429_vm12, %v863_v61, %v865_v63  ;;  %v815_v3 = vpop.permute.xlu0 %814 }
 0x179   : > { %1382 = vmatprep.subr.bf16.mxu1 %v867_v2 }
 0x17b   : > { %v817_v4 = vpop.permute.xlu1 %816 }
 0x17c   : > { %v819_v7 = vsel %vm377_vm13, %v815_v3, %v817_v4 }
 0x17d   : > { %1383 = vmatpush3.bf16.msra.mxu1 %v819_v7 }
 0x17e   : > { %1521 = vmatprep.subr.bf16.mxu1 %v1654_v62 }
 0x180   : > { %987 = vmatmul.mubr.bf16.vlgmr.msra.gmra.mrb[8].mxu1 %v2037_v44 }
 0x181   : > { %994 = vmatprep.mubr.bf16.mxu1 %v2041_v45  ;;  %1523 = vmatpush3.bf16.msra.mxu1 %v2087_v21 }
 0x182   : > { %1524 = vmatprep.subr.bf16.mxu1 %v1654_v62 }
 0x185   : > { %1526 = vmatpush3.bf16.msra.mxu1 %v2093_v1 }
 0x186   : > { %1527 = vmatprep.subr.bf16.mxu1 %v1654_v62 }
 0x188   : > { %995 = vmatmul.mubr.bf16.gmra.mrb[12].mxu1 %v2058_v54 }
 0x189   : > { %1529 = vmatpush3.bf16.msra.mxu1 %v2105_v5  ;;  %1488 = vmatprep.mubr.msk.f32.mxu1 %vm1655_vm15, %v1656_v35 }
 0x18a   : > { %1530 = vmatprep.subr.bf16.mxu1 %v1654_v62 }
 0x18d   : > { %1532 = vmatpush3.bf16.msra.mxu1 %v2117_v13 }
 0x18e   : > { %1533 = vmatprep.subr.bf16.mxu1 %v1654_v62 }
 0x191   : > { %1535 = vmatpush3.bf16.msra.mxu1 %v2130_v22 }
 0x192   : > { %1536 = vmatprep.subr.bf16.mxu1 %v1654_v62 }
 0x195   : > { %1538 = vmatpush3.bf16.msra.mxu1 %v2171_v10 }
 0x196   : > { %1539 = vmatprep.subr.bf16.mxu1 %v1654_v62 }
 0x199   : > { %1541 = vmatpush3.bf16.msra.mxu1 %v2183_v20 }
 0x19a   : > { %1542 = vmatprep.subr.bf16.mxu1 %v1654_v62 }
 0x19d   : > { %1544 = vmatpush3.bf16.msra.mxu1 %v1519_v31 }
 0x1ce   : > { %v1337_v44 = vpop.f32.mrb[0].mxu0 }
 0x1cf   : > { %v1338_v45 = vpop.f32.mrb[1].mxu0 }
 0x1d0   : > { %v1339_v54 = vadd.f32 %v1338_v45, %v1337_v44  ;;  %v1340_v21 = vpop.f32.mrb[2].mxu0 }
 0x1d1   : > { %v1341_v1 = vpop.f32.mrb[3].mxu0 }
 0x1d2   : > { %v1342_v5 = vadd.f32 %v1341_v1, %v1340_v21  ;;  %v614_v13 = vadd.f32 %v1339_v54, %v2107_v6 }
 0x1d4   : > { %v617_v10 = vadd.f32 %v1342_v5, %v2174_v11 }
 0x1d6   : > { %v661_v22 = vpop.f32.mrb[0].mxu1  ;;  %v1343_v9 = vpop.f32.mrb[4].mxu0 }
 0x1d7   : > { %v662_v12 = vadd.f32 %v661_v22, %v614_v13  ;;  %v663_v16 = vpop.f32.mrb[1].mxu1  ;;  %v1344_v23 = vpop.f32.mrb[5].mxu0 }
 0x1d8   : > { %v664_v25 = vpop.f32.mrb[2].mxu1  ;;  %v1345_v20 = vadd.f32 %v1344_v23, %v1343_v9  ;;  %v1346_v26 = vpop.f32.mrb[6].mxu0 }
 0x1d9   : > { %v675_v62 = vmax.f32 %v662_v12, 0.0  ;;  %v665_v28 = vadd.f32 %v664_v25, %v617_v10  ;;  %v666_v29 = vpop.f32.mrb[3].mxu1  ;;  %v1347_v31 = vpop.f32.mrb[7].mxu0 }
 0x1da   : > { %v622_v32 = vadd.f32 %v1345_v20, %v2201_v39 }
 0x1db   : > { %1448 = vmatmul.mubr.f32.vlgmr.msra.gmra.mrb[8].mxu0 %v675_v62  ;;  %v676_v33 = vmax.f32 %v665_v28, 0.0 }
 0x1dc   : > { %1003 = vmatpush1.bf16.msra.mxu0 %v2073_v17  ;;  %1450 = vmatprep.mubr.msk.f32.mxu0 %vm1655_vm15, %v1656_v35 }
 0x1dd   : > { %1004 = vmatprep.subr.bf16.mxu0 %v1639_v8 }
 0x1de   : > { %v669_v37 = vpop.f32.mrb[4].mxu1 }
 0x1df   : > { %1451 = vmatmul.mubr.f32.gmra.mrb[10].mxu0 %v676_v33  ;;  %v670_v38 = vadd.f32 %v669_v37, %v622_v32  ;;  %v671_v40 = vpop.f32.mrb[5].mxu1 }
 0x1e0   : > { %1005 = vmatpush1.bf16.msra.mxu0 %v2127_v19  ;;  %1453 = vmatprep.mubr.msk.f32.mxu0 %vm1655_vm15, %v1656_v35  ;;  %v672_v41 = vpop.f32.mrb[6].mxu1  ;;  %v943_v19 = vpop.permute.xlu0 %942 }
 0x1e1   : > { %1006 = vmatprep.subr.bf16.mxu0 %v1639_v8  ;;  %v677_v43 = vmax.f32 %v670_v38, 0.0  ;;  %v673_v17 = vpop.f32.mrb[7].mxu1 }
 0x1e3   : > { %1454 = vmatmul.mubr.f32.gmra.mrb[12].mxu0 %v677_v43 }
 0x1e4   : > { %1007 = vmatpush1.bf16.msra.mxu0 %v2134_v24  ;;  %1312 = vmatprep.mubr.msk.bf16.mxu0 %vm572_vm0, %v1860_v14  ;;  %v945_v14 = vpop.permute.xlu1 %944 }
 0x1e5   : > { %1008 = vmatprep.subr.bf16.mxu0 %v1639_v8  ;;  %v950_v24 = vsel %vm520_vm14, %v943_v19, %v945_v14 }
 0x1e8   : > { %1009 = vmatpush1.bf16.msra.mxu0 %v2139_v27  ;;  %v949_v27 = vpop.permute.xlu1 %948 }
 0x1e9   : > { %1010 = vmatprep.subr.bf16.mxu0 %v1639_v8 }
 0x1ec   : > { %1011 = vmatpush1.bf16.msra.mxu0 %v2142_v30  ;;  %v947_v30 = vpop.permute.xlu0 %946 }
 0x1ed   : > { %1012 = vmatprep.subr.bf16.mxu0 %v1639_v8 }
 0x1f0   : > { %1013 = vmatpush1.bf16.msra.mxu0 %v2147_v36  ;;  %v951_v36 = vsel %vm520_vm14, %v947_v30, %v949_v27 }
 0x1f1   : > { %1014 = vmatprep.subr.bf16.mxu0 %v1639_v8 }
 0x1f4   : > { %1015 = vmatpush1.bf16.msra.mxu0 %v2152_v42 }
 0x1f5   : > { %1016 = vmatprep.subr.bf16.mxu0 %v1639_v8 }
 0x1f8   : > { %1017 = vmatpush1.bf16.msra.mxu0 %v2157_v52 }
 0x1f9   : > { %1018 = vmatprep.subr.bf16.mxu0 %v1639_v8 }
 0x1fc   : > { %1019 = vmatpush1.bf16.msra.mxu0 %v2162_v0 }
 0x1fd   : > { %1020 = vmatprep.subr.bf16.mxu0 %v1639_v8 }
 0x200   : > { %1021 = vmatpush1.bf16.msra.mxu0 %v2196_v34 }
 0x201   : > { %1022 = vmatprep.subr.bf16.mxu0 %v1639_v8 }
 0x204   : > { %1023 = vmatpush1.bf16.msra.mxu0 %v2205_v47 }
 0x205   : > { %1024 = vmatprep.subr.bf16.mxu0 %v1639_v8 }
 0x208   : > { %1025 = vmatpush1.bf16.msra.mxu0 %v2210_v60 }
 0x209   : > { %1026 = vmatprep.subr.bf16.mxu0 %v1639_v8 }
 0x20c   : > { %1027 = vmatpush1.bf16.msra.mxu0 %v950_v24 }
 0x20d   : > { %1028 = vmatprep.subr.bf16.mxu0 %v1639_v8 }
 0x210   : > { %1029 = vmatpush1.bf16.msra.mxu0 %v951_v36 }
 0x213   : > { %1035 = vmatmul.mubr.bf16.vlgmr.msra.gmra.mrb[16].mxu0 %v2056_v53 }
 0x214   : > { %1313 = vmatprep.mubr.msk.bf16.mxu0 %vm572_vm0, %v2062_v55  ;;  %vm761_vm0 = vcmask 584704  }
 0x21b   : > { %1043 = vmatmul.mubr.bf16.gmra.mrb[20].mxu0 %v2075_v58 }
 0x253   : > { %v1384_v42 = vpop.f32.mrb[8].mxu1 }
 0x254   : > { %v1385_v52 = vpop.f32.mrb[9].mxu1 }
 0x255   : > { %v1386_v0 = vadd.f32 %v1385_v52, %v1384_v42  ;;  %v1387_v34 = vpop.f32.mrb[10].mxu1 }
 0x256   : > { %v1388_v46 = vpop.f32.mrb[11].mxu1 }
 0x257   : > { %v1389_v15 = vadd.f32 %v1388_v46, %v1387_v34  ;;  %v989_v57 = vadd.f32 %v1386_v0, %v2107_v6 }
 0x259   : > { %v992_v63 = vadd.f32 %v1389_v15, %v2174_v11 }
 0x25b   : > { %v1390_v47 = vpop.f32.mrb[12].mxu1 }
 0x25c   : > { %v1391_v48 = vpop.f32.mrb[13].mxu1 }
 0x25d   : > { %v1392_v49 = vadd.f32 %v1391_v48, %v1390_v47  ;;  %v1393_v50 = vpop.f32.mrb[14].mxu1 }
 0x25e   : > { %v1394_v8 = vpop.f32.mrb[15].mxu1 }
 0x25f   : > { %v997_v45 = vadd.f32 %v1392_v49, %v2201_v39 }
 0x2ae   : > { %v744_v53 = vpop.f32.mrb[8].mxu0 }
 0x2af   : > { %759 = vst.msk [vmem:[%s2276_s30] sm:$0xff] %vm758_vm1, %v744_v53  ;;  %v1449_v55 = vpop.f32.mrb[9].mxu0 }
 0x2b2   : > { %v749_v58 = vpop.f32.mrb[10].mxu0 }
 0x2b3   : > { %760 = vst.msk [vmem:[%s2276_s30 + $0x8] sm:$0xff] %vm758_vm1, %v749_v58  ;;  %v1452_v51 = vpop.f32.mrb[11].mxu0 }
 0x2b6   : > { %v754_v18 = vpop.f32.mrb[12].mxu0 }
 0x2b7   : > { %762 = vst.msk [vmem:[%s2276_s30 + $0x10] sm:$0xf] %vm761_vm0, %v754_v18  ;;  %v1455_v56 = vpop.f32.mrb[13].mxu0 }
 0x2ba   : > { %v1186_v10 = vld [vmem:[%s2276_s30 + $0x8] sm:$0xff] (%p1713_p5) }
 0x2bb   : > { %1187 = vst [vmem:[%s1146_s12 + $0x8] sm:$0xff] (%p1713_p5), %v1186_v10 }
 0x2be   : > { %v1188_v23 = vld [vmem:[%s2276_s30 + $0x10] sm:$0xff] (%p1713_p5) }
 0x2bf   : > { %1189 = vst [vmem:[%s1146_s12 + $0x10] sm:$0xff] (%p1713_p5), %v1188_v23 }
 0x2e6   : > { %v1036_v59 = vpop.f32.mrb[16].mxu0 }
 0x2e7   : > { %v1037_v60 = vadd.f32 %v1036_v59, %v989_v57  ;;  %v1038_v61 = vpop.f32.mrb[17].mxu0 }
 0x2e8   : > { %v1039_v2 = vpop.f32.mrb[18].mxu0 }
 0x2e9   : > { %v1050_v3 = vmax.f32 %v1037_v60, 0.0  ;;  %v1040_v4 = vadd.f32 %v1039_v2, %v992_v63  ;;  %v1041_v7 = vpop.f32.mrb[19].mxu0 }
 0x2eb   : > { %1489 = vmatmul.mubr.f32.vlgmr.msra.gmra.mrb[16].mxu1 %v1050_v3  ;;  %v1051_v44 = vmax.f32 %v1040_v4, 0.0 }
 0x2ec   : > { %1491 = vmatprep.mubr.msk.f32.mxu1 %vm1655_vm15, %v1656_v35 }
 0x2ee   : > { %v1044_v54 = vpop.f32.mrb[20].mxu0 }
 0x2ef   : > { %v1045_v6 = vadd.f32 %v1044_v54, %v997_v45  ;;  %v1046_v21 = vpop.f32.mrb[21].mxu0  ;;  %1492 = vmatmul.mubr.f32.gmra.mrb[18].mxu1 %v1051_v44 }
 0x2f0   : > { %v1047_v1 = vpop.f32.mrb[22].mxu0  ;;  %1494 = vmatprep.mubr.msk.f32.mxu1 %vm1655_vm15, %v1656_v35  ;;  %v1184_v35 = vld [vmem:[%s2276_s30] sm:$0xff] (%p1713_p5) }
 0x2f1   : > { %v1052_v11 = vmax.f32 %v1045_v6, 0.0  ;;  %v1048_v5 = vpop.f32.mrb[23].mxu0  ;;  %1185 = vst [vmem:[%s1146_s12] sm:$0xff] (%p1713_p5), %v1184_v35 }
 0x2f3   : > { %1495 = vmatmul.mubr.f32.gmra.mrb[20].mxu1 %v1052_v11 }
 0x3be   : > { %v1119_v13 = vpop.f32.mrb[16].mxu1 }
 0x3bf   : > { %1314 = vst.msk [vmem:[%s2276_s30 + $0x18] sm:$0xff] %vm758_vm1, %v1119_v13  ;;  %v1490_v22 = vpop.f32.mrb[17].mxu1 }
 0x3c1   : > { %1143 = sbr.rel (!%p1713_p5) target bundleno = 976 (0x3d0), region = 78 }
 0x3c2   : > { %v1124_v9 = vpop.f32.mrb[18].mxu1 }
 0x3c3   : > { %1315 = vst.msk [vmem:[%s2276_s30 + $0x20] sm:$0xff] %vm758_vm1, %v1124_v9  ;;  %v1493_v39 = vpop.f32.mrb[19].mxu1 }
 0x3c6   : > { %v1129_v12 = vpop.f32.mrb[20].mxu1  ;;  %v1190_v25 = vld [vmem:[%s2276_s30 + $0x18] sm:$0xff] (%p1713_p5) }
 0x3c7   : > { %1316 = vst.msk [vmem:[%s2276_s30 + $0x28] sm:$0xf] %vm761_vm0, %v1129_v12  ;;  %v1496_v16 = vpop.f32.mrb[21].mxu1  ;;  %1191 = vst [vmem:[%s1146_s12 + $0x60] sm:$0xff] (%p1713_p5), %v1190_v25 }
 0x3ca   : > { %v1192_v20 = vld [vmem:[%s2276_s30 + $0x20] sm:$0xff] }
 0x3cb   : > { %1193 = vst [vmem:[%s1146_s12 + $0x68] sm:$0xff] %v1192_v20 }
 0x3ce   : > { %v1194_v26 = vld [vmem:[%s2276_s30 + $0x28] sm:$0xff] }
 0x3cf   : > { %1195 = vst [vmem:[%s1146_s12 + $0x70] sm:$0xff] %v1194_v26 }
 0x3d0 PF: > { %p11_p11 = scmp.ge.s32.totalorder %s1701_s19, 6   ;;  %s2330_s15 = smov %s1633_s16 }
 0x3d1   : > { %s2331_s16 = smov %s1711_s22  ;;  %s2332_s17 = smov %s1701_s19 }
 0x3d2   :  { %13 = sbr.rel (!%p11_p11) target bundleno = 2 (0x2), region = 155 }

// kernel: _lambda_.2
= control target key start
LH: loop header
LB: loop body
LE: loop exit
PB: predicated region body
PF: predicated region fallthrough
CT: control target
= control target key end

     0   :  { %s2468_s15 = smov 0   ;;  %s2470_s16 = smov 0   ;;  %s3662_s0 = inlined_call_operand.vmem [shape: bf16[2,2,16,403], index: 0, kind: input, shape index: {}]   ;;  %s3663_s1 = inlined_call_operand.vmem [shape: bf16[2,20,320], index: 1, kind: input, shape index: {}]   ;;  %s3664_s2 = inlined_call_operand.vmem [shape: f32[2,20,1], index: 2, kind: input, shape index: {}]   ;;  %s3665_s3 = inlined_call_operand.vmem [shape: f32[384,24], index: 3, kind: input, shape index: {}]   ;;  %s3666_s4 = inlined_call_operand.vmem [shape: f32[2,2,20,24], index: 4, kind: output, shape index: {}]  }
   0x1   :  { %s2472_s17 = smov 0  }
   0x2 LB: > { %s2484_s18 = sadd.s32 4294967295, %s2421_s17   ;;  %s2487_s19 = sadd.s32 1, %s2421_s17   ;;  %s2421_s17 = sphi %s2472_s17, %s3783_s17   ;;  %s2417_s16 = sphi %s2470_s16, %s3782_s16   ;;  %s2413_s15 = sphi %s2468_s15, %s3781_s15  }
   0x3   : > { %s18_s20 = ssub.s32 %s2421_s17, %s2487_s19  ;;  %s21_s21 = sadd.s32 1, %s2417_s16 }
   0x4   : > { %p19_p0 = scmp.eq.s32.totalorder %s18_s20, 0  ;;  %p28_p1 = scmp.ne.s32.totalorder %s2417_s16, %s2413_s15 }
   0x5   : > { %p29_p2 = scmp.eq.s32.totalorder %s2421_s17, 0  ;;  %p131_p3 = scmp.eq.s32.totalorder %s2484_s18, 1 }
   0x6   : > { %s2497_s22 = scalar_select %p19_p0, %s2417_s16, %s21_s21  }
   0x7   : > { %p30_p4 = por %p29_p2, %p28_p1  ;;  %p2499_p5 = por %p131_p3, %p28_p1 }
   0x8   : > { %p1854_p6 = scmp.ge.s32.totalorder %s2421_s17, 2 }
   0xa   : > { %156 = sbr.rel (%p1854_p6) target bundleno = 25 (0x19), region = 20 }
  0x11   : > { %159 = sbr.rel (!%p30_p4) target bundleno = 25 (0x19), region = 24  ;;  %s161_s24 = sand.u32 (%p30_p4), 1, %s2417_s16  }
  0x12   : > { %s1894_s25 = sshll.u32 (%p30_p4), %s2421_s17, 5  ;;  %s1855_s26 = sshll.u32 (%p30_p4), %s161_s24, 6 }
  0x13   : > { %s166_s29 = scalar_lea.vmem (%p30_p4), %s3662_s0, %s1894_s25  ;;  %s163_s30 = scalar_lea.vmem (%p30_p4), [#allocation2], %s1855_s26 }
  0x14   : > { %v179_v0 = vld [vmem:[%s166_s29] sm:$0xff] (%p30_p4)  ;;  %v181_v1 = vld [vmem:[%s166_s29 + $0x8] sm:$0xff] (%p30_p4)  ;;  %v183_v2 = vld [vmem:[%s166_s29 + $0x10] sm:$0xff] (%p30_p4) }
  0x15   : > { %180 = vst [vmem:[%s163_s30] sm:$0xff] (%p30_p4), %v179_v0  ;;  %182 = vst [vmem:[%s163_s30 + $0x8] sm:$0xff] (%p30_p4), %v181_v1  ;;  %v185_v3 = vld [vmem:[%s166_s29 + $0x18] sm:$0xff] (%p30_p4)  ;;  %v187_v4 = vld [vmem:[%s166_s29 + $0x40] sm:$0xff] (%p30_p4) }
  0x16   : > { %184 = vst [vmem:[%s163_s30 + $0x10] sm:$0xff] (%p30_p4), %v183_v2  ;;  %v189_v5 = vld [vmem:[%s166_s29 + $0x48] sm:$0xff] (%p30_p4)  ;;  %186 = vst [vmem:[%s163_s30 + $0x18] sm:$0xff] (%p30_p4), %v185_v3  ;;  %v191_v6 = vld [vmem:[%s166_s29 + $0x50] sm:$0xff] (%p30_p4) }
  0x17   : > { %188 = vst [vmem:[%s163_s30 + $0x20] sm:$0xff] (%p30_p4), %v187_v4  ;;  %190 = vst [vmem:[%s163_s30 + $0x28] sm:$0xff] (%p30_p4), %v189_v5  ;;  %v193_v7 = vld [vmem:[%s166_s29 + $0x58] sm:$0xff] (%p30_p4) }
  0x18   : > { %192 = vst [vmem:[%s163_s30 + $0x30] sm:$0xff] %v191_v6  ;;  %194 = vst [vmem:[%s163_s30 + $0x38] sm:$0xff] %v193_v7 }
  0x19 PF: > { %p1858_p7 = scmp.ge.s32.totalorder %s2421_s17, 1  ;;  %p215_p8 = scmp.lt.s32.totalorder %s2421_s17, 3 }
  0x1b   : > { %p216_p9 = pnand %p1858_p7, %p215_p8 }
  0x1d   : > { %219 = sbr.rel (%p216_p9) target bundleno = 1054 (0x41e), region = 55 }
  0x24   : > { %s3667_s5 = sand.u32 1, %s2413_s15   ;;  %s2423_s8 = smov 127   ;;  %v3675_v12 = vmov 0   ;;  %vm355_vm0 = vcmask 1039360   ;;  %vm370_vm1 = vcmask 1031168   ;;  %vm385_vm2 = vcmask 1022976  }
  0x25   : > { %s1859_s6 = sshll.u32 %s3667_s5, 6  ;;  %s2424_s9 = smov 126   ;;  %2378 = vset.pattern.permute.xlu1 %v3675_v12  ;;  %2377 = vset.pattern.permute.xlu0 %v3675_v12  ;;  %vm400_vm3 = vcmask 1014784   ;;  %vm415_vm4 = vcmask 1006592   ;;  %vm430_vm5 = vcmask 998400   ;;  %vm445_vm6 = vcmask 990208  }
  0x26   : > { %s2514_s7 = scalar_lea.vmem [#allocation2], %s1859_s6  ;;  %s2425_s10 = smov 125   ;;  %vm460_vm7 = vcmask 982016   ;;  %vm475_vm8 = vcmask 973824   ;;  %vm490_vm9 = vcmask 965632   ;;  %vm3672_vm10 = vcmask 957440  }
  0x27   : > { %v2517_v8 = vld [vmem:[%s2514_s7 + $0x4] ss:$16 sps:$4 sm:$0xff]   ;;  %v2520_v9 = vld [vmem:[%s2514_s7] ss:$16 sps:$4 sm:$0xff]   ;;  %v2525_v10 = vld [vmem:[%s2514_s7 + $0x8] ss:$16 sps:$4 sm:$0xff]  }
  0x28   : > { %349 = vrot.lane.b32.xlu0 %v2517_v8, %s2423_s8  ;;  %676 = vmatprep.subr.bf16.mxu0 %v2517_v8  ;;  %v2536_v11 = vld [vmem:[%s2514_s7 + $0xc] ss:$16 sps:$4 sm:$0xff]   ;;  %s2426_s11 = smov 124   ;;  %s2427_s12 = smov 123   ;;  %v2729_v57 = vld [vmem:[%s2514_s7 + $0x24] ss:$16 sps:$4 sm:$0xff]  }
  0x29   : > { %347 = vrot.lane.b32.xlu1 %v2520_v9, %s2423_s8  ;;  %677 = vmatpush1.bf16.msra.mxu0 %v2520_v9  ;;  %s2428_s13 = smov 122   ;;  %s2429_s14 = smov 121   ;;  %v2744_v62 = vld [vmem:[%s2514_s7 + $0x28] ss:$16 sps:$4 sm:$0xff]   ;;  %v2757_v4 = vld [vmem:[%s2514_s7 + $0x20] ss:$16 sps:$4 sm:$0xff]  }
  0x2a   : > { %s2430_s17 = smov 120   ;;  %p256_p10 = scmp.lt.s32.totalorder %s2484_s18, 1  ;;  %v2764_v7 = vld [vmem:[%s2514_s7 + $0x2c] ss:$16 sps:$4 sm:$0xff]   ;;  %vm520_vm11 = vcmask 949248   ;;  %vm535_vm12 = vcmask 941056  }
  0x2b   : > { %s2431_s20 = smov 119   ;;  %s2433_s28 = smov 118   ;;  %vm550_vm13 = vcmask 932864   ;;  %vm565_vm14 = vcmask 924672   ;;  %vm604_vm15 = vcmask 916480  }
  0x2c   : > { %351 = vrot.lane.b32.xlu0 %v2525_v10, %s2423_s8  ;;  %s2588_s21 = scalar_select %p256_p10, %s2484_s18, 1 }
  0x2d   : > { %364 = vrot.lane.b32.xlu1 %v2517_v8, %s2424_s9  ;;  %s2434_s29 = smov 117   ;;  %s2435_s30 = smov 116  }
  0x2e   : > { %s2330_s24 = smul.u32 36, %s2588_s21  ;;  %s2436_s6 = smov 115  }
  0x2f   : > { %s3668_s25 = smov 113   ;;  %s2439_s26 = smov 112  }
  0x30   : > { %366 = vrot.lane.b32.xlu0 %v2525_v10, %s2424_s9  ;;  %s2600_s27 = scalar_lea.vmem %s3663_s1, %s2330_s24  ;;  %s3670_s24 = smov 114  }
  0x31   : > { %353 = vrot.lane.b32.xlu1 %v2536_v11, %s2423_s8  ;;  %v2391_v13 = vld [vmem:[%s2600_s27 + $0x4] ss:$12 sps:$4 sm:$0xff]   ;;  %s2331_s5 = smul.u32 24, %s2588_s21 }
  0x32   : > { %708 = vmatprep.mubr.bf16.mxu0 %v2391_v13  ;;  %810 = vmatprep.mubr.bf16.mxu1 %v2391_v13 }
  0x33   : > { %s2739_s21 = scalar_lea.vmem %s3664_s2, %s2331_s5  ;;  %s3719_s5 = smov 114  }
  0x34   : > { %362 = vrot.lane.b32.xlu0 %v2520_v9, %s2424_s9  ;;  %v273_v0 = vld [vmem:[%s2739_s21] sm:$0xff] }
  0x35   : > { %379 = vrot.lane.b32.xlu1 %v2517_v8, %s2425_s10 }
  0x38   : > { %381 = vrot.lane.b32.xlu0 %v2525_v10, %s2425_s10 }
  0x39   : > { %368 = vrot.lane.b32.xlu1 %v2536_v11, %s2424_s9 }
  0x3c   : > { %377 = vrot.lane.b32.xlu0 %v2520_v9, %s2425_s10 }
  0x3d   : > { %394 = vrot.lane.b32.xlu1 %v2517_v8, %s2426_s11 }
  0x40   : > { %396 = vrot.lane.b32.xlu0 %v2525_v10, %s2426_s11 }
  0x41   : > { %383 = vrot.lane.b32.xlu1 %v2536_v11, %s2425_s10 }
  0x44   : > { %392 = vrot.lane.b32.xlu0 %v2520_v9, %s2426_s11 }
  0x45   : > { %409 = vrot.lane.b32.xlu1 %v2517_v8, %s2427_s12 }
  0x48   : > { %411 = vrot.lane.b32.xlu0 %v2525_v10, %s2427_s12 }
  0x49   : > { %407 = vrot.lane.b32.xlu1 %v2520_v9, %s2427_s12 }
  0x4c   : > { %424 = vrot.lane.b32.xlu0 %v2517_v8, %s2428_s13 }
  0x4d   : > { %426 = vrot.lane.b32.xlu1 %v2525_v10, %s2428_s13 }
  0x50   : > { %422 = vrot.lane.b32.xlu0 %v2520_v9, %s2428_s13 }
  0x51   : > { %439 = vrot.lane.b32.xlu1 %v2517_v8, %s2429_s14 }
  0x54   : > { %441 = vrot.lane.b32.xlu0 %v2525_v10, %s2429_s14 }
  0x55   : > { %437 = vrot.lane.b32.xlu1 %v2520_v9, %s2429_s14 }
  0x58   : > { %454 = vrot.lane.b32.xlu0 %v2517_v8, %s2430_s17 }
  0x59   : > { %456 = vrot.lane.b32.xlu1 %v2525_v10, %s2430_s17 }
  0x5c   : > { %452 = vrot.lane.b32.xlu0 %v2520_v9, %s2430_s17 }
  0x5d   : > { %469 = vrot.lane.b32.xlu1 %v2517_v8, %s2431_s20 }
  0x60   : > { %471 = vrot.lane.b32.xlu0 %v2525_v10, %s2431_s20 }
  0x61   : > { %467 = vrot.lane.b32.xlu1 %v2520_v9, %s2431_s20 }
  0x64   : > { %484 = vrot.lane.b32.xlu0 %v2517_v8, %s2433_s28 }
  0x65   : > { %486 = vrot.lane.b32.xlu1 %v2525_v10, %s2433_s28 }
  0x68   : > { %482 = vrot.lane.b32.xlu0 %v2520_v9, %s2433_s28 }
  0x69   : > { %499 = vrot.lane.b32.xlu1 %v2517_v8, %s2434_s29 }
  0x6c   : > { %501 = vrot.lane.b32.xlu0 %v2525_v10, %s2434_s29 }
  0x6d   : > { %497 = vrot.lane.b32.xlu1 %v2520_v9, %s2434_s29 }
  0x70   : > { %514 = vrot.lane.b32.xlu0 %v2517_v8, %s2435_s30 }
  0x71   : > { %516 = vrot.lane.b32.xlu1 %v2525_v10, %s2435_s30 }
  0x74   : > { %512 = vrot.lane.b32.xlu0 %v2520_v9, %s2435_s30 }
  0x75   : > { %529 = vrot.lane.b32.xlu1 %v2517_v8, %s2436_s6 }
  0x78   : > { %531 = vrot.lane.b32.xlu0 %v2525_v10, %s2436_s6 }
  0x79   : > { %527 = vrot.lane.b32.xlu1 %v2520_v9, %s2436_s6 }
  0x7c   : > { %544 = vrot.lane.b32.xlu0 %v2517_v8, %s3670_s24 }
  0x7d   : > { %546 = vrot.lane.b32.xlu1 %v2525_v10, %s3670_s24 }
  0x80   : > { %542 = vrot.lane.b32.xlu0 %v2520_v9, %s3670_s24 }
  0x81   : > { %559 = vrot.lane.b32.xlu1 %v2517_v8, %s3668_s25 }
  0x84   : > { %561 = vrot.lane.b32.xlu0 %v2525_v10, %s3668_s25 }
  0x85   : > { %557 = vrot.lane.b32.xlu1 %v2520_v9, %s3668_s25 }
  0x88   : > { %574 = vrot.lane.b32.xlu0 %v2517_v8, %s2439_s26 }
  0x89   : > { %576 = vrot.lane.b32.xlu1 %v2525_v10, %s2439_s26 }
  0x8c   : > { %572 = vrot.lane.b32.xlu0 %v2520_v9, %s2439_s26 }
  0x8d   : > { %458 = vrot.lane.b32.xlu1 %v2536_v11, %s2430_s17 }
  0x91   : > { %473 = vrot.lane.b32.xlu1 %v2536_v11, %s2431_s20 }
  0x9a   : > { %v350_v14 = vpop.permute.xlu0 %349 }
  0x9b   : > { %v348_v15 = vpop.permute.xlu1 %347 }
  0x9c   : > { %v356_v19 = vsel %vm355_vm0, %v348_v15, %v350_v14 }
  0x9e   : > { %v352_v16 = vpop.permute.xlu0 %351 }
  0x9f   : > { %v365_v17 = vpop.permute.xlu1 %364  ;;  %v357_v18 = vsel %vm355_vm0, %v350_v14, %v352_v16 }
  0xa0   : > { %582 = vrot.lane.b32.xlu1 %v357_v18, %s2439_s26  ;;  %678 = vmatprep.subr.bf16.mxu0 %v357_v18 }
  0xa1   : > { %679 = vmatpush1.bf16.msra.mxu0 %v356_v19 }
  0xa2   : > { %v367_v20 = vpop.permute.xlu0 %366 }
  0xa3   : > { %v2652_v21 = vpop.permute.xlu1 %353  ;;  %v372_v22 = vsel %vm370_vm1, %v365_v17, %v367_v20 }
  0xa4   : > { %590 = vrot.lane.b32.xlu1 %v372_v22, %s2439_s26  ;;  %v2658_v23 = vsel %vm355_vm0, %v352_v16, %v2652_v21  ;;  %680 = vmatprep.subr.bf16.mxu0 %v372_v22 }
  0xa5   : > { %584 = vrot.lane.b32.xlu0 %v2658_v23, %s2439_s26 }
  0xa6   : > { %v363_v24 = vpop.permute.xlu0 %362 }
  0xa7   : > { %v380_v25 = vpop.permute.xlu1 %379  ;;  %v371_v26 = vsel %vm370_vm1, %v363_v24, %v365_v17 }
  0xa8   : > { %681 = vmatpush1.bf16.msra.mxu0 %v371_v26 }
  0xa9   : > { %580 = vrot.lane.b32.xlu0 %v356_v19, %s2439_s26 }
  0xaa   : > { %v382_v27 = vpop.permute.xlu0 %381 }
  0xab   : > { %v2664_v28 = vpop.permute.xlu1 %368  ;;  %v387_v29 = vsel %vm385_vm2, %v380_v25, %v382_v27 }
  0xac   : > { %598 = vrot.lane.b32.xlu1 %v387_v29, %s2439_s26  ;;  %v2670_v30 = vsel %vm370_vm1, %v367_v20, %v2664_v28  ;;  %682 = vmatprep.subr.bf16.mxu0 %v387_v29 }
  0xad   : > { %592 = vrot.lane.b32.xlu0 %v2670_v30, %s2439_s26 }
  0xae   : > { %v378_v31 = vpop.permute.xlu0 %377 }
  0xaf   : > { %v395_v32 = vpop.permute.xlu1 %394  ;;  %v386_v33 = vsel %vm385_vm2, %v378_v31, %v380_v25 }
  0xb0   : > { %488 = vrot.lane.b32.xlu1 %v2536_v11, %s2433_s28  ;;  %683 = vmatpush1.bf16.msra.mxu0 %v386_v33 }
  0xb1   : > { %588 = vrot.lane.b32.xlu0 %v371_v26, %s2439_s26 }
  0xb2   : > { %v2678_v34 = vpop.permute.xlu0 %396 }
  0xb3   : > { %v384_v35 = vpop.permute.xlu1 %383  ;;  %v402_v36 = vsel %vm400_vm3, %v395_v32, %v2678_v34 }
  0xb4   : > { %503 = vrot.lane.b32.xlu1 %v2536_v11, %s2434_s29  ;;  %v2685_v37 = vsel %vm385_vm2, %v382_v27, %v384_v35  ;;  %684 = vmatprep.subr.bf16.mxu0 %v402_v36 }
  0xb5   : > { %600 = vrot.lane.b32.xlu0 %v2685_v37, %s2439_s26 }
  0xb6   : > { %v393_v38 = vpop.permute.xlu0 %392 }
  0xb7   : > { %v410_v39 = vpop.permute.xlu1 %409  ;;  %v401_v40 = vsel %vm400_vm3, %v393_v38, %v395_v32 }
  0xb8   : > { %398 = vrot.lane.b32.xlu1 %v2536_v11, %s2426_s11  ;;  %685 = vmatpush1.bf16.msra.mxu0 %v401_v40 }
  0xb9   : > { %596 = vrot.lane.b32.xlu0 %v386_v33, %s2439_s26 }
  0xba   : > { %v2693_v41 = vpop.permute.xlu0 %411 }
  0xbb   : > { %v408_v42 = vpop.permute.xlu1 %407  ;;  %v417_v43 = vsel %vm415_vm4, %v410_v39, %v2693_v41 }
  0xbc   : > { %413 = vrot.lane.b32.xlu1 %v2536_v11, %s2427_s12  ;;  %686 = vmatprep.subr.bf16.mxu0 %v417_v43  ;;  %v416_v44 = vsel %vm415_vm4, %v408_v42, %v410_v39  ;;  %v271_v42 = vld [vmem:[%s2600_s27 + $0x18] sm:$0x33] }
  0xbd   : > { %518 = vrot.lane.b32.xlu0 %v2536_v11, %s2435_s30  ;;  %687 = vmatpush1.bf16.msra.mxu0 %v416_v44  ;;  %v2828_v44 = vld [vmem:[%s2600_s27] ss:$12 sps:$4 sm:$0xff]  }
  0xbe   : > { %v425_v45 = vpop.permute.xlu0 %424  ;;  %3714 = vst [vmem:[#allocation4_spill] sm:$0xff] %v2828_v44 }
  0xbf   : > { %v2702_v46 = vpop.permute.xlu1 %426 }
  0xc0   : > { %428 = vrot.lane.b32.xlu1 %v2536_v11, %s2428_s13  ;;  %v432_v47 = vsel %vm430_vm5, %v425_v45, %v2702_v46 }
  0xc1   : > { %533 = vrot.lane.b32.xlu0 %v2536_v11, %s2436_s6  ;;  %688 = vmatprep.subr.bf16.mxu0 %v432_v47  ;;  %v2832_v47 = vcombine.high %v271_v42, %v271_v42 }
  0xc2   : > { %v423_v48 = vpop.permute.xlu0 %422 }
  0xc3   : > { %v440_v49 = vpop.permute.xlu1 %439  ;;  %v431_v50 = vsel %vm430_vm5, %v423_v48, %v425_v45  ;;  %3715 = vst [vmem:[#allocation5_spill] sm:$0xff] %v2832_v47 }
  0xc4   : > { %443 = vrot.lane.b32.xlu1 %v2536_v11, %s2429_s14  ;;  %689 = vmatpush1.bf16.msra.mxu0 %v431_v50 }
  0xc5   : > { %548 = vrot.lane.b32.xlu0 %v2536_v11, %s3670_s24  ;;  %s3722_s24 = smov 113  }
  0xc6   : > { %v2715_v51 = vpop.permute.xlu0 %441 }
  0xc7   : > { %v438_v52 = vpop.permute.xlu1 %437  ;;  %v447_v53 = vsel %vm445_vm6, %v440_v49, %v2715_v51 }
  0xc8   : > { %586 = vrot.lane.b32.xlu1 %v2652_v21, %s2439_s26  ;;  %690 = vmatprep.subr.bf16.mxu0 %v447_v53  ;;  %v446_v54 = vsel %vm445_vm6, %v438_v52, %v440_v49 }
  0xc9   : > { %563 = vrot.lane.b32.xlu0 %v2536_v11, %s3668_s25  ;;  %691 = vmatpush1.bf16.msra.mxu0 %v446_v54 }
  0xca   : > { %v455_v55 = vpop.permute.xlu0 %454 }
  0xcb   : > { %v2724_v56 = vpop.permute.xlu1 %456 }
  0xcc   : > { %602 = vrot.lane.b32.xlu1 %v384_v35, %s2439_s26  ;;  %v462_v58 = vsel %vm460_vm7, %v455_v55, %v2724_v56 }
  0xcd   : > { %578 = vrot.lane.b32.xlu0 %v2536_v11, %s2439_s26  ;;  %692 = vmatprep.subr.bf16.mxu0 %v462_v58 }
  0xce   : > { %v453_v59 = vpop.permute.xlu0 %452 }
  0xcf   : > { %v470_v60 = vpop.permute.xlu1 %469  ;;  %v461_v61 = vsel %vm460_vm7, %v453_v59, %v455_v55  ;;  %v2849_v55 = vcombine.low %v271_v42, %v271_v42 }
  0xd0   : > { %1074 = vrot.lane.b32.xlu1 %v2729_v57, %s2423_s8  ;;  %693 = vmatpush1.bf16.msra.mxu0 %v461_v61 }
  0xd1   : > { %594 = vrot.lane.b32.xlu0 %v2664_v28, %s2439_s26  ;;  %3716 = vst [vmem:[#allocation6_spill] sm:$0xff] %v2849_v55 }
  0xd2   : > { %v2748_v63 = vpop.permute.xlu0 %471 }
  0xd3   : > { %v468_v1 = vpop.permute.xlu1 %467  ;;  %v477_v2 = vsel %vm475_vm8, %v470_v60, %v2748_v63 }
  0xd4   : > { %1076 = vrot.lane.b32.xlu1 %v2744_v62, %s2423_s8  ;;  %694 = vmatprep.subr.bf16.mxu0 %v477_v2  ;;  %v476_v3 = vsel %vm475_vm8, %v468_v1, %v470_v60  ;;  %v274_v1 = vld [vmem:[%s2739_s21 + $0x8] sm:$0xff] }
  0xd5   : > { %631 = vperm.xlu0 %2377, %v273_v0   ;;  %695 = vmatpush1.bf16.msra.mxu0 %v476_v3 }
  0xd6   : > { %v485_v5 = vpop.permute.xlu0 %484 }
  0xd7   : > { %v2759_v6 = vpop.permute.xlu1 %486 }
  0xd8   : > { %1088 = vrot.lane.b32.xlu1 %v2729_v57, %s2424_s9  ;;  %v492_v8 = vsel %vm490_vm9, %v485_v5, %v2759_v6 }
  0xd9   : > { %1072 = vrot.lane.b32.xlu0 %v2757_v4, %s2423_s8  ;;  %696 = vmatprep.subr.bf16.mxu0 %v492_v8 }
  0xda   : > { %v483_v9 = vpop.permute.xlu0 %482 }
  0xdb   : > { %v500_v11 = vpop.permute.xlu1 %499  ;;  %v491_v13 = vsel %vm490_vm9, %v483_v9, %v485_v5 }
  0xdc   : > { %1078 = vrot.lane.b32.xlu1 %v2764_v7, %s2423_s8  ;;  %697 = vmatpush1.bf16.msra.mxu0 %v491_v13  ;;  %v275_v13 = vld [vmem:[%s2739_s21 + $0x10] sm:$0xf] }
  0xdd   : > { %1090 = vrot.lane.b32.xlu0 %v2744_v62, %s2424_s9 }
  0xde   : > { %v2775_v14 = vpop.permute.xlu0 %501 }
  0xdf   : > { %v498_v15 = vpop.permute.xlu1 %497  ;;  %v507_v16 = vsel %vm3672_vm10, %v500_v11, %v2775_v14 }
  0xe0   : > { %1102 = vrot.lane.b32.xlu1 %v2729_v57, %s2425_s10  ;;  %698 = vmatprep.subr.bf16.mxu0 %v507_v16  ;;  %v506_v17 = vsel %vm3672_vm10, %v498_v15, %v500_v11 }
  0xe1   : > { %1086 = vrot.lane.b32.xlu0 %v2757_v4, %s2424_s9  ;;  %699 = vmatpush1.bf16.msra.mxu0 %v506_v17 }
  0xe2   : > { %v515_v18 = vpop.permute.xlu0 %514 }
  0xe3   : > { %v2784_v19 = vpop.permute.xlu1 %516 }
  0xe4   : > { %1092 = vrot.lane.b32.xlu1 %v2764_v7, %s2424_s9  ;;  %v522_v20 = vsel %vm520_vm11, %v515_v18, %v2784_v19 }
  0xe5   : > { %1104 = vrot.lane.b32.xlu0 %v2744_v62, %s2425_s10  ;;  %700 = vmatprep.subr.bf16.mxu0 %v522_v20 }
  0xe6   : > { %v513_v21 = vpop.permute.xlu0 %512 }
  0xe7   : > { %v530_v22 = vpop.permute.xlu1 %529  ;;  %v521_v24 = vsel %vm520_vm11, %v513_v21, %v515_v18  ;;  %v2919_v21 = vld [vmem:[%s2600_s27 + $0x8] ss:$12 sps:$4 sm:$0xff]  }
  0xe8   : > { %1116 = vrot.lane.b32.xlu1 %v2729_v57, %s2426_s11  ;;  %701 = vmatpush1.bf16.msra.mxu0 %v521_v24  ;;  %3717 = vst [vmem:[#allocation7_spill] sm:$0xff] %v2919_v21 }
  0xe9   : > { %1100 = vrot.lane.b32.xlu0 %v2757_v4, %s2425_s10 }
  0xea   : > { %v2797_v25 = vpop.permute.xlu0 %531 }
  0xeb   : > { %v528_v26 = vpop.permute.xlu1 %527  ;;  %v537_v27 = vsel %vm535_vm12, %v530_v22, %v2797_v25 }
  0xec   : > { %1106 = vrot.lane.b32.xlu1 %v2764_v7, %s2425_s10  ;;  %702 = vmatprep.subr.bf16.mxu0 %v537_v27  ;;  %v536_v28 = vsel %vm535_vm12, %v528_v26, %v530_v22 }
  0xed   : > { %1118 = vrot.lane.b32.xlu0 %v2744_v62, %s2426_s11  ;;  %703 = vmatpush1.bf16.msra.mxu0 %v536_v28 }
  0xee   : > { %v545_v29 = vpop.permute.xlu0 %544 }
  0xef   : > { %v2806_v31 = vpop.permute.xlu1 %546 }
  0xf0   : > { %1130 = vrot.lane.b32.xlu1 %v2729_v57, %s2427_s12  ;;  %v552_v32 = vsel %vm550_vm13, %v545_v29, %v2806_v31 }
  0xf1   : > { %1114 = vrot.lane.b32.xlu0 %v2757_v4, %s2426_s11  ;;  %704 = vmatprep.subr.bf16.mxu0 %v552_v32 }
  0xf2   : > { %v543_v33 = vpop.permute.xlu0 %542 }
  0xf3   : > { %v560_v35 = vpop.permute.xlu1 %559  ;;  %v551_v36 = vsel %vm550_vm13, %v543_v33, %v545_v29  ;;  %v2939_v29 = vld [vmem:[%s2600_s27 + $0x20] ss:$0 sps:$4 sm:$0x33]  }
  0xf4   : > { %1128 = vrot.lane.b32.xlu1 %v2757_v4, %s2427_s12  ;;  %705 = vmatpush1.bf16.msra.mxu0 %v551_v36  ;;  %3718 = vst [vmem:[#allocation8_spill] sm:$0xff] %v2939_v29 }
  0xf5   : > { %1132 = vrot.lane.b32.xlu0 %v2744_v62, %s2427_s12 }
  0xf6   : > { %v2819_v38 = vpop.permute.xlu0 %561 }
  0xf7   : > { %v558_v39 = vpop.permute.xlu1 %557  ;;  %v567_v40 = vsel %vm565_vm14, %v560_v35, %v2819_v38 }
  0xf8   : > { %1146 = vrot.lane.b32.xlu1 %v2744_v62, %s2428_s13  ;;  %706 = vmatprep.subr.bf16.mxu0 %v567_v40  ;;  %v566_v43 = vsel %vm565_vm14, %v558_v39, %v560_v35 }
  0xf9   : > { %1144 = vrot.lane.b32.xlu0 %v2729_v57, %s2428_s13  ;;  %707 = vmatpush1.bf16.msra.mxu0 %v566_v43 }
  0xfa   : > { %v575_v45 = vpop.permute.xlu0 %574 }
  0xfb   : > { %v2834_v48 = vpop.permute.xlu1 %576 }
  0xfc   : > { %1158 = vrot.lane.b32.xlu1 %v2729_v57, %s2429_s14  ;;  %v606_v49 = vsel %vm604_vm15, %v575_v45, %v2834_v48  ;;  %709 = vmatmul.mubr.bf16.vlgmr.msra.gmra.mrb[0].mxu0 %v2828_v44 }
  0xfd   : > { %1142 = vrot.lane.b32.xlu0 %v2757_v4, %s2428_s13  ;;  %727 = vmatprep.subr.bf16.mxu0 %v606_v49  ;;  %v311_v49 = vld [vmem:[%s3665_s3 + $0x118] sm:$0xff] }
  0xfe   : > { %v573_v50 = vpop.permute.xlu0 %572  ;;  %718 = vmatprep.mubr.bf16.mxu0 %v2832_v47 }
  0xff   : > { %v459_v52 = vpop.permute.xlu1 %458  ;;  %v605_v53 = vsel %vm604_vm15, %v573_v50, %v575_v45  ;;  %v310_v45 = vld [vmem:[%s3665_s3 + $0x110] sm:$0xff] }
 0x100   : > { %v463_v54 = vsel %vm460_vm7, %v2724_v56, %v459_v52  ;;  %1156 = vrot.lane.b32.xlu1 %v2757_v4, %s2429_s14  ;;  %728 = vmatpush1.bf16.msra.mxu0 %v605_v53  ;;  %v2986_v50 = vpack.c.bf16 %v311_v49, %v310_v45  ;;  %v298_v45 = vld [vmem:[%s3665_s3 + $0xb0] sm:$0xff]  ;;  %v299_v49 = vld [vmem:[%s3665_s3 + $0xb8] sm:$0xff] }
 0x101   : > { %1895 = vmatprep.subr.bf16.mxu1 %v463_v54  ;;  %1160 = vrot.lane.b32.xlu0 %v2744_v62, %s2429_s14 }
 0x102   : > { %1896 = vmatpush3.bf16.msra.mxu1 %v2525_v10  ;;  %3721 = vst [vmem:[#allocation10_spill] sm:$0xff] %v2986_v50 }
 0x103   : > { %v474_v58 = vpop.permute.xlu1 %473 }
 0x104   : > { %v478_v59 = vsel %vm475_vm8, %v2748_v63, %v474_v58  ;;  %1174 = vrot.lane.b32.xlu1 %v2744_v62, %s2430_s17  ;;  %719 = vmatmul.mubr.bf16.gmra.mrb[4].mxu0 %v2849_v55  ;;  %v313_v58 = vld [vmem:[%s3665_s3 + $0x128] sm:$0xff] }
 0x105   : > { %1897 = vmatprep.subr.bf16.mxu1 %v478_v59  ;;  %1172 = vrot.lane.b32.xlu0 %v2729_v57, %s2430_s17 }
 0x106   : > { %1898 = vmatpush3.bf16.msra.mxu1 %v2658_v23  ;;  %759 = vmatprep.mubr.bf16.mxu0 %v3675_v12 }
 0x108   : > { %1176 = vrot.lane.b32.xlu1 %v2764_v7, %s2430_s17 }
 0x109   : > { %1170 = vrot.lane.b32.xlu0 %v2757_v4, %s2430_s17 }
 0x10c   : > { %1188 = vrot.lane.b32.xlu1 %v2744_v62, %s2431_s20 }
 0x10d   : > { %1186 = vrot.lane.b32.xlu0 %v2729_v57, %s2431_s20 }
 0x110   : > { %1190 = vrot.lane.b32.xlu1 %v2764_v7, %s2431_s20 }
 0x111   : > { %1184 = vrot.lane.b32.xlu0 %v2757_v4, %s2431_s20 }
 0x112   : > { %v583_v10 = vpop.permute.xlu1 %582 }
 0x114   : > { %1202 = vrot.lane.b32.xlu1 %v2744_v62, %s2433_s28 }
 0x115   : > { %1200 = vrot.lane.b32.xlu0 %v2729_v57, %s2433_s28 }
 0x116   : > { %v591_v60 = vpop.permute.xlu1 %590 }
 0x117   : > { %v2879_v23 = vpop.permute.xlu0 %584 }
 0x118   : > { %v609_v56 = vsel %vm604_vm15, %v583_v10, %v2879_v23  ;;  %1204 = vrot.lane.b32.xlu1 %v2764_v7, %s2433_s28 }
 0x119   : > { %729 = vmatprep.subr.bf16.mxu0 %v609_v56  ;;  %1198 = vrot.lane.b32.xlu0 %v2757_v4, %s2433_s28  ;;  %v314_v56 = vld [vmem:[%s3665_s3 + $0x130] sm:$0xff] }
 0x11b   : > { %v581_v61 = vpop.permute.xlu0 %580 }
 0x11c   : > { %v608_v63 = vsel %vm604_vm15, %v581_v61, %v583_v10  ;;  %1216 = vrot.lane.b32.xlu1 %v2744_v62, %s2434_s29 }
 0x11d   : > { %730 = vmatpush1.bf16.msra.mxu0 %v608_v63  ;;  %1214 = vrot.lane.b32.xlu0 %v2729_v57, %s2434_s29 }
 0x11e   : > { %v599_v0 = vpop.permute.xlu1 %598 }
 0x11f   : > { %v2893_v2 = vpop.permute.xlu0 %592 }
 0x120   : > { %v612_v3 = vsel %vm604_vm15, %v591_v60, %v2893_v2  ;;  %1212 = vrot.lane.b32.xlu1 %v2757_v4, %s2434_s29 }
 0x121   : > { %731 = vmatprep.subr.bf16.mxu0 %v612_v3  ;;  %636 = vperm.xlu0 %2377, %v274_v1   ;;  %v316_v1 = vld [vmem:[%s3665_s3 + $0x140] sm:$0xff] }
 0x122   : > { %v489_v5 = vpop.permute.xlu1 %488 }
 0x123   : > { %v589_v8 = vpop.permute.xlu0 %588  ;;  %v493_v9 = vsel %vm490_vm9, %v2759_v6, %v489_v5 }
 0x124   : > { %v611_v11 = vsel %vm604_vm15, %v589_v8, %v591_v60  ;;  %1899 = vmatprep.subr.bf16.mxu1 %v493_v9  ;;  %1228 = vrot.lane.b32.xlu1 %v2729_v57, %s2435_s30  ;;  %v315_v60 = vld [vmem:[%s3665_s3 + $0x138] sm:$0xff]  ;;  %v318_v8 = vld [vmem:[%s3665_s3 + $0x150] sm:$0xff] }
 0x125   : > { %732 = vmatpush1.bf16.msra.mxu0 %v611_v11  ;;  %1900 = vmatpush3.bf16.msra.mxu1 %v2670_v30  ;;  %v3025_v61 = vpack.c.bf16 %v315_v60, %v314_v56  ;;  %v319_v9 = vld [vmem:[%s3665_s3 + $0x158] sm:$0xff]  ;;  %v300_v56 = vld [vmem:[%s3665_s3 + $0xc0] sm:$0xff]  ;;  %v301_v60 = vld [vmem:[%s3665_s3 + $0xc8] sm:$0xff] }
 0x126   : > { %v504_v15 = vpop.permute.xlu1 %503  ;;  %1218 = vrot.lane.b32.xlu0 %v2764_v7, %s2434_s29  ;;  %v3061_v11 = vpack.c.bf16 %v319_v9, %v318_v8  ;;  %v285_v8 = vld [vmem:[%s3665_s3 + $0x48] sm:$0xff] }
 0x127   : > { %v2908_v16 = vpop.permute.xlu0 %600  ;;  %v508_v6 = vsel %vm3672_vm10, %v2775_v14, %v504_v15  ;;  %vm669_vm10 = vcmask 523264   ;;  %3724 = vst [vmem:[#allocation12_spill] sm:$0xff] %v3025_v61  ;;  %v321_v15 = vld [vmem:[%s3665_s3 + $0x168] sm:$0xff] }
 0x128   : > { %v615_v17 = vsel %vm604_vm15, %v599_v0, %v2908_v16  ;;  %1901 = vmatprep.subr.bf16.mxu1 %v508_v6  ;;  %641 = vperm.xlu1 %2378, %v275_v13   ;;  %3726 = vst [vmem:[#allocation14_spill] sm:$0xff] %v3061_v11  ;;  %v320_v13 = vld [vmem:[%s3665_s3 + $0x160] sm:$0xff] }
 0x129   : > { %733 = vmatprep.subr.bf16.mxu0 %v615_v17  ;;  %1902 = vmatpush3.bf16.msra.mxu1 %v2685_v37  ;;  %v292_v6 = vld [vmem:[%s3665_s3 + $0x80] sm:$0xff]  ;;  %v293_v17 = vld [vmem:[%s3665_s3 + $0x88] sm:$0xff] }
 0x12a   : > { %v399_v18 = vpop.permute.xlu1 %398  ;;  %1230 = vrot.lane.b32.xlu0 %v2744_v62, %s2435_s30 }
 0x12b   : > { %v597_v30 = vpop.permute.xlu0 %596  ;;  %v403_v24 = vsel %vm400_vm3, %v2678_v34, %v399_v18  ;;  %v276_v18 = vld [vmem:[%s3665_s3] sm:$0xff] }
 0x12c   : > { %v614_v20 = vsel %vm604_vm15, %v597_v30, %v599_v0  ;;  %1232 = vrot.lane.b32.xlu1 %v2764_v7, %s2435_s30  ;;  %v3082_v30 = vpack.c.bf16 %v293_v17, %v292_v6  ;;  %v303_v6 = vld [vmem:[%s3665_s3 + $0xd8] sm:$0xff] }
 0x12d   : > { %734 = vmatpush1.bf16.msra.mxu0 %v614_v20  ;;  %v277_v20 = vld [vmem:[%s3665_s3 + $0x8] sm:$0xff] }
 0x12e   : > { %v414_v14 = vpop.permute.xlu1 %413  ;;  %1226 = vrot.lane.b32.xlu0 %v2757_v4, %s2435_s30  ;;  %3727 = vst [vmem:[#allocation15_spill] sm:$0xff] %v3082_v30 }
 0x12f   : > { %v519_v37 = vpop.permute.xlu0 %518  ;;  %v418_v34 = vsel %vm415_vm4, %v2693_v41, %v414_v14  ;;  %v3673_v41 = vmov 0.0|0.0   ;;  %v294_v14 = vld [vmem:[%s3665_s3 + $0x90] sm:$0xff] }
 0x130   : > { %1872 = vmatmul.mubr.msk.bf16.vlgmr.msra.gmra.mrb[0].mxu0 %vm669_vm10, %v2919_v21  ;;  %v523_v22 = vsel %vm520_vm11, %v2784_v19, %v519_v37  ;;  %1244 = vrot.lane.b32.xlu1 %v2744_v62, %s2436_s6  ;;  %v295_v37 = vld [vmem:[%s3665_s3 + $0x98] sm:$0xff] }
 0x131   : > { %1903 = vmatprep.subr.bf16.mxu1 %v523_v22  ;;  %769 = vmatprep.mubr.bf16.mxu0 %v3675_v12 }
 0x132   : > { %1904 = vmatpush3.bf16.msra.mxu1 %v403_v24  ;;  %v429_v26 = vpop.permute.xlu1 %428  ;;  %1242 = vrot.lane.b32.xlu0 %v2729_v57, %s2436_s6  ;;  %v3098_v24 = vpack.c.bf16 %v321_v15, %v320_v13  ;;  %v302_v15 = vld [vmem:[%s3665_s3 + $0xd0] sm:$0xff] }
 0x133   : > { %v534_v27 = vpop.permute.xlu0 %533  ;;  %v433_v33 = vsel %vm430_vm5, %v2702_v46, %v429_v26  ;;  %2221 = vmatprep.subr.bf16.mxu0 %v3673_v41  ;;  %v309_v46 = vld [vmem:[%s3665_s3 + $0x108] sm:$0xff]  ;;  %v3100_v26 = vpack.c.bf16 %v277_v20, %v276_v18  ;;  %v3224_v20 = vpack.c.bf16 %v303_v6, %v302_v15 }
 0x134   : > { %v538_v28 = vsel %vm535_vm12, %v2797_v25, %v534_v27  ;;  %1240 = vrot.lane.b32.xlu1 %v2757_v4, %s2436_s6  ;;  %3728 = vst [vmem:[#allocation16_spill] sm:$0xff] %v3098_v24  ;;  %v3102_v27 = vpack.c.bf16 %v295_v37, %v294_v14  ;;  %v286_v14 = vld [vmem:[%s3665_s3 + $0x50] sm:$0xff]  ;;  %v287_v37 = vld [vmem:[%s3665_s3 + $0x58] sm:$0xff] }
 0x135   : > { %1905 = vmatprep.subr.bf16.mxu1 %v538_v28  ;;  %3729 = vst [vmem:[#allocation17_spill] sm:$0xff] %v3100_v26  ;;  %v278_v28 = vld [vmem:[%s3665_s3 + $0x10] sm:$0xff]  ;;  %3739 = vst [vmem:[#allocation27_spill] sm:$0xff] %v3224_v20 }
 0x136   : > { %1906 = vmatpush3.bf16.msra.mxu1 %v418_v34  ;;  %v444_v19 = vpop.permute.xlu1 %443  ;;  %1120 = vrot.lane.b32.xlu0 %v2764_v7, %s2426_s11  ;;  %3730 = vst [vmem:[#allocation18_spill] sm:$0xff] %v3102_v27  ;;  %v279_v34 = vld [vmem:[%s3665_s3 + $0x18] sm:$0xff] }
 0x137   : > { %v549_v32 = vpop.permute.xlu0 %548  ;;  %v448_v40 = vsel %vm445_vm6, %v2715_v51, %v444_v19 }
 0x138   : > { %1873 = vmatmul.mubr.msk.bf16.gmra.mrb[4].mxu0 %vm669_vm10, %v2939_v29  ;;  %v553_v25 = vsel %vm550_vm13, %v2806_v31, %v549_v32  ;;  %1256 = vrot.lane.b32.xlu1 %v2729_v57, %s3719_s5  ;;  %v308_v31 = vld [vmem:[%s3665_s3 + $0x100] sm:$0xff]  ;;  %v322_v32 = vld [vmem:[%s3665_s3 + $0x170] sm:$0xff] }
 0x139   : > { %1907 = vmatprep.subr.bf16.mxu1 %v553_v25  ;;  %v2970_v42 = vpack.c.bf16 %v309_v46, %v308_v31  ;;  %v323_v25 = vld [vmem:[%s3665_s3 + $0x178] sm:$0xff]  ;;  %v280_v31 = vld [vmem:[%s3665_s3 + $0x20] sm:$0xff]  ;;  %v281_v46 = vld [vmem:[%s3665_s3 + $0x28] sm:$0xff] }
 0x13a   : > { %1908 = vmatpush3.bf16.msra.mxu1 %v433_v33  ;;  %v587_v35 = vpop.permute.xlu1 %586  ;;  %1246 = vrot.lane.b32.xlu0 %v2764_v7, %s2436_s6  ;;  %v297_v33 = vld [vmem:[%s3665_s3 + $0xa8] sm:$0xff] }
 0x13b   : > { %v564_v36 = vpop.permute.xlu0 %563  ;;  %3720 = vst [vmem:[#allocation9_spill] sm:$0xff] %v2970_v42  ;;  %2223 = vmatpush3.bf16.msra.mxu0 %v2970_v42  ;;  %v610_v52 = vsel %vm604_vm15, %v2879_v23, %v587_v35 }
 0x13c   : > { %v568_v39 = vsel %vm565_vm14, %v2819_v38, %v564_v36  ;;  %1134 = vrot.lane.b32.xlu1 %v2764_v7, %s2427_s12  ;;  %2224 = vmatprep.subr.bf16.mxu0 %v3673_v41  ;;  %v3129_v36 = vpack.c.bf16 %v279_v34, %v278_v28 }
 0x13d   : > { %1909 = vmatprep.subr.bf16.mxu1 %v568_v39 }
 0x13e   : > { %1910 = vmatpush3.bf16.msra.mxu1 %v448_v40  ;;  %v603_v43 = vpop.permute.xlu1 %602  ;;  %1258 = vrot.lane.b32.xlu0 %v2744_v62, %s3719_s5  ;;  %3731 = vst [vmem:[#allocation19_spill] sm:$0xff] %v3129_v36 }
 0x13f   : > { %v579_v38 = vpop.permute.xlu0 %578  ;;  %2226 = vmatpush3.bf16.msra.mxu0 %v2986_v50  ;;  %v616_v63 = vsel %vm604_vm15, %v2908_v16, %v603_v43 }
 0x140   : > { %v607_v51 = vsel %vm604_vm15, %v2834_v48, %v579_v38  ;;  %1260 = vrot.lane.b32.xlu1 %v2764_v7, %s3719_s5  ;;  %v312_v48 = vld [vmem:[%s3665_s3 + $0x120] sm:$0xff]  ;;  %2227 = vmatprep.subr.bf16.mxu0 %v3673_v41  ;;  %v3150_v38 = vpack.c.bf16 %v323_v25, %v322_v32  ;;  %v305_v32 = vld [vmem:[%s3665_s3 + $0xe8] sm:$0xff] }
 0x141   : > { %811 = vmatmul.mubr.bf16.vlgmr.msra.gmra.mrb[0].mxu1 %v2828_v44  ;;  %2083 = vmatprep.subr.bf16.mxu1 %v607_v51  ;;  %v3005_v59 = vpack.c.bf16 %v313_v58, %v312_v48  ;;  %v282_v48 = vld [vmem:[%s3665_s3 + $0x30] sm:$0xff]  ;;  %v283_v58 = vld [vmem:[%s3665_s3 + $0x38] sm:$0xff] }
 0x142   : > { %2084 = vmatpush3.bf16.msra.mxu1 %v607_v51  ;;  %818 = vmatprep.mubr.bf16.mxu1 %v2832_v47  ;;  %v2992_v53 = vpop.permute.xlu1 %1074  ;;  %3733 = vst [vmem:[#allocation21_spill] sm:$0xff] %v3150_v38 }
 0x143   : > { %v595_v54 = vpop.permute.xlu0 %594  ;;  %2085 = vmatprep.subr.bf16.mxu1 %v610_v52  ;;  %1254 = vrot.lane.b32.xlu0 %v2757_v4, %s3719_s5  ;;  %3723 = vst [vmem:[#allocation11_spill] sm:$0xff] %v3005_v59 }
 0x144   : > { %1272 = vrot.lane.b32.xlu1 %v2744_v62, %s3722_s24  ;;  %v613_v10 = vsel %vm604_vm15, %v2893_v2, %v595_v54  ;;  %2229 = vmatpush3.bf16.msra.mxu0 %v3005_v59  ;;  %v317_v2 = vld [vmem:[%s3665_s3 + $0x148] sm:$0xff]  ;;  %v3167_v54 = vpack.c.bf16 %v299_v49, %v298_v45 }
 0x145   : > { %2230 = vmatprep.subr.bf16.mxu0 %v3673_v41  ;;  %v3044_v3 = vpack.c.bf16 %v317_v2, %v316_v1  ;;  %v3196_v2 = vpack.c.bf16 %v301_v60, %v300_v56 }
 0x146   : > { %2086 = vmatpush3.bf16.msra.mxu1 %v610_v52  ;;  %v3010_v23 = vpop.permute.xlu1 %1076  ;;  %v3162_v52 = vpack.c.bf16 %v281_v46, %v280_v31  ;;  %3735 = vst [vmem:[#allocation23_spill] sm:$0xff] %v3167_v54  ;;  %v3247_v31 = vpack.c.bf16 %v287_v37, %v286_v14  ;;  %v288_v46 = vld [vmem:[%s3665_s3 + $0x60] sm:$0xff]  ;;  %v306_v14 = vld [vmem:[%s3665_s3 + $0xf0] sm:$0xff]  ;;  %v307_v37 = vld [vmem:[%s3665_s3 + $0xf8] sm:$0xff] }
 0x147   : > { %2087 = vmatprep.subr.bf16.mxu1 %v613_v10  ;;  %1270 = vrot.lane.b32.xlu0 %v2729_v57, %s3722_s24  ;;  %3725 = vst [vmem:[#allocation13_spill] sm:$0xff] %v3044_v3  ;;  %v3145_v40 = vsel %vm355_vm0, %v2992_v53, %v3010_v23  ;;  %3737 = vst [vmem:[#allocation25_spill] sm:$0xff] %v3196_v2 }
 0x148   : > { %1268 = vrot.lane.b32.xlu1 %v2757_v4, %s3722_s24  ;;  %2232 = vmatpush3.bf16.msra.mxu0 %v3025_v61  ;;  %3734 = vst [vmem:[#allocation22_spill] sm:$0xff] %v3162_v52  ;;  %3740 = vst [vmem:[#allocation28_spill] sm:$0xff] %v3247_v31 }
 0x149   : > { %819 = vmatmul.mubr.bf16.gmra.mrb[4].mxu1 %v2849_v55  ;;  %2233 = vmatprep.subr.bf16.mxu0 %v3673_v41 }
 0x14a   : > { %2088 = vmatpush3.bf16.msra.mxu1 %v613_v10  ;;  %2091 = vmatprep.mubr.msk.bf16.mxu1 %vm669_vm10, %v2919_v21  ;;  %v3031_v0 = vpop.permute.xlu1 %1088 }
 0x14b   : > { %2089 = vmatprep.subr.bf16.mxu1 %v616_v63  ;;  %1148 = vrot.lane.b32.xlu0 %v2764_v7, %s2428_s13 }
 0x14c   : > { %1284 = vrot.lane.b32.xlu1 %v2729_v57, %s2439_s26  ;;  %2235 = vmatpush3.bf16.msra.mxu0 %v3044_v3 }
 0x14d   : > { %2236 = vmatprep.subr.bf16.mxu0 %v3673_v41 }
 0x14e   : > { %2090 = vmatpush3.bf16.msra.mxu1 %v616_v63  ;;  %v1079_v5 = vpop.permute.xlu1 %1078 }
 0x14f   : > { %1274 = vrot.lane.b32.xlu0 %v2764_v7, %s3722_s24  ;;  %v3115_v19 = vsel %vm355_vm0, %v3010_v23, %v1079_v5  ;;  %2190 = vmatprep.subr.bf16.mxu1 %v3082_v30 }
 0x150   : > { %1162 = vrot.lane.b32.xlu1 %v2764_v7, %s2429_s14  ;;  %2238 = vmatpush3.bf16.msra.mxu0 %v3061_v11 }
 0x151   : > { %2092 = vmatmul.mubr.msk.bf16.vlgmr.msra.gmra.mrb[8].mxu1 %vm669_vm10, %v2939_v29  ;;  %2239 = vmatprep.subr.bf16.mxu0 %v3673_v41 }
 0x152   : > { %v3069_v16 = vpop.permute.xlu1 %1102  ;;  %2192 = vmatpush3.bf16.msra.mxu1 %v3100_v26 }
 0x153   : > { %1286 = vrot.lane.b32.xlu0 %v2744_v62, %s2439_s26  ;;  %2194 = vmatprep.subr.bf16.mxu1 %v3102_v27 }
 0x154   : > { %v3093_v22 = vpop.permute.xlu0 %631  ;;  %1288 = vrot.lane.b32.xlu1 %v2764_v7, %s2439_s26  ;;  %v296_v7 = vld [vmem:[%s3665_s3 + $0xa0] sm:$0xff]  ;;  %2241 = vmatpush3.bf16.msra.mxu0 %v3098_v24 }
 0x155   : > { %v3134_v39 = vpack.c.bf16 %v297_v33, %v296_v7  ;;  %2242 = vmatprep.subr.bf16.mxu0 %v3673_v41  ;;  %v304_v7 = vld [vmem:[%s3665_s3 + $0xe0] sm:$0xff] }
 0x156   : > { %v1093_v35 = vpop.permute.xlu1 %1092  ;;  %2196 = vmatpush3.bf16.msra.mxu1 %v3129_v36 }
 0x157   : > { %1282 = vrot.lane.b32.xlu0 %v2757_v4, %s2439_s26  ;;  %3732 = vst [vmem:[#allocation20_spill] sm:$0xff] %v3134_v39  ;;  %2198 = vmatprep.subr.bf16.mxu1 %v3134_v39 }
 0x158   : > { %v1073_v43 = vpop.permute.xlu0 %1072  ;;  %1294 = vrot.lane.b32.xlu1 %v3115_v19, %s2439_s26  ;;  %2244 = vmatpush3.bf16.msra.mxu0 %v3150_v38 }
 0x159   : > { %v3177_v10 = vsel %vm355_vm0, %v1073_v43, %v2992_v53  ;;  %v3191_v53 = vpack.c.bf16 %v283_v58, %v282_v48  ;;  %v289_v43 = vld [vmem:[%s3665_s3 + $0x68] sm:$0xff]  ;;  %vm2441_vm0 = vmmov 0  }
 0x15a   : > { %v3159_v51 = vpop.permute.xlu1 %1116  ;;  %2200 = vmatpush3.bf16.msra.mxu1 %v3162_v52  ;;  %v3273_v58 = vpack.c.bf16 %v289_v43, %v288_v46 }
 0x15b   : > { %1292 = vrot.lane.b32.xlu0 %v3145_v40, %s2439_s26  ;;  %3736 = vst [vmem:[#allocation24_spill] sm:$0xff] %v3191_v53  ;;  %2202 = vmatprep.subr.bf16.mxu1 %v3167_v54 }
 0x15c   : > { %v1091_v23 = vpop.permute.xlu0 %1090  ;;  %1296 = vrot.lane.b32.xlu1 %v1079_v5, %s2439_s26  ;;  %v284_v5 = vld [vmem:[%s3665_s3 + $0x40] sm:$0xff]  ;;  %3742 = vst [vmem:[#allocation30_spill] sm:$0xff] %v3273_v58 }
 0x15d   : > { %v3188_v63 = vsel %vm370_vm1, %v1091_v23, %v1093_v35  ;;  %v3206_v9 = vsel %vm370_vm1, %v3031_v0, %v1091_v23  ;;  %v3219_v18 = vpack.c.bf16 %v285_v8, %v284_v5 }
 0x15e   : > { %v1107_v1 = vpop.permute.xlu1 %1106  ;;  %2204 = vmatpush3.bf16.msra.mxu1 %v3191_v53 }
 0x15f   : > { %1290 = vrot.lane.b32.xlu0 %v3177_v10, %s2439_s26  ;;  %3738 = vst [vmem:[#allocation26_spill] sm:$0xff] %v3219_v18  ;;  %2206 = vmatprep.subr.bf16.mxu1 %v3196_v2 }
 0x160   : > { %v1087_v13 = vpop.permute.xlu0 %1086  ;;  %1302 = vrot.lane.b32.xlu1 %v3188_v63, %s2439_s26 }
 0x161   : > { %v3234_v28 = vsel %vm370_vm1, %v1087_v13, %v3031_v0  ;;  %vm3746_vm1 = vcmask 957440  }
 0x162   : > { %v3216_v17 = vpop.permute.xlu1 %1130  ;;  %2208 = vmatpush3.bf16.msra.mxu1 %v3219_v18 }
 0x163   : > { %1300 = vrot.lane.b32.xlu0 %v3206_v9, %s2439_s26  ;;  %2210 = vmatprep.subr.bf16.mxu1 %v3224_v20 }
 0x164   : > { %v1105_v34 = vpop.permute.xlu0 %1104  ;;  %1304 = vrot.lane.b32.xlu1 %v1093_v35, %s2439_s26  ;;  %v3256_v35 = vpack.c.bf16 %v305_v32, %v304_v7  ;;  %v290_v7 = vld [vmem:[%s3665_s3 + $0x70] sm:$0xff]  ;;  %v291_v32 = vld [vmem:[%s3665_s3 + $0x78] sm:$0xff] }
 0x165   : > { %v3244_v25 = vsel %vm385_vm2, %v1105_v34, %v1107_v1  ;;  %v3266_v45 = vsel %vm385_vm2, %v3069_v16, %v1105_v34  ;;  %v3308_v34 = vpack.c.bf16 %v307_v37, %v306_v14 }
 0x166   : > { %v1129_v33 = vpop.permute.xlu1 %1128  ;;  %3741 = vst [vmem:[#allocation29_spill] sm:$0xff] %v3256_v35  ;;  %2212 = vmatpush3.bf16.msra.mxu1 %v3247_v31 }
 0x167   : > { %v3251_v0 = vsel %vm415_vm4, %v1129_v33, %v3216_v17  ;;  %1298 = vrot.lane.b32.xlu0 %v3234_v28, %s2439_s26  ;;  %2214 = vmatprep.subr.bf16.mxu1 %v3256_v35  ;;  %3743 = vst [vmem:[#allocation31_spill] sm:$0xff] %v3308_v34  ;;  %v3316_v33 = vpack.c.bf16 %v291_v32, %v290_v7 }
 0x168   : > { %v1101_v49 = vpop.permute.xlu0 %1100  ;;  %1310 = vrot.lane.b32.xlu1 %v3244_v25, %s2439_s26 }
 0x169   : > { %v3280_v23 = vsel %vm385_vm2, %v1101_v49, %v3069_v16  ;;  %3744 = vst [vmem:[#allocation32_spill] sm:$0xff] %v3316_v33  ;;  %v3677_v49 = vmov 0.0   ;;  %vm3747_vm2 = vmmov %vm3746_vm1 }
 0x16a   : > { %v3270_v48 = vpop.permute.xlu1 %1146  ;;  %2216 = vmatpush3.bf16.msra.mxu1 %v3273_v58  ;;  %2127 = vmatprep.mubr.msk.f32.mxu0 %vm2441_vm0, %v3677_v49 }
 0x16b   : > { %1308 = vrot.lane.b32.xlu0 %v3266_v45, %s2439_s26  ;;  %2218 = vmatprep.subr.bf16.mxu1 %v3308_v34 }
 0x16c   : > { %v3282_v56 = vpop.permute.xlu0 %1118  ;;  %1312 = vrot.lane.b32.xlu1 %v1107_v1, %s2439_s26 }
 0x16e   : > { %v3285_v60 = vpop.permute.xlu1 %1158  ;;  %2220 = vmatpush3.bf16.msra.mxu1 %v3316_v33 }
 0x16f   : > { %1306 = vrot.lane.b32.xlu0 %v3280_v23, %s2439_s26  ;;  %1338 = vmatprep.subr.bf16.mxu1 %v2729_v57 }
 0x170   : > { %v1115_v5 = vpop.permute.xlu0 %1114 }
 0x171   : > { %v3292_v8 = vsel %vm400_vm3, %v1115_v5, %v3159_v51 }
 0x172   : > { %v1157_v13 = vpop.permute.xlu1 %1156 }
 0x173   : > { %v3296_v16 = vsel %vm445_vm6, %v1157_v13, %v3285_v60 }
 0x174   : > { %v3321_v46 = vpop.permute.xlu0 %1132 }
 0x176   : > { %v3298_v15 = vpop.permute.xlu1 %1174 }
 0x178   : > { %v3323_v43 = vpop.permute.xlu0 %1144 }
 0x17a   : > { %v1177_v1 = vpop.permute.xlu1 %1176 }
 0x17b   : > { %v1180_v6 = vsel %vm460_vm7, %v3298_v15, %v1177_v1 }
 0x17c   : > { %1989 = vmatprep.subr.bf16.mxu0 %v1180_v6  ;;  %v3327_v5 = vpop.permute.xlu0 %1142 }
 0x17e   : > { %v3335_v14 = vpop.permute.xlu1 %1188 }
 0x180   : > { %v3329_v13 = vpop.permute.xlu0 %1160 }
 0x182   : > { %v3339_v37 = vpop.permute.xlu1 %1190 }
 0x184   : > { %v3331_v1 = vpop.permute.xlu0 %1172 }
 0x186   : > { %v3343_v32 = vpop.permute.xlu1 %1202 }
 0x188   : > { %v3333_v6 = vpop.permute.xlu0 %1170 }
 0x18a   : > { %v3347_v12 = vpop.permute.xlu1 %1204 }
 0x18c   : > { %v3337_v57 = vpop.permute.xlu0 %1186 }
 0x18e   : > { %v3351_v33 = vpop.permute.xlu1 %1216 }
 0x190   : > { %v3341_v7 = vpop.permute.xlu0 %1184 }
 0x192   : > { %v3355_v34 = vpop.permute.xlu1 %1212 }
 0x194   : > { %v3345_v41 = vpop.permute.xlu0 %1200 }
 0x196   : > { %v3359_v24 = vpop.permute.xlu1 %1228 }
 0x198   : > { %v3349_v49 = vpop.permute.xlu0 %1198 }
 0x19c   : > { %v3353_v38 = vpop.permute.xlu0 %1214 }
 0x1a0   : > { %v3357_v58 = vpop.permute.xlu0 %636 }
 0x1a4   : > { %v3361_v35 = vpop.permute.xlu0 %1218 }
 0x1a7   : > { %v3363_v31 = vpop.permute.xlu1 %641 }
 0x1a8   : > { %v3365_v11 = vpop.permute.xlu0 %1230 }
 0x1ab   : > { %v3367_v20 = vpop.permute.xlu1 %1232 }
 0x1ac   : > { %v3369_v18 = vpop.permute.xlu0 %1226 }
 0x1af   : > { %v3371_v3 = vpop.permute.xlu1 %1244 }
 0x1b0   : > { %v3373_v2 = vpop.permute.xlu0 %1242 }
 0x1b3   : > { %v3375_v53 = vpop.permute.xlu1 %1240 }
 0x1b4   : > { %v3377_v61 = vpop.permute.xlu0 %1120 }
 0x1b7   : > { %v3379_v52 = vpop.permute.xlu1 %1256 }
 0x1b8   : > { %v3383_v26 = vpop.permute.xlu0 %1246 }
 0x1bb   : > { %v3387_v47 = vpop.permute.xlu1 %1134 }
 0x203   : > { %v761_v54 = vpop.f32.mrb[0].mxu0 }
 0x204   : > { %v2301_v59 = vadd.f32 %v761_v54, %v3093_v22  ;;  %v763_v39 = vpop.f32.mrb[1].mxu0 }
 0x205   : > { %v2302_v36 = vadd.f32 %v763_v39, %v3093_v22  ;;  %v765_v50 = vpop.f32.mrb[2].mxu0 }
 0x206   : > { %v767_v27 = vpop.f32.mrb[3].mxu0  ;;  %v874_v30 = vmax.f32 %v2301_v59, 0.0  ;;  %v2303_v21 = vadd.f32 %v765_v50, %v3357_v58 }
 0x207   : > { %v875_v42 = vmax.f32 %v2302_v36, 0.0  ;;  %v2304_v29 = vadd.f32 %v767_v27, %v3357_v58  ;;  %v3392_v27 = vpop.permute.xlu0 %1258 }
 0x208   : > { %v877_v39 = vmax.f32 %v2303_v21, 0.0 }
 0x209   : > { %v878_v55 = vmax.f32 %v2304_v29, 0.0  ;;  %947 = vmatprep.mubr.f32.mxu1 %v875_v42 }
 0x20a   : > { %948 = vmatmul.mubr.f32.vlgmr.msra.gmra.mrb[12].mxu1 %v874_v30  ;;  %v3403_v30 = vld [vmem:[%s2600_s27 + $0x4] ss:$12 sps:$4 sm:$0xff]   ;;  %s3780_s27 = sand.u32 1, %s2413_s15   ;;  %s2332_s15 = smul.u32 (%p2499_p5), 24, %s2484_s18 }
 0x20b   : > { %1339 = vmatpush1.bf16.msra.mxu1 %v2757_v4  ;;  %v771_v54 = vpop.f32.mrb[4].mxu0  ;;  %952 = vmatprep.mubr.f32.mxu1 %v878_v55  ;;  %v3396_v4 = vpop.permute.xlu1 %1260  ;;  %s2329_s20 = smul.u32 48, %s3780_s27 }
 0x20c   : > { %v2305_v44 = vadd.f32 %v771_v54, %v3363_v31  ;;  %1340 = vmatprep.subr.bf16.mxu1 %v3145_v40  ;;  %v773_v36 = vpop.f32.mrb[5].mxu0  ;;  %v3399_v21 = vpop.permute.xlu0 %1254  ;;  %s1718_s30 = scalar_lea.vmem (%p2499_p5), %s3666_s4, %s2332_s15 }
 0x20d   : > { %v2306_v50 = vadd.f32 %v773_v36, %v3363_v31  ;;  %v775_v29 = vpop.f32.mrb[6].mxu0  ;;  %v1123_v36 = vsel %vm400_vm3, %v3159_v51, %v3282_v56  ;;  %v1151_v51 = vsel %vm430_vm5, %v3323_v43, %v3270_v48  ;;  %s3613_s28 = scalar_lea.vmem [#allocation3], %s2329_s20 }
 0x20e   : > { %v776_v42 = vpop.f32.mrb[7].mxu0  ;;  %953 = vmatmul.mubr.f32.gmra.mrb[14].mxu1 %v877_v39  ;;  %v880_v55 = vmax.f32 %v2305_v44, 0.0 }
 0x20f   : > { %v881_v59 = vmax.f32 %v2306_v50, 0.0  ;;  %1341 = vmatpush1.bf16.msra.mxu1 %v3177_v10  ;;  %v3407_v10 = vpop.permute.xlu1 %1272 }
 0x210   : > { %1342 = vmatprep.subr.bf16.mxu1 %v3206_v9  ;;  %v3413_v50 = vpop.permute.xlu0 %1270 }
 0x211   : > { %957 = vmatprep.mubr.f32.mxu1 %v881_v59 }
 0x212   : > { %958 = vmatmul.mubr.f32.gmra.mrb[16].mxu1 %v880_v55 }
 0x213   : > { %1343 = vmatpush1.bf16.msra.mxu1 %v3234_v28  ;;  %1370 = vmatprep.mubr.bf16.mxu1 %v3403_v30  ;;  %v3419_v29 = vpop.permute.xlu1 %1268 }
 0x214   : > { %1344 = vmatprep.subr.bf16.mxu1 %v3266_v45  ;;  %v1911_v40 = vpop.f32.mrb[0].mxu1  ;;  %v1137_v45 = vsel %vm415_vm4, %v3216_v17, %v3321_v46  ;;  %v1150_v17 = vsel %vm430_vm5, %v3327_v5, %v3323_v43 }
 0x215   : > { %v1912_v54 = vpop.f32.mrb[1].mxu1 }
 0x216   : > { %v1913_v39 = vadd.f32 %v1912_v54, %v1911_v40  ;;  %v1914_v44 = vpop.f32.mrb[2].mxu1  ;;  %v3421_v40 = vpop.permute.xlu0 %1148 }
 0x217   : > { %1345 = vmatpush1.bf16.msra.mxu1 %v3280_v23  ;;  %v1915_v9 = vpop.f32.mrb[3].mxu1  ;;  %v3430_v54 = vpop.permute.xlu1 %1284 }
 0x218   : > { %v1916_v28 = vadd.f32 %v1915_v9, %v1914_v44  ;;  %1346 = vmatprep.subr.bf16.mxu1 %v1123_v36  ;;  %v1165_v9 = vsel %vm445_vm6, %v3285_v60, %v3329_v13 }
 0x21a   : > { %v3432_v44 = vpop.permute.xlu0 %1274  ;;  %v816_v43 = vadd.f32 %v1916_v28, %v3357_v58 }
 0x21b   : > { %1347 = vmatpush1.bf16.msra.mxu1 %v3292_v8  ;;  %v3444_v60 = vpop.permute.xlu1 %1162 }
 0x21c   : > { %1348 = vmatprep.subr.bf16.mxu1 %v1137_v45  ;;  %v1917_v42 = vpop.f32.mrb[4].mxu1  ;;  %v813_v45 = vadd.f32 %v1913_v39, %v3093_v22  ;;  %v1178_v39 = vsel %vm460_vm7, %v3333_v6, %v3331_v1  ;;  %v1207_v6 = vsel %vm490_vm9, %v3345_v41, %v3343_v32 }
 0x21d   : > { %v1918_v23 = vpop.f32.mrb[5].mxu1 }
 0x21e   : > { %v1919_v59 = vadd.f32 %v1918_v23, %v1917_v42  ;;  %v1920_v55 = vpop.f32.mrb[6].mxu1 }
 0x21f   : > { %1349 = vmatpush1.bf16.msra.mxu1 %v3251_v0  ;;  %v1921_v8 = vpop.f32.mrb[7].mxu1  ;;  %v3458_v28 = vpop.permute.xlu1 %1288 }
 0x220   : > { %1350 = vmatprep.subr.bf16.mxu1 %v1151_v51  ;;  %v821_v0 = vadd.f32 %v1919_v59, %v3363_v31  ;;  %v1179_v8 = vsel %vm460_vm7, %v3331_v1, %v3298_v15  ;;  %v1194_v15 = vsel %vm475_vm8, %v3335_v14, %v3339_v37  ;;  %vm3748_vm7 = vmmov %vm3746_vm1 }
 0x223   : > { %1351 = vmatpush1.bf16.msra.mxu1 %v1150_v17 }
 0x224   : > { %1352 = vmatprep.subr.bf16.mxu1 %v1165_v9  ;;  %v2093_v36 = vpop.f32.mrb[8].mxu1  ;;  %v3446_v9 = vpop.permute.xlu0 %1286 }
 0x225   : > { %v869_v42 = vadd.f32 %v2093_v36, %v821_v0  ;;  %v860_v23 = vpop.f32.mrb[9].mxu1  ;;  %v3745_v36 = vmov 0.0  }
 0x226   : > { %v861_v55 = vadd.f32 %v860_v23, %v813_v45  ;;  %v2094_v51 = vpop.f32.mrb[10].mxu1 }
 0x227   : > { %1353 = vmatpush1.bf16.msra.mxu1 %v3296_v16  ;;  %v863_v5 = vpop.f32.mrb[11].mxu1  ;;  %v1193_v16 = vsel %vm475_vm8, %v3337_v57, %v3335_v14  ;;  %v1208_v14 = vsel %vm490_vm9, %v3343_v32, %v3347_v12  ;;  %v882_v37 = vmax.f32 %v869_v42, 0.0  ;;  %v1221_v12 = vsel %vm3746_vm1, %v3353_v38, %v3351_v33  ;;  %v3751_v51 = vld [vmem:[#allocation6_spill] sm:$0xff] }
 0x228   : > { %v876_v59 = vmax.f32 %v861_v55, 0.0  ;;  %v864_v17 = vadd.f32 %v863_v5, %v816_v43  ;;  %1354 = vmatprep.subr.bf16.mxu1 %v1179_v8  ;;  %v3465_v1 = vpop.permute.xlu0 %1282 }
 0x22a   : > { %2128 = vmatmul.mubr.f32.vlgmr.msra.gmra.mrb[8].mxu0 %v876_v59  ;;  %v879_v0 = vmax.f32 %v864_v17, 0.0  ;;  %v3753_v59 = vld [vmem:[#allocation7_spill] sm:$0xff] }
 0x22b   : > { %1355 = vmatpush1.bf16.msra.mxu1 %v1178_v39  ;;  %1990 = vmatpush3.bf16.msra.mxu0 %v2744_v62  ;;  %v1192_v62 = vsel %vm475_vm8, %v3341_v7, %v3337_v57  ;;  %v1206_v57 = vsel %vm490_vm9, %v3349_v49, %v3345_v41  ;;  %v3479_v7 = vpop.permute.xlu1 %1294  ;;  %v1220_v41 = vsel %vm3748_vm7, %v3355_v34, %v3353_v38  ;;  %v3755_v39 = vld [vmem:[#allocation15_spill] sm:$0xff] }
 0x22c   : > { %1356 = vmatprep.subr.bf16.mxu1 %v1193_v16  ;;  %1991 = vmatprep.subr.bf16.mxu0 %v1194_v15  ;;  %v1293_v32 = vpop.permute.xlu0 %1292  ;;  %v1234_v49 = vsel %vm520_vm11, %v3369_v18, %v3359_v24  ;;  %v1124_v38 = vsel %vm400_vm3, %v3282_v56, %v3377_v61  ;;  %v1249_v34 = vsel %vm535_vm12, %v3373_v2, %v3371_v3  ;;  %v3756_v16 = vld [vmem:[#allocation8_spill] sm:$0xff]  ;;  %v3757_v15 = vld [vmem:[#allocation9_spill] sm:$0xff]  ;;  %vm1043_vm3 = vcmask 195584  }
 0x22d   : > { %2130 = vmatprep.mubr.msk.f32.mxu0 %vm2441_vm0, %v3745_v36  ;;  %v1138_v61 = vsel %vm415_vm4, %v3321_v46, %v3387_v47  ;;  %v1152_v47 = vsel %vm430_vm5, %v3270_v48, %v3421_v40  ;;  %v1278_v56 = vsel %vm565_vm14, %v3407_v10, %v3432_v44  ;;  %v1166_v48 = vsel %vm445_vm6, %v3329_v13, %v3444_v60  ;;  %v3750_v44 = vld [vmem:[#allocation5_spill] sm:$0xff] }
 0x22e   : > { %2131 = vmatmul.mubr.f32.gmra.mrb[10].mxu0 %v879_v0  ;;  %v1318_v13 = vsel %vm604_vm15, %v1293_v32, %v3479_v7  ;;  %v3752_v60 = vmov 0   ;;  %v3759_v0 = vld [vmem:[#allocation18_spill] sm:$0xff]  ;;  %vm1046_vm4 = vcmask 191488  }
 0x22f   : > { %1357 = vmatpush1.bf16.msra.mxu1 %v1192_v62  ;;  %1992 = vmatpush3.bf16.msra.mxu0 %v3115_v19  ;;  %v1222_v19 = vsel %vm3747_vm2, %v3351_v33, %v3361_v35  ;;  %v1236_v35 = vsel %vm520_vm11, %v3365_v11, %v3367_v20  ;;  %v1297_v33 = vpop.permute.xlu1 %1296  ;;  %v1263_v20 = vsel %vm550_vm13, %v3379_v52, %v3392_v27  ;;  %v3760_v62 = vld [vmem:[#allocation10_spill] sm:$0xff] }
 0x230   : > { %1358 = vmatprep.subr.bf16.mxu1 %v1207_v6  ;;  %1993 = vmatprep.subr.bf16.mxu0 %v1208_v14  ;;  %v3762_v6 = vld [vmem:[#allocation20_spill] sm:$0xff]  ;;  %v3763_v14 = vld [vmem:[#allocation11_spill] sm:$0xff] }
 0x231   : > { %2133 = vmatprep.mubr.msk.f32.mxu0 %vm2441_vm0, %v3745_v36 }
 0x232   : > { %2134 = vmatmul.mubr.f32.gmra.mrb[12].mxu0 %v882_v37  ;;  %v3764_v37 = vld [vmem:[#allocation22_spill] sm:$0xff] }
 0x233   : > { %1359 = vmatpush1.bf16.msra.mxu1 %v1206_v57  ;;  %1994 = vmatpush3.bf16.msra.mxu0 %v3188_v63  ;;  %v1235_v63 = vsel %vm520_vm11, %v3359_v24, %v3365_v11  ;;  %v1250_v11 = vsel %vm535_vm12, %v3371_v3, %v3383_v26  ;;  %v1248_v24 = vsel %vm535_vm12, %v3375_v53, %v3373_v2  ;;  %v1303_v18 = vpop.permute.xlu1 %1302  ;;  %v3765_v57 = vld [vmem:[#allocation23_spill] sm:$0xff] }
 0x234   : > { %1360 = vmatprep.subr.bf16.mxu1 %v1221_v12  ;;  %1995 = vmatprep.subr.bf16.mxu0 %v1222_v19  ;;  %v1264_v3 = vsel %vm550_vm13, %v3392_v27, %v3396_v4  ;;  %v1262_v53 = vsel %vm550_vm13, %v3399_v21, %v3379_v52  ;;  %v1277_v2 = vsel %vm565_vm14, %v3413_v50, %v3407_v10  ;;  %v3767_v12 = vld [vmem:[#allocation24_spill] sm:$0xff]  ;;  %v3768_v19 = vld [vmem:[#allocation25_spill] sm:$0xff] }
 0x235   : > { %1472 = vmatprep.mubr.bf16.mxu0 %v3403_v30  ;;  %v1276_v52 = vsel %vm565_vm14, %v3419_v29, %v3413_v50  ;;  %v1315_v4 = vsel %vm604_vm15, %v3430_v54, %v3446_v9  ;;  %v1316_v21 = vsel %vm604_vm15, %v3446_v9, %v3458_v28  ;;  %v1314_v30 = vsel %vm604_vm15, %v3465_v1, %v3430_v54  ;;  %v3749_v50 = vld [vmem:[#allocation4_spill] sm:$0xff]  ;;  %v3758_v28 = vld [vmem:[#allocation17_spill] sm:$0xff]  ;;  %v3761_v1 = vld [vmem:[#allocation19_spill] sm:$0xff] }
 0x236   : > { %v1319_v29 = vsel %vm604_vm15, %v3479_v7, %v1297_v33  ;;  %v3754_v9 = vmov 0.0|0.0   ;;  %v3766_v7 = vld [vmem:[#allocation12_spill] sm:$0xff] }
 0x237   : > { %1361 = vmatpush1.bf16.msra.mxu1 %v1220_v41  ;;  %1996 = vmatpush3.bf16.msra.mxu0 %v3244_v25  ;;  %v1291_v25 = vpop.permute.xlu0 %1290  ;;  %v1305_v46 = vpop.permute.xlu1 %1304  ;;  %v3770_v41 = vld [vmem:[#allocation26_spill] sm:$0xff]  ;;  %v3773_v33 = vld [vmem:[#allocation28_spill] sm:$0xff] }
 0x238   : > { %1362 = vmatprep.subr.bf16.mxu1 %v1235_v63  ;;  %1997 = vmatprep.subr.bf16.mxu0 %v1236_v35  ;;  %v1317_v54 = vsel %vm604_vm15, %v1291_v25, %v1293_v32  ;;  %v1322_v42 = vsel %vm604_vm15, %v1303_v18, %v1305_v46  ;;  %v3769_v32 = vld [vmem:[#allocation13_spill] sm:$0xff]  ;;  %v3771_v63 = vld [vmem:[#allocation27_spill] sm:$0xff]  ;;  %v3772_v35 = vld [vmem:[#allocation14_spill] sm:$0xff] }
 0x239   : > { %v3776_v25 = vld [vmem:[#allocation30_spill] sm:$0xff] }
 0x23b   : > { %1363 = vmatpush1.bf16.msra.mxu1 %v1234_v49  ;;  %1998 = vmatpush3.bf16.msra.mxu0 %v1124_v38  ;;  %v1301_v26 = vpop.permute.xlu0 %1300  ;;  %v1311_v10 = vpop.permute.xlu1 %1310  ;;  %v3774_v49 = vld [vmem:[#allocation29_spill] sm:$0xff]  ;;  %v3775_v38 = vld [vmem:[#allocation16_spill] sm:$0xff] }
 0x23c   : > { %1364 = vmatprep.subr.bf16.mxu1 %v1249_v34  ;;  %1999 = vmatprep.subr.bf16.mxu0 %v1250_v11  ;;  %v1321_v45 = vsel %vm604_vm15, %v1301_v26, %v1303_v18  ;;  %v3777_v34 = vld [vmem:[#allocation31_spill] sm:$0xff]  ;;  %v3778_v11 = vld [vmem:[#allocation21_spill] sm:$0xff] }
 0x23f   : > { %1365 = vmatpush1.bf16.msra.mxu1 %v1248_v24  ;;  %2000 = vmatpush3.bf16.msra.mxu0 %v1138_v61  ;;  %v1299_v27 = vpop.permute.xlu0 %1298  ;;  %v1313_v23 = vpop.permute.xlu1 %1312  ;;  %v3779_v24 = vld [vmem:[#allocation32_spill] sm:$0xff] }
 0x240   : > { %1366 = vmatprep.subr.bf16.mxu1 %v1263_v20  ;;  %2001 = vmatprep.subr.bf16.mxu0 %v1264_v3  ;;  %v1320_v55 = vsel %vm604_vm15, %v1299_v27, %v1301_v26  ;;  %v1325_v8 = vsel %vm604_vm15, %v1311_v10, %v1313_v23 }
 0x243   : > { %1367 = vmatpush1.bf16.msra.mxu1 %v1262_v53  ;;  %2002 = vmatpush3.bf16.msra.mxu0 %v1152_v47  ;;  %v1309_v40 = vpop.permute.xlu0 %1308 }
 0x244   : > { %1368 = vmatprep.subr.bf16.mxu1 %v1277_v2  ;;  %2003 = vmatprep.subr.bf16.mxu0 %v1278_v56  ;;  %v1324_v5 = vsel %vm604_vm15, %v1309_v40, %v1311_v10 }
 0x247   : > { %1369 = vmatpush1.bf16.msra.mxu1 %v1276_v52  ;;  %2004 = vmatpush3.bf16.msra.mxu0 %v1166_v48  ;;  %v1307_v43 = vpop.permute.xlu0 %1306 }
 0x248   : > { %1389 = vmatprep.subr.bf16.mxu1 %v1315_v4  ;;  %2136 = vmatprep.subr.bf16.mxu0 %v1316_v21  ;;  %v1323_v17 = vsel %vm604_vm15, %v1307_v43, %v1309_v40 }
 0x24a   : > { %1371 = vmatmul.mubr.bf16.vlgmr.msra.gmra.mrb[20].mxu1 %v3749_v50  ;;  %1473 = vmatmul.mubr.bf16.vlgmr.msra.gmra.mrb[16].mxu0 %v3749_v50 }
 0x24b   : > { %1390 = vmatpush1.bf16.msra.mxu1 %v1314_v30  ;;  %2137 = vmatpush3.bf16.msra.mxu0 %v1316_v21 }
 0x24c   : > { %1391 = vmatprep.subr.bf16.mxu1 %v1318_v13  ;;  %2138 = vmatprep.subr.bf16.mxu0 %v1319_v29 }
 0x24d   : > { %1380 = vmatprep.mubr.bf16.mxu1 %v3750_v44  ;;  %1480 = vmatprep.mubr.bf16.mxu0 %v3750_v44 }
 0x24f   : > { %1392 = vmatpush1.bf16.msra.mxu1 %v1317_v54  ;;  %2139 = vmatpush3.bf16.msra.mxu0 %v1319_v29 }
 0x250   : > { %1393 = vmatprep.subr.bf16.mxu1 %v1321_v45  ;;  %2140 = vmatprep.subr.bf16.mxu0 %v1322_v42 }
 0x252   : > { %1381 = vmatmul.mubr.bf16.gmra.mrb[24].mxu1 %v3751_v51  ;;  %1481 = vmatmul.mubr.bf16.gmra.mrb[20].mxu0 %v3751_v51 }
 0x253   : > { %1394 = vmatpush1.bf16.msra.mxu1 %v1320_v55  ;;  %2141 = vmatpush3.bf16.msra.mxu0 %v1322_v42 }
 0x254   : > { %1395 = vmatprep.subr.bf16.mxu1 %v1324_v5  ;;  %2142 = vmatprep.subr.bf16.mxu0 %v1325_v8 }
 0x255   : > { %1421 = vmatprep.mubr.bf16.mxu1 %v3752_v60  ;;  %2144 = vmatprep.mubr.msk.bf16.mxu0 %vm669_vm10, %v3753_v59 }
 0x257   : > { %1396 = vmatpush1.bf16.msra.mxu1 %v1323_v17  ;;  %2143 = vmatpush3.bf16.msra.mxu0 %v1325_v8 }
 0x258   : > { %2277 = vmatprep.subr.bf16.mxu1 %v3754_v9  ;;  %2246 = vmatprep.subr.bf16.mxu0 %v3755_v39 }
 0x25a   : > { %1884 = vmatmul.mubr.msk.bf16.vlgmr.msra.gmra.mrb[20].mxu1 %vm669_vm10, %v3753_v59  ;;  %2145 = vmatmul.mubr.msk.bf16.vlgmr.msra.gmra.mrb[24].mxu0 %vm669_vm10, %v3756_v16 }
 0x25b   : > { %1431 = vmatprep.mubr.bf16.mxu1 %v3752_v60  ;;  %2279 = vmatpush3.bf16.msra.mxu1 %v3757_v15 }
 0x25c   : > { %2248 = vmatpush3.bf16.msra.mxu0 %v3758_v28  ;;  %2280 = vmatprep.subr.bf16.mxu1 %v3754_v9 }
 0x25d   : > { %2250 = vmatprep.subr.bf16.mxu0 %v3759_v0 }
 0x25f   : > { %2282 = vmatpush3.bf16.msra.mxu1 %v3760_v62 }
 0x260   : > { %2252 = vmatpush3.bf16.msra.mxu0 %v3761_v1  ;;  %2283 = vmatprep.subr.bf16.mxu1 %v3754_v9 }
 0x261   : > { %2254 = vmatprep.subr.bf16.mxu0 %v3762_v6 }
 0x262   : > { %1885 = vmatmul.mubr.msk.bf16.gmra.mrb[24].mxu1 %vm669_vm10, %v3756_v16 }
 0x263   : > { %2285 = vmatpush3.bf16.msra.mxu1 %v3763_v14  ;;  %2180 = vmatprep.mubr.msk.f32.mxu1 %vm2441_vm0, %v3745_v36 }
 0x264   : > { %2256 = vmatpush3.bf16.msra.mxu0 %v3764_v37  ;;  %2286 = vmatprep.subr.bf16.mxu1 %v3754_v9 }
 0x265   : > { %2258 = vmatprep.subr.bf16.mxu0 %v3765_v57 }
 0x267   : > { %2288 = vmatpush3.bf16.msra.mxu1 %v3766_v7 }
 0x268   : > { %2260 = vmatpush3.bf16.msra.mxu0 %v3767_v12  ;;  %2289 = vmatprep.subr.bf16.mxu1 %v3754_v9 }
 0x269   : > { %2262 = vmatprep.subr.bf16.mxu0 %v3768_v19 }
 0x26b   : > { %2291 = vmatpush3.bf16.msra.mxu1 %v3769_v32 }
 0x26c   : > { %2264 = vmatpush3.bf16.msra.mxu0 %v3770_v41  ;;  %2292 = vmatprep.subr.bf16.mxu1 %v3754_v9 }
 0x26d   : > { %2266 = vmatprep.subr.bf16.mxu0 %v3771_v63 }
 0x26f   : > { %2294 = vmatpush3.bf16.msra.mxu1 %v3772_v35 }
 0x270   : > { %2268 = vmatpush3.bf16.msra.mxu0 %v3773_v33  ;;  %2295 = vmatprep.subr.bf16.mxu1 %v3754_v9 }
 0x271   : > { %2270 = vmatprep.subr.bf16.mxu0 %v3774_v49 }
 0x273   : > { %2297 = vmatpush3.bf16.msra.mxu1 %v3775_v38 }
 0x274   : > { %2272 = vmatpush3.bf16.msra.mxu0 %v3776_v25  ;;  %2298 = vmatprep.subr.bf16.mxu1 %v3754_v9 }
 0x275   : > { %2274 = vmatprep.subr.bf16.mxu0 %v3777_v34 }
 0x277   : > { %2300 = vmatpush3.bf16.msra.mxu1 %v3778_v11 }
 0x278   : > { %2276 = vmatpush3.bf16.msra.mxu0 %v3779_v24 }
 0x2dd   : > { %v1961_v61 = vpop.f32.mrb[12].mxu1 }
 0x2de   : > { %v1962_v18 = vpop.f32.mrb[13].mxu1 }
 0x2df   : > { %v1963_v20 = vadd.f32 %v1962_v18, %v1961_v61 }
 0x2e1   : > { %v1964_v3 = vpop.f32.mrb[14].mxu1 }
 0x2e2   : > { %v1965_v26 = vpop.f32.mrb[15].mxu1 }
 0x2e3   : > { %v1966_v53 = vadd.f32 %v1965_v26, %v1964_v3 }
 0x2e5   : > { %v1967_v47 = vpop.f32.mrb[16].mxu1 }
 0x2e6   : > { %v1968_v2 = vpop.f32.mrb[17].mxu1 }
 0x2e7   : > { %v1969_v56 = vadd.f32 %v1968_v2, %v1967_v47 }
 0x2fd   : > { %v1029_v46 = vpop.f32.mrb[8].mxu0 }
 0x2fe   : > { %v1030_v52 = vadd.f32 %v1963_v20, %v1029_v46  ;;  %v2129_v48 = vpop.f32.mrb[9].mxu0 }
 0x300   : > { %1044 = vst.msk [vmem:[%s3613_s28] sm:$0xff] %vm1043_vm3, %v1030_v52 }
 0x301   : > { %v1034_v27 = vpop.f32.mrb[10].mxu0 }
 0x302   : > { %v1035_v4 = vadd.f32 %v1966_v53, %v1034_v27  ;;  %v2132_v21 = vpop.f32.mrb[11].mxu0 }
 0x304   : > { %1045 = vst.msk [vmem:[%s3613_s28 + $0x8] sm:$0xff] %vm1043_vm3, %v1035_v4 }
 0x305   : > { %v1039_v30 = vpop.f32.mrb[12].mxu0 }
 0x306   : > { %v1040_v10 = vadd.f32 %v1969_v56, %v1039_v30  ;;  %v2135_v50 = vpop.f32.mrb[13].mxu0 }
 0x308   : > { %1047 = vst.msk [vmem:[%s3613_s28 + $0x10] sm:$0xf] %vm1046_vm4, %v1040_v10  ;;  %v1756_v10 = vld [vmem:[%s3613_s28] sm:$0xff] (%p2499_p5) }
 0x309   : > { %1757 = vst [vmem:[%s1718_s30] sm:$0xff] (%p2499_p5), %v1756_v10 }
 0x30b   : > { %v1758_v50 = vld [vmem:[%s3613_s28 + $0x8] sm:$0xff] (%p2499_p5) }
 0x30c   : > { %1759 = vst [vmem:[%s1718_s30 + $0x8] sm:$0xff] (%p2499_p5), %v1758_v50 }
 0x31d   : > { %v2005_v13 = vpop.f32.mrb[16].mxu0 }
 0x31e   : > { %v2006_v29 = vpop.f32.mrb[17].mxu0 }
 0x31f   : > { %v2007_v40 = vadd.f32 %v2006_v29, %v2005_v13  ;;  %v2008_v44 = vpop.f32.mrb[18].mxu0  ;;  %v1760_v13 = vld [vmem:[%s3613_s28 + $0x10] sm:$0xff] (%p2499_p5) }
 0x320   : > { %v2009_v54 = vpop.f32.mrb[19].mxu0  ;;  %1761 = vst [vmem:[%s1718_s30 + $0x10] sm:$0xff] (%p2499_p5), %v1760_v13 }
 0x321   : > { %v2010_v45 = vadd.f32 %v2009_v54, %v2008_v44  ;;  %v1475_v59 = vadd.f32 %v2007_v40, %v3093_v22 }
 0x323   : > { %v1478_v1 = vadd.f32 %v2010_v45, %v3357_v58 }
 0x325   : > { %v2011_v42 = vpop.f32.mrb[20].mxu0 }
 0x326   : > { %v2012_v23 = vpop.f32.mrb[21].mxu0 }
 0x327   : > { %v2013_v55 = vadd.f32 %v2012_v23, %v2011_v42  ;;  %v2014_v51 = vpop.f32.mrb[22].mxu0 }
 0x328   : > { %v2015_v43 = vpop.f32.mrb[23].mxu0 }
 0x329   : > { %v1483_v5 = vadd.f32 %v2013_v55, %v3363_v31 }
 0x32d   : > { %v1423_v8 = vpop.f32.mrb[20].mxu1  ;;  %v2146_v60 = vpop.f32.mrb[24].mxu0 }
 0x32e   : > { %v2307_v17 = vadd.f32 %v1423_v8, %v3093_v22  ;;  %v1531_v9 = vadd.f32 %v2146_v60, %v1483_v5  ;;  %v1425_v39 = vpop.f32.mrb[21].mxu1  ;;  %v1522_v16 = vpop.f32.mrb[25].mxu0 }
 0x32f   : > { %v2308_v15 = vadd.f32 %v1425_v39, %v3093_v22  ;;  %v1523_v28 = vadd.f32 %v1522_v16, %v1475_v59  ;;  %v1427_v0 = vpop.f32.mrb[22].mxu1  ;;  %v2147_v62 = vpop.f32.mrb[26].mxu0 }
 0x330   : > { %v1429_v6 = vpop.f32.mrb[23].mxu1  ;;  %v1525_v14 = vpop.f32.mrb[27].mxu0  ;;  %v1536_v19 = vmax.f32 %v2307_v17, 0.0  ;;  %v2309_v32 = vadd.f32 %v1427_v0, %v3357_v58 }
 0x331   : > { %v1537_v37 = vmax.f32 %v2308_v15, 0.0  ;;  %v1538_v57 = vmax.f32 %v1523_v28, 0.0  ;;  %v2310_v7 = vadd.f32 %v1429_v6, %v3357_v58  ;;  %v1526_v12 = vadd.f32 %v1525_v14, %v1478_v1 }
 0x332   : > { %v1539_v35 = vmax.f32 %v2309_v32, 0.0  ;;  %v1544_v58 = vmax.f32 %v1531_v9, 0.0 }
 0x333   : > { %v1540_v41 = vmax.f32 %v2310_v7, 0.0  ;;  %1609 = vmatprep.mubr.f32.mxu0 %v1537_v37  ;;  %2181 = vmatmul.mubr.f32.vlgmr.msra.gmra.mrb[18].mxu1 %v1538_v57  ;;  %v1541_v22 = vmax.f32 %v1526_v12, 0.0 }
 0x334   : > { %1610 = vmatmul.mubr.f32.vlgmr.msra.gmra.mrb[14].mxu0 %v1536_v19  ;;  %2183 = vmatprep.mubr.msk.f32.mxu1 %vm2441_vm0, %v3745_v36 }
 0x335   : > { %v1433_v63 = vpop.f32.mrb[24].mxu1  ;;  %1614 = vmatprep.mubr.f32.mxu0 %v1540_v41 }
 0x336   : > { %v2311_v33 = vadd.f32 %v1433_v63, %v3363_v31  ;;  %v1435_v49 = vpop.f32.mrb[25].mxu1 }
 0x337   : > { %v2312_v38 = vadd.f32 %v1435_v49, %v3363_v31  ;;  %v1437_v25 = vpop.f32.mrb[26].mxu1  ;;  %2184 = vmatmul.mubr.f32.gmra.mrb[28].mxu1 %v1541_v22 }
 0x338   : > { %v1438_v34 = vpop.f32.mrb[27].mxu1  ;;  %1615 = vmatmul.mubr.f32.gmra.mrb[28].mxu0 %v1539_v35  ;;  %2186 = vmatprep.mubr.msk.f32.mxu1 %vm2441_vm0, %v3745_v36  ;;  %v1542_v24 = vmax.f32 %v2311_v33, 0.0 }
 0x339   : > { %v1543_v11 = vmax.f32 %v2312_v38, 0.0 }
 0x33b   : > { %1619 = vmatprep.mubr.f32.mxu0 %v1543_v11  ;;  %2187 = vmatmul.mubr.f32.gmra.mrb[30].mxu1 %v1544_v58 }
 0x33c   : > { %1620 = vmatmul.mubr.f32.gmra.mrb[30].mxu0 %v1542_v24 }
 0x406   : > { %v1691_v61 = vpop.f32.mrb[18].mxu1 }
 0x407   : > { %v2055_v18 = vpop.f32.mrb[14].mxu0  ;;  %v2182_v20 = vpop.f32.mrb[19].mxu1 }
 0x408   : > { %v2056_v3 = vpop.f32.mrb[15].mxu0 }
 0x409   : > { %v2057_v31 = vadd.f32 %v2056_v3, %v2055_v18 }
 0x40a   : > { %v1696_v26 = vpop.f32.mrb[28].mxu1 }
 0x40b   : > { %v1692_v53 = vadd.f32 %v2057_v31, %v1691_v61  ;;  %v2058_v47 = vpop.f32.mrb[28].mxu0  ;;  %v2185_v2 = vpop.f32.mrb[29].mxu1 }
 0x40c   : > { %v2059_v56 = vpop.f32.mrb[29].mxu0 }
 0x40d   : > { %1888 = vst.msk [vmem:[%s3613_s28 + $0x18] sm:$0xff] %vm1043_vm3, %v1692_v53  ;;  %v2060_v36 = vadd.f32 %v2059_v56, %v2058_v47 }
 0x40e   : > { %v1701_v46 = vpop.f32.mrb[30].mxu1 }
 0x40f   : > { %v1697_v52 = vadd.f32 %v2060_v36, %v1696_v26  ;;  %v2061_v48 = vpop.f32.mrb[30].mxu0  ;;  %v2188_v27 = vpop.f32.mrb[31].mxu1  ;;  %1715 = sbr.rel (!%p2499_p5) target bundleno = 1054 (0x41e), region = 63 }
 0x410   : > { %v2062_v4 = vpop.f32.mrb[31].mxu0 }
 0x411   : > { %1889 = vst.msk [vmem:[%s3613_s28 + $0x20] sm:$0xff] %vm1043_vm3, %v1697_v52  ;;  %v2063_v21 = vadd.f32 %v2062_v4, %v2061_v48 }
 0x413   : > { %v1702_v30 = vadd.f32 %v2063_v21, %v1701_v46 }
 0x414   : > { %v1762_v29 = vld [vmem:[%s3613_s28 + $0x18] sm:$0xff] (%p2499_p5) }
 0x415   : > { %1890 = vst.msk [vmem:[%s3613_s28 + $0x28] sm:$0xf] %vm1046_vm4, %v1702_v30  ;;  %1763 = vst [vmem:[%s1718_s30 + $0x30] sm:$0xff] (%p2499_p5), %v1762_v29 }
 0x418   : > { %v1764_v40 = vld [vmem:[%s3613_s28 + $0x20] sm:$0xff] }
 0x419   : > { %1765 = vst [vmem:[%s1718_s30 + $0x38] sm:$0xff] %v1764_v40 }
 0x41c   : > { %v1766_v44 = vld [vmem:[%s3613_s28 + $0x28] sm:$0xff] }
 0x41d   : > { %1767 = vst [vmem:[%s1718_s30 + $0x40] sm:$0xff] %v1766_v44 }
 0x41e PF: > { %p11_p11 = scmp.ge.s32.totalorder %s2487_s19, 4   ;;  %s3781_s15 = smov %s2417_s16 }
 0x41f   : > { %s3782_s16 = smov %s2497_s22  ;;  %s3783_s17 = smov %s2487_s19 }
 0x420   :  { %13 = sbr.rel (!%p11_p11) target bundleno = 2 (0x2), region = 140 }

</bundles_post_ra>
